<compile_context>
chip_gen: v5e
topology: v5e:2x2
jax: 0.10.0
libtpu: 0.0.40
codegen_flags: <defaults>
</compile_context>

<pallas_src>
import jax
import jax.numpy as jnp
from jax.experimental import pallas as pl
from jax.experimental.pallas import tpu as pltpu

DIM = 16          # args.dim
N_TRIPLES = 8     # triples per head-set
N_LAYER = 2       # hard-coded `self.n_layer = 2` in __init__
SSL_TEMP = 0.05
KGE_WEIGHT = 1e-8
_VMEM_LIMIT = 32 * 1024 * 1024   # explicit scoped-VMEM limit, safe on all gens
# agg == 'concat' (the only branch `predict` implements)


def _round_up(n, m):
    return ((n + m - 1) // m) * m


# --------------------------------------------------------------------------
# 1) Fused knowledge attention (all sets / layers / batch rows in one call)
# --------------------------------------------------------------------------
def _attention_kernel(hp_ref, t_ref, w1_ref, w2_ref, o_ref):
    """One row-tile of the fused attention.

    hp (tile, T, 2d) = [h | p] (pre-concatenated), t (tile, T, d),
    w1 (2d, d) stacked [W1h; W1p], w2 (1, d), out (tile, d).
    att = sigmoid(sigmoid(hp @ W1) . w2); softmax over T; out = sum_T att*t.
    """
    tile, T, d2 = hp_ref.shape
    d = t_ref.shape[-1]
    hp2 = hp_ref[...].reshape(tile * T, d2)                      # sublane-merge, no-op
    hid = jax.nn.sigmoid(
        jnp.dot(hp2, w1_ref[...], preferred_element_type=jnp.float32))   # (tile*T, d)
    hid3 = hid.reshape(tile, T, d)
    att = jax.nn.sigmoid(jnp.sum(hid3 * w2_ref[...], axis=-1))   # (tile, T)
    # softmax over the triple axis (torch dim=-1)
    m = jnp.max(att, axis=-1, keepdims=True)
    ex = jnp.exp(att - m)
    w = ex * pl.reciprocal(jnp.sum(ex, axis=-1, keepdims=True), approx=True)
    o_ref[...] = jnp.sum(w[:, :, None] * t_ref[...], axis=1)     # (tile, d)


def fused_knowledge_attention(hp_all, t_all, w1, w2, *, row_tile=256):
    """All (set, layer, batch) attention problems in a single pallas_call."""
    N, T, d2 = hp_all.shape
    d = t_all.shape[-1]
    tile = row_tile if N >= row_tile else _round_up(N, 8)
    Np = _round_up(N, tile)
    if Np != N:
        padw = ((0, Np - N), (0, 0), (0, 0))
        hp_all = jnp.pad(hp_all, padw)
        t_all = jnp.pad(t_all, padw)
    out = pl.pallas_call(
        _attention_kernel,
        out_shape=jax.ShapeDtypeStruct((Np, d), jnp.float32),
        grid=(Np // tile,),
        in_specs=[
            pl.BlockSpec((tile, T, d2), lambda r: (r, 0, 0)),
            pl.BlockSpec((tile, T, d), lambda r: (r, 0, 0)),
            pl.BlockSpec((d2, d), lambda r: (0, 0)),
            pl.BlockSpec((1, d), lambda r: (0, 0)),
        ],
        out_specs=pl.BlockSpec((tile, d), lambda r: (r, 0)),
        compiler_params=pltpu.CompilerParams(
            dimension_semantics=("parallel",),
            vmem_limit_bytes=_VMEM_LIMIT),
    )(hp_all, t_all, w1, w2)
    return out[:N]                                                # (N, d)


# --------------------------------------------------------------------------
# 2) Fused contrastive SSL loss
#
# For one "side", with A = stack_i normalize(cur_i), Bm = stack_i normalize(cur2_i)
# (both (3B, 2d)) and E = exp(A @ Bm^T / T), the sum of the reference's three
# RKG_Embedding_Loss calls equals
#     kge_w * ( -2*sum_r S_rr/T + sum_r log(rowsum_r E) + sum_c log(colsum_c E) ).
# (Row order of the "all" matrices does not affect the inner exp-sums.)
# Columns are tiled; row-sums / diag / col-log-sums accumulate in VMEM scratch.
# --------------------------------------------------------------------------
def _ssl_loss_kernel(a_ref, b_ref, o_ref, row_acc, pos_acc, lcol_acc):
    ct = pl.program_id(1)
    n_ct = pl.num_programs(1)
    R = a_ref.shape[1]           # true number of rows (== true columns)
    TC = b_ref.shape[1]          # column-tile width (may overshoot on last tile)

    @pl.when(ct == 0)
    def _():
        row_acc[...] = jnp.zeros_like(row_acc)
        pos_acc[...] = jnp.zeros_like(pos_acc)
        lcol_acc[...] = jnp.zeros_like(lcol_acc)

    eps = 1e-12
    a = a_ref[0]                 # (R, K)
    bt = b_ref[0]                # (TC, K)
    # F.normalize(dim=1); exact divide kept here (errors are amplified by /0.05)
    a = a / jnp.maximum(jnp.sqrt(jnp.sum(a * a, axis=1, keepdims=True)), eps)
    bt = bt / jnp.maximum(jnp.sqrt(jnp.sum(bt * bt, axis=1, keepdims=True)), eps)

    s = jnp.einsum('rk,ck->rc', a, bt,
                   preferred_element_type=jnp.float32) / SSL_TEMP      # (R, TC)

    row_ids = jax.lax.broadcasted_iota(jnp.int32, (R, TC), 1 - 1)      # dim 0
    col_ids = jax.lax.broadcasted_iota(jnp.int32, (1, TC), 1) + ct * TC
    col_valid = col_ids < R                                            # (1, TC)

    e = jnp.where(col_valid, jnp.exp(s), 0.0)                          # (R, TC)
    row_acc[...] += jnp.sum(e, axis=1, keepdims=True)                  # (R, 1)

    colsum = jnp.sum(e, axis=0, keepdims=True)                         # (1, TC)
    lcol_acc[...] += jnp.sum(jnp.where(col_valid, jnp.log(colsum), 0.0),
                             keepdims=True)                            # (1, 1)
    pos_acc[...] += jnp.sum(jnp.where(row_ids == col_ids, s, 0.0),
                            keepdims=True)                             # (1, 1)

    @pl.when(ct == n_ct - 1)
    def _():
        log_row = jnp.sum(jnp.log(row_acc[...]), keepdims=True)        # (1, 1)
        loss = KGE_WEIGHT * (-2.0 * pos_acc[...] + log_row + lcol_acc[...])
        o_ref[...] = loss.reshape(1, 1, 1)


def fused_rkg_loss(a_stack, b_stack, *, col_tile=256):
    """a_stack/b_stack: (S, 3B, 2d); returns the summed SSL loss of all S sides."""
    S, Rr, K = a_stack.shape
    if Rr <= col_tile:
        tc = Rr
    else:
        tc = max(8, (col_tile // 8) * 8)
    n_ct = (Rr + tc - 1) // tc
    Rp = n_ct * tc
    if Rp != Rr:
        b_stack = jnp.pad(b_stack, ((0, 0), (0, Rp - Rr), (0, 0)))
    out = pl.pallas_call(
        _ssl_loss_kernel,
        out_shape=jax.ShapeDtypeStruct((S, 1, 1), jnp.float32),
        grid=(S, n_ct),
        in_specs=[
            pl.BlockSpec((1, Rr, K), lambda s, c: (s, 0, 0)),
            pl.BlockSpec((1, tc, K), lambda s, c: (s, c, 0)),
        ],
        out_specs=pl.BlockSpec((1, 1, 1), lambda s, c: (s, 0, 0)),
        scratch_shapes=[
            pltpu.VMEM((Rr, 1), jnp.float32),   # running row-sums of exp
            pltpu.VMEM((1, 1), jnp.float32),    # sum of diagonal S_rr/T
            pltpu.VMEM((1, 1), jnp.float32),    # sum of log(col-sums)
        ],
        compiler_params=pltpu.CompilerParams(
            dimension_semantics=("parallel", "arbitrary"),
            vmem_limit_bytes=_VMEM_LIMIT),
    )(a_stack, b_stack)
    return jnp.sum(out)


# --------------------------------------------------------------------------
# 3) Fused final scores (row-tiled)
# --------------------------------------------------------------------------
def _scores_kernel(e1_ref, e_ref, emb0_ref, emb1_ref, o_ref):
    """scores = sigmoid(sum(e1*e) + sum(softmax(emb0)*softmax(emb1)))."""
    def softmax1(x):
        m = jnp.max(x, axis=1, keepdims=True)
        ex = jnp.exp(x - m)
        return ex * pl.reciprocal(jnp.sum(ex, axis=1, keepdims=True), approx=True)

    s0 = softmax1(emb0_ref[...])
    s1 = softmax1(emb1_ref[...])
    dot = (jnp.sum(e1_ref[...] * e_ref[...], axis=1, keepdims=True)
           + jnp.sum(s0 * s1, axis=1, keepdims=True))
    o_ref[...] = jax.nn.sigmoid(dot)                # (tile, 1)


def fused_scores(e1, e, emb0, emb1, *, row_tile=512):
    B = e1.shape[0]
    tile = row_tile if B >= row_tile else _round_up(B, 8)
    Bp = _round_up(B, tile)

    def pad(x):
        return jnp.pad(x, ((0, Bp - B), (0, 0))) if Bp != B else x

    e1p, ep, m0p, m1p = pad(e1), pad(e), pad(emb0), pad(emb1)
    out = pl.pallas_call(
        _scores_kernel,
        out_shape=jax.ShapeDtypeStruct((Bp, 1), jnp.float32),
        grid=(Bp // tile,),
        in_specs=[
            pl.BlockSpec((tile, e1.shape[1]), lambda r: (r, 0)),
            pl.BlockSpec((tile, e.shape[1]), lambda r: (r, 0)),
            pl.BlockSpec((tile, emb0.shape[1]), lambda r: (r, 0)),
            pl.BlockSpec((tile, emb1.shape[1]), lambda r: (r, 0)),
        ],
        out_specs=pl.BlockSpec((tile, 1), lambda r: (r, 0)),
        compiler_params=pltpu.CompilerParams(
            dimension_semantics=("parallel",),
            vmem_limit_bytes=_VMEM_LIMIT),
    )(e1p, ep, m0p, m1p)
    return out[:B, 0]


# --------------------------------------------------------------------------
# FGKAN predict / forward (glue, mirrors the PyTorch reference incl. aliasing)
# --------------------------------------------------------------------------
def predict(drug_kg, drug_ddi, drug_kg_two, ddi_origin_embeddings,
            drug2_kg, drug2_kg_two, drug2_ddi, drug2_ddi_two,
            embedding_0, embedding_1):
    # NOTE: `ddi_origin_embeddings` is the SAME Python list as `drug_ddi`
    # (alias created in forward) — mutations below intentionally interact,
    # exactly as in the reference.
    for i in range(len(drug_kg)):
        drug_kg[i] = jnp.concatenate((drug_kg[i], drug_ddi[i]), axis=-1)
        drug_kg_two[i] = jnp.concatenate(
            (drug_kg_two[i], ddi_origin_embeddings[i]), axis=-1)
    for i in range(len(drug_kg)):
        drug_ddi[i] = jnp.concatenate((drug2_kg[i], drug2_ddi[i]), axis=-1)
        ddi_origin_embeddings[i] = jnp.concatenate(
            (drug2_kg_two[i], drug2_ddi_two[i]), axis=-1)

    e_u = drug_kg[0]
    e_i = drug_ddi[0]
    e_p_u = drug_kg_two[0]
    e_p_i = ddi_origin_embeddings[0]

    # agg == 'concat'
    # Fused SSL loss: the 3+3 per-element RKG_Embedding_Loss calls reduce to one
    # (3B, 3B) similarity problem per side; both sides run in one pallas_call.
    a_kg = jnp.concatenate(drug_kg, axis=0)                    # (3B, 2d)
    b_kg = jnp.concatenate(drug_kg_two, axis=0)
    a_ddi = jnp.concatenate(drug_ddi, axis=0)
    b_ddi = jnp.concatenate(list(ddi_origin_embeddings), axis=0)
    kge_total = fused_rkg_loss(jnp.stack([a_kg, a_ddi], axis=0),
                               jnp.stack([b_kg, b_ddi], axis=0))

    for i in range(1, len(drug_kg)):
        e_u = jnp.concatenate((drug_kg[i], e_u), axis=-1)
    for i in range(1, len(drug_kg_two)):
        e_p_u = jnp.concatenate((drug_kg_two[i], e_p_u), axis=-1)
    e1 = jnp.concatenate((e_u, e_p_u), axis=-1)

    for i in range(1, len(drug_ddi)):
        e_i = jnp.concatenate((drug_ddi[i], e_i), axis=-1)
    for i in range(1, len(ddi_origin_embeddings)):
        e_p_i = jnp.concatenate((ddi_origin_embeddings[i], e_p_i), axis=-1)
    e = jnp.concatenate((e_p_i, e_i), axis=-1)

    scores = fused_scores(e1, e, embedding_0, embedding_1)
    return scores, kge_total


def fgkan_forward(params, items,
                  kg_init_ts, ddi_pot_ts, kg_pot_ts, ddi_orig_ts,
                  kg_init_ts1, ddi_pot_ts1, kg_pot_ts1, ddi_orig_ts1,
                  embeddings_0, embeddings_1):
    E = params["entity_emb"]
    R = params["relation_emb"]
    w1, w2 = params["w1"], params["w2"]     # w1: stacked (2d, d), w2: (1, d)

    sets = (kg_init_ts, ddi_pot_ts, kg_pot_ts,
            kg_init_ts1, ddi_pot_ts1, kg_pot_ts1, ddi_orig_ts1)
    # The reference also propagates ddi_origin_triple_set, but that result is
    # immediately overwritten (`ddi_origin_embeddings = ddi_embeddings`), so
    # the computation is dead and skipped (output identical).
    del ddi_orig_ts

    # Build [h|p] and t operands for every (set, layer) problem, stack, and run
    # ONE fused attention kernel.
    # TODO(synk): move these E[...] / R[...] gathers in-kernel via
    # PrefetchScalarGridSpec to avoid the HBM round trip of the gathered operands.
    hp_list, t_list = [], []
    for ts in sets:
        for i in range(N_LAYER):
            h = E[ts[0][0]]
            p = R[ts[1][0]]
            for _k in range(1, i + 1):      # reference reuses index `i` (not k)
                h = h + E[ts[0][i]]
                p = p * R[ts[1][i]]
            hp_list.append(jnp.concatenate((h, p), axis=-1))    # (B, T, 2d)
            t_list.append(E[ts[2][i]])                          # (B, T, d)
    hp_all = jnp.concatenate(hp_list, axis=0)                   # (7*NL*B, T, 2d)
    t_all = jnp.concatenate(t_list, axis=0)
    att_flat = fused_knowledge_attention(hp_all, t_all, w1, w2)
    B = items.shape[0]
    att = att_flat.reshape(len(sets), N_LAYER, B, att_flat.shape[-1])

    def emb_list(first, set_idx):
        return [first] + [att[set_idx, l] for l in range(N_LAYER)]

    mean0 = lambda ts: E[ts[0][0]].mean(axis=1)

    kg_embeddings = emb_list(mean0(kg_init_ts), 0)
    ddi_embeddings = emb_list(E[items], 1)
    kg_potential_embeddings = emb_list(mean0(kg_pot_ts), 2)
    kg_embeddings1 = emb_list(mean0(kg_init_ts1), 3)
    ddi_embeddings1 = emb_list(mean0(ddi_pot_ts1), 4)
    kg_potential_embeddings1 = emb_list(mean0(kg_pot_ts1), 5)
    ddi_origin_embeddings1 = emb_list(mean0(ddi_orig_ts1), 6)

    ddi_origin_embeddings = ddi_embeddings      # alias (same list), as in reference
    # agg == 'concat' -> the sum/pool append branch is skipped.
    return predict(kg_embeddings, ddi_embeddings, kg_potential_embeddings,
                   ddi_origin_embeddings, kg_embeddings1, ddi_embeddings1,
                   kg_potential_embeddings1, ddi_origin_embeddings1,
                   embeddings_0, embeddings_1)


# --------------------------------------------------------------------------
if __name__ == "__main__":
    key = jax.random.PRNGKey(0)
    B, T, d = 2, N_TRIPLES, DIM
    n_entity, n_relation, e_dim = 32, 8, 8

    keys = jax.random.split(key, 10)

    def xavier(k, shape):                      # nn.init.xavier_uniform_
        fan_out, fan_in = shape[0], shape[1]
        bound = (6.0 / (fan_in + fan_out)) ** 0.5
        return jax.random.uniform(k, shape, jnp.float32, -bound, bound)

    entity_emb = xavier(keys[0], (n_entity, d))
    relation_emb = xavier(keys[1], (n_relation, d))
    w1 = xavier(keys[2], (d, 2 * d))           # torch Linear(2d, d).weight (out, in)
    w2 = xavier(keys[3], (1, d))               # torch Linear(d, 1).weight  (out, in)
    params = dict(entity_emb=entity_emb, relation_emb=relation_emb,
                  w1=w1.T,                     # (2d, d): [h|p] @ w1.T == Linear(cat(h,p))
                  w2=w2)

    tkeys = iter(jax.random.split(keys[4], 64))

    def make_triple_set():
        heads = tuple(jax.random.randint(next(tkeys), (B, T), 0, n_entity,
                                         jnp.int32) for _ in range(N_LAYER))
        rels = tuple(jax.random.randint(next(tkeys), (B, T), 0, n_relation,
                                        jnp.int32) for _ in range(N_LAYER))
        tails = tuple(jax.random.randint(next(tkeys), (B, T), 0, n_entity,
                                         jnp.int32) for _ in range(N_LAYER))
        return (heads, rels, tails)

    items = jax.random.randint(keys[5], (B,), 0, n_entity, jnp.int32)
    triple_sets = tuple(make_triple_set() for _ in range(8))
    embeddings_0 = jax.random.normal(keys[6], (B, e_dim), jnp.float32)
    embeddings_1 = jax.random.normal(keys[7], (B, e_dim), jnp.float32)

    fwd = jax.jit(fgkan_forward)
    scores, kge_loss = fwd(params, items, *triple_sets,
                           embeddings_0, embeddings_1)
    jax.block_until_ready((scores, kge_loss))
    assert scores.shape == (B,)
    assert kge_loss.shape == ()
    print("KERNEL_OK")
</pallas_src>

<mosaic_0001>
module attributes {stable_mosaic.version = 11 : i64} {
  func.func @_attention_kernel(%arg0: i32, %arg1: memref<32x8x32xf32, #tpu.memory_space<vmem>>, %arg2: memref<32x8x16xf32, #tpu.memory_space<vmem>>, %arg3: memref<32x16xf32, #tpu.memory_space<vmem>>, %arg4: memref<1x16xf32, #tpu.memory_space<vmem>>, %arg5: memref<32x16xf32, #tpu.memory_space<vmem>>) attributes {dimension_semantics = [#tpu.dimension_semantics<parallel>], iteration_bounds = array<i64: 1>, scalar_prefetch = 0 : i64, scratch_operands = 0 : i64, tpu.core_type = #tpu.core_type<tc>, window_params = [{transform_indices = @transform_0, window_bounds = array<i64: 32, 8, 32>}, {transform_indices = @transform_1, window_bounds = array<i64: 32, 8, 16>}, {pipeline_mode = #tpu.pipeline_mode<synchronous>, transform_indices = @transform_2, window_bounds = array<i64: 32, 16>}, {pipeline_mode = #tpu.pipeline_mode<synchronous>, transform_indices = @transform_3, window_bounds = array<i64: 1, 16>}, {transform_indices = @transform_4, window_bounds = array<i64: 32, 16>}]} {
    %c0 = arith.constant 0 : index
    %c0_0 = arith.constant 0 : index
    %c0_1 = arith.constant 0 : index
    %0 = vector.load %arg1[%c0, %c0_0, %c0_1] : memref<32x8x32xf32, #tpu.memory_space<vmem>>, vector<32x8x32xf32>
    %1 = vector.shape_cast %0 : vector<32x8x32xf32> to vector<256x32xf32>
    %c0_2 = arith.constant 0 : index
    %c0_3 = arith.constant 0 : index
    %2 = vector.load %arg3[%c0_2, %c0_3] : memref<32x16xf32, #tpu.memory_space<vmem>>, vector<32x16xf32>
    %cst = arith.constant dense<0.000000e+00> : vector<256x16xf32>
    %3 = tpu.matmul %1, %2, %cst {dimension_numbers = #tpu.dot_dimension_numbers<[1], [0], [0], [1], [0, 0, 1, 1], [], []>} : vector<256x32xf32>, vector<32x16xf32>, vector<256x16xf32> -> vector<256x16xf32>
    %4 = arith.negf %3 : vector<256x16xf32>
    %5 = math.exp %4 : vector<256x16xf32>
    %cst_4 = arith.constant 1.000000e+00 : f32
    %6 = vector.broadcast %cst_4 : f32 to vector<256x16xf32>
    %7 = arith.addf %6, %5 : vector<256x16xf32>
    %8 = arith.divf %6, %7 : vector<256x16xf32>
    %9 = vector.shape_cast %8 : vector<256x16xf32> to vector<32x8x16xf32>
    %c0_5 = arith.constant 0 : index
    %c0_6 = arith.constant 0 : index
    %10 = vector.load %arg4[%c0_5, %c0_6] : memref<1x16xf32, #tpu.memory_space<vmem>>, vector<1x16xf32>
    %11 = vector.shape_cast %10 : vector<1x16xf32> to vector<1x1x16xf32>
    %12 = vector.broadcast %11 : vector<1x1x16xf32> to vector<32x8x16xf32>
    %13 = arith.mulf %9, %12 : vector<32x8x16xf32>
    %cst_7 = arith.constant dense<0.000000e+00> : vector<32x8xf32>
    %14 = vector.multi_reduction <add>, %13, %cst_7 [2] : vector<32x8x16xf32> to vector<32x8xf32>
    %15 = arith.negf %14 : vector<32x8xf32>
    %16 = math.exp %15 : vector<32x8xf32>
    %cst_8 = arith.constant 1.000000e+00 : f32
    %17 = vector.broadcast %cst_8 : f32 to vector<32x8xf32>
    %18 = arith.addf %17, %16 : vector<32x8xf32>
    %19 = arith.divf %17, %18 : vector<32x8xf32>
    %cst_9 = arith.constant dense<0xFF800000> : vector<32xf32>
    %20 = vector.multi_reduction <maximumf>, %19, %cst_9 [1] : vector<32x8xf32> to vector<32xf32>
    %21 = vector.shape_cast %20 : vector<32xf32> to vector<32x1xf32>
    %22 = vector.broadcast %21 : vector<32x1xf32> to vector<32x8xf32>
    %23 = arith.subf %19, %22 : vector<32x8xf32>
    %24 = math.exp %23 : vector<32x8xf32>
    %cst_10 = arith.constant dense<0.000000e+00> : vector<32xf32>
    %25 = vector.multi_reduction <add>, %24, %cst_10 [1] : vector<32x8xf32> to vector<32xf32>
    %26 = vector.shape_cast %25 : vector<32xf32> to vector<32x1xf32>
    %27 = tpu.reciprocal %26 {approx = true} : vector<32x1xf32> -> vector<32x1xf32>
    %28 = vector.broadcast %27 : vector<32x1xf32> to vector<32x8xf32>
    %29 = arith.mulf %24, %28 : vector<32x8xf32>
    %30 = vector.shape_cast %29 : vector<32x8xf32> to vector<32x8x1xf32>
    %c0_11 = arith.constant 0 : index
    %c0_12 = arith.constant 0 : index
    %c0_13 = arith.constant 0 : index
    %31 = vector.load %arg2[%c0_11, %c0_12, %c0_13] : memref<32x8x16xf32, #tpu.memory_space<vmem>>, vector<32x8x16xf32>
    %32 = vector.broadcast %30 : vector<32x8x1xf32> to vector<32x8x16xf32>
    %33 = arith.mulf %32, %31 : vector<32x8x16xf32>
    %cst_14 = arith.constant dense<0.000000e+00> : vector<32x16xf32>
    %34 = vector.multi_reduction <add>, %33, %cst_14 [1] : vector<32x8x16xf32> to vector<32x16xf32>
    %c0_15 = arith.constant 0 : index
    %c0_16 = arith.constant 0 : index
    %35 = vector.load %arg5[%c0_15, %c0_16] : memref<32x16xf32, #tpu.memory_space<vmem>>, vector<32x16xf32>
    tpu.vector_store %arg5[%c0_15, %c0_16], %34 {strides = array<i32>} : memref<32x16xf32, #tpu.memory_space<vmem>>, vector<32x16xf32>,
    return
  }
  func.func @transform_0(%arg0: i32) -> (i32, i32, i32) {
    %c0_i32 = arith.constant 0 : i32
    %c0_i32_0 = arith.constant 0 : i32
    %c0_i32_1 = arith.constant 0 : i32
    return %arg0, %c0_i32, %c0_i32_0 : i32, i32, i32
  }
  func.func @transform_1(%arg0: i32) -> (i32, i32, i32) {
    %c0_i32 = arith.constant 0 : i32
    %c0_i32_0 = arith.constant 0 : i32
    %c0_i32_1 = arith.constant 0 : i32
    return %arg0, %c0_i32, %c0_i32_0 : i32, i32, i32
  }
  func.func @transform_2(%arg0: i32) -> (i32, i32) {
    %c0_i32 = arith.constant 0 : i32
    %c0_i32_0 = arith.constant 0 : i32
    %c0_i32_1 = arith.constant 0 : i32
    return %c0_i32, %c0_i32_0 : i32, i32
  }
  func.func @transform_3(%arg0: i32) -> (i32, i32) {
    %c0_i32 = arith.constant 0 : i32
    %c0_i32_0 = arith.constant 0 : i32
    %c0_i32_1 = arith.constant 0 : i32
    return %c0_i32, %c0_i32_0 : i32, i32
  }
  func.func @transform_4(%arg0: i32) -> (i32, i32) {
    %c0_i32 = arith.constant 0 : i32
    %c0_i32_0 = arith.constant 0 : i32
    return %arg0, %c0_i32 : i32, i32
  }
}

module attributes {stable_mosaic.version = 11 : i64} {
  func.func @_ssl_loss_kernel(%arg0: i32, %arg1: i32, %arg2: memref<1x6x32xf32, #tpu.memory_space<vmem>>, %arg3: memref<1x6x32xf32, #tpu.memory_space<vmem>>, %arg4: memref<1x1x1xf32, #tpu.memory_space<vmem>>, %arg5: memref<6x1xf32, #tpu.memory_space<vmem>>, %arg6: memref<1x1xf32, #tpu.memory_space<vmem>>, %arg7: memref<1x1xf32, #tpu.memory_space<vmem>>) attributes {dimension_semantics = [#tpu.dimension_semantics<parallel>, #tpu.dimension_semantics<arbitrary>], iteration_bounds = array<i64: 2, 1>, scalar_prefetch = 0 : i64, scratch_operands = 3 : i64, tpu.core_type = #tpu.core_type<tc>, window_params = [{transform_indices = @transform_0, window_bounds = array<i64: 1, 6, 32>}, {transform_indices = @transform_1, window_bounds = array<i64: 1, 6, 32>}, {transform_indices = @transform_2, window_bounds = array<i64: 1, 1, 1>}]} {
    %c0_i32 = arith.constant 0 : i32
    %0 = arith.cmpi eq, %arg1, %c0_i32 : i32
    %1 = arith.extui %0 : i1 to i32
    %c0_i32_0 = arith.constant 0 : i32
    %2 = arith.cmpi ne, %1, %c0_i32_0 : i32
    scf.if %2 {
      %cst_33 = arith.constant 0.000000e+00 : f32
      %71 = vector.broadcast %cst_33 : f32 to vector<6x1xf32>
      %c0_34 = arith.constant 0 : index
      %c0_35 = arith.constant 0 : index
      %72 = vector.load %arg5[%c0_34, %c0_35] : memref<6x1xf32, #tpu.memory_space<vmem>>, vector<6x1xf32>
      tpu.vector_store %arg5[%c0_34, %c0_35], %71 {strides = array<i32>} : memref<6x1xf32, #tpu.memory_space<vmem>>, vector<6x1xf32>,
      %cst_36 = arith.constant 0.000000e+00 : f32
      %73 = vector.broadcast %cst_36 : f32 to vector<1x1xf32>
      %c0_37 = arith.constant 0 : index
      %c0_38 = arith.constant 0 : index
      %74 = vector.load %arg6[%c0_37, %c0_38] : memref<1x1xf32, #tpu.memory_space<vmem>>, vector<1x1xf32>
      tpu.vector_store %arg6[%c0_37, %c0_38], %73 {strides = array<i32>} : memref<1x1xf32, #tpu.memory_space<vmem>>, vector<1x1xf32>,
      %cst_39 = arith.constant 0.000000e+00 : f32
      %75 = vector.broadcast %cst_39 : f32 to vector<1x1xf32>
      %c0_40 = arith.constant 0 : index
      %c0_41 = arith.constant 0 : index
      %76 = vector.load %arg7[%c0_40, %c0_41] : memref<1x1xf32, #tpu.memory_space<vmem>>, vector<1x1xf32>
      tpu.vector_store %arg7[%c0_40, %c0_41], %75 {strides = array<i32>} : memref<1x1xf32, #tpu.memory_space<vmem>>, vector<1x1xf32>,
    } else {
    }
    %c0 = arith.constant 0 : index
    %c0_1 = arith.constant 0 : index
    %c0_2 = arith.constant 0 : index
    %3 = vector.load %arg2[%c0, %c0_1, %c0_2] : memref<1x6x32xf32, #tpu.memory_space<vmem>>, vector<1x6x32xf32>
    %4 = vector.shape_cast %3 : vector<1x6x32xf32> to vector<6x32xf32>
    %c0_3 = arith.constant 0 : index
    %c0_4 = arith.constant 0 : index
    %c0_5 = arith.constant 0 : index
    %5 = vector.load %arg3[%c0_3, %c0_4, %c0_5] : memref<1x6x32xf32, #tpu.memory_space<vmem>>, vector<1x6x32xf32>
    %6 = vector.shape_cast %5 : vector<1x6x32xf32> to vector<6x32xf32>
    %7 = arith.mulf %4, %4 : vector<6x32xf32>
    %cst = arith.constant dense<0.000000e+00> : vector<6xf32>
    %8 = vector.multi_reduction <add>, %7, %cst [1] : vector<6x32xf32> to vector<6xf32>
    %9 = vector.shape_cast %8 : vector<6xf32> to vector<6x1xf32>
    %10 = math.sqrt %9 : vector<6x1xf32>
    %cst_6 = arith.constant 9.99999996E-13 : f32
    %11 = vector.broadcast %cst_6 : f32 to vector<6x1xf32>
    %12 = arith.maximumf %10, %11 : vector<6x1xf32>
    %13 = vector.broadcast %12 : vector<6x1xf32> to vector<6x32xf32>
    %14 = arith.divf %4, %13 : vector<6x32xf32>
    %15 = arith.mulf %6, %6 : vector<6x32xf32>
    %cst_7 = arith.constant dense<0.000000e+00> : vector<6xf32>
    %16 = vector.multi_reduction <add>, %15, %cst_7 [1] : vector<6x32xf32> to vector<6xf32>
    %17 = vector.shape_cast %16 : vector<6xf32> to vector<6x1xf32>
    %18 = math.sqrt %17 : vector<6x1xf32>
    %cst_8 = arith.constant 9.99999996E-13 : f32
    %19 = vector.broadcast %cst_8 : f32 to vector<6x1xf32>
    %20 = arith.maximumf %18, %19 : vector<6x1xf32>
    %21 = vector.broadcast %20 : vector<6x1xf32> to vector<6x32xf32>
    %22 = arith.divf %6, %21 : vector<6x32xf32>
    "tpu.trace_start"() <{level = 10 : i32, message = "rk,ck->rc"}> : () -> ()
    %cst_9 = arith.constant dense<0.000000e+00> : vector<6x6xf32>
    %23 = tpu.matmul %14, %22, %cst_9 {dimension_numbers = #tpu.dot_dimension_numbers<[1], [1], [0], [0], [0, 0, 1, 0], [], []>} : vector<6x32xf32>, vector<6x32xf32>, vector<6x6xf32> -> vector<6x6xf32>
    "tpu.trace_stop"() : () -> ()
    %cst_10 = arith.constant 5.000000e-02 : f32
    %24 = vector.broadcast %cst_10 : f32 to vector<6x6xf32>
    %25 = arith.divf %23, %24 : vector<6x6xf32>
    %26 = tpu.iota {dimensions = array<i32: 0>} : vector<6x6xi32>
    %27 = tpu.iota {dimensions = array<i32: 1>} : vector<1x6xi32>
    %c6_i32 = arith.constant 6 : i32
    %28 = arith.muli %arg1, %c6_i32 : i32
    %29 = vector.broadcast %28 : i32 to vector<1x6xi32>
    %30 = arith.addi %27, %29 : vector<1x6xi32>
    %c6_i32_11 = arith.constant 6 : i32
    %31 = vector.broadcast %c6_i32_11 : i32 to vector<1x6xi32>
    %32 = arith.cmpi slt, %30, %31 : vector<1x6xi32>
    %33 = math.exp %25 : vector<6x6xf32>
    %cst_12 = arith.constant 0.000000e+00 : f32
    %34 = vector.shape_cast %32 : vector<1x6xi1> to vector<1x6xi1>
    %35 = vector.broadcast %34 : vector<1x6xi1> to vector<6x6xi1>
    %36 = vector.broadcast %cst_12 : f32 to vector<6x6xf32>
    %37 = arith.select %35, %33, %36 : vector<6x6xi1>, vector<6x6xf32>
    %c0_13 = arith.constant 0 : index
    %c0_14 = arith.constant 0 : index
    %38 = vector.load %arg5[%c0_13, %c0_14] : memref<6x1xf32, #tpu.memory_space<vmem>>, vector<6x1xf32>
    %cst_15 = arith.constant dense<0.000000e+00> : vector<6xf32>
    %39 = vector.multi_reduction <add>, %37, %cst_15 [1] : vector<6x6xf32> to vector<6xf32>
    %40 = vector.shape_cast %39 : vector<6xf32> to vector<6x1xf32>
    %41 = arith.addf %38, %40 : vector<6x1xf32>
    %c0_16 = arith.constant 0 : index
    %c0_17 = arith.constant 0 : index
    %42 = vector.load %arg5[%c0_16, %c0_17] : memref<6x1xf32, #tpu.memory_space<vmem>>, vector<6x1xf32>
    tpu.vector_store %arg5[%c0_16, %c0_17], %41 {strides = array<i32>} : memref<6x1xf32, #tpu.memory_space<vmem>>, vector<6x1xf32>,
    %cst_18 = arith.constant dense<0.000000e+00> : vector<6xf32>
    %43 = vector.multi_reduction <add>, %37, %cst_18 [0] : vector<6x6xf32> to vector<6xf32>
    %44 = vector.shape_cast %43 : vector<6xf32> to vector<1x6xf32>
    %c0_19 = arith.constant 0 : index
    %c0_20 = arith.constant 0 : index
    %45 = vector.load %arg7[%c0_19, %c0_20] : memref<1x1xf32, #tpu.memory_space<vmem>>, vector<1x1xf32>
    %46 = math.log %44 : vector<1x6xf32>
    %cst_21 = arith.constant 0.000000e+00 : f32
    %47 = vector.broadcast %cst_21 : f32 to vector<1x6xf32>
    %48 = arith.select %32, %46, %47 : vector<1x6xi1>, vector<1x6xf32>
    %49 = vector.shape_cast %48 : vector<1x6xf32> to vector<1x1x6xf32>
    %cst_22 = arith.constant dense<0.000000e+00> : vector<1xf32>
    %50 = vector.multi_reduction <add>, %49, %cst_22 [1, 2] : vector<1x1x6xf32> to vector<1xf32>
    %51 = vector.shape_cast %50 : vector<1xf32> to vector<1x1x1xf32>
    %52 = vector.extract %51[0, 0, 0] : f32 from vector<1x1x1xf32>
    %53 = vector.broadcast %52 : f32 to vector<1x1xf32>
    %54 = arith.addf %45, %53 : vector<1x1xf32>
    %c0_23 = arith.constant 0 : index
    %c0_24 = arith.constant 0 : index
    %55 = vector.load %arg7[%c0_23, %c0_24] : memref<1x1xf32, #tpu.memory_space<vmem>>, vector<1x1xf32>
    tpu.vector_store %arg7[%c0_23, %c0_24], %54 {strides = array<i32>} : memref<1x1xf32, #tpu.memory_space<vmem>>, vector<1x1xf32>,
    %c0_25 = arith.constant 0 : index
    %c0_26 = arith.constant 0 : index
    %56 = vector.load %arg6[%c0_25, %c0_26] : memref<1x1xf32, #tpu.memory_space<vmem>>, vector<1x1xf32>
    %57 = vector.broadcast %30 : vector<1x6xi32> to vector<6x6xi32>
    %58 = arith.cmpi eq, %26, %57 : vector<6x6xi32>
    %cst_27 = arith.constant 0.000000e+00 : f32
    %59 = vector.broadcast %cst_27 : f32 to vector<6x6xf32>
    %60 = arith.select %58, %25, %59 : vector<6x6xi1>, vector<6x6xf32>
    %61 = vector.shape_cast %60 : vector<6x6xf32> to vector<1x6x6xf32>
    %cst_28 = arith.constant dense<0.000000e+00> : vector<1xf32>
    %62 = vector.multi_reduction <add>, %61, %cst_28 [1, 2] : vector<1x6x6xf32> to vector<1xf32>
    %63 = vector.shape_cast %62 : vector<1xf32> to vector<1x1x1xf32>
    %64 = vector.extract %63[0, 0, 0] : f32 from vector<1x1x1xf32>
    %65 = vector.broadcast %64 : f32 to vector<1x1xf32>
    %66 = arith.addf %56, %65 : vector<1x1xf32>
    %c0_29 = arith.constant 0 : index
    %c0_30 = arith.constant 0 : index
    %67 = vector.load %arg6[%c0_29, %c0_30] : memref<1x1xf32, #tpu.memory_space<vmem>>, vector<1x1xf32>
    tpu.vector_store %arg6[%c0_29, %c0_30], %66 {strides = array<i32>} : memref<1x1xf32, #tpu.memory_space<vmem>>, vector<1x1xf32>,
    %c0_i32_31 = arith.constant 0 : i32
    %68 = arith.cmpi eq, %arg1, %c0_i32_31 : i32
    %69 = arith.extui %68 : i1 to i32
    %c0_i32_32 = arith.constant 0 : i32
    %70 = arith.cmpi ne, %69, %c0_i32_32 : i32
    scf.if %70 {
      %c0_33 = arith.constant 0 : index
      %c0_34 = arith.constant 0 : index
      %71 = vector.load %arg5[%c0_33, %c0_34] : memref<6x1xf32, #tpu.memory_space<vmem>>, vector<6x1xf32>
      %72 = math.log %71 : vector<6x1xf32>
      %73 = vector.shape_cast %72 : vector<6x1xf32> to vector<1x6x1xf32>
      %cst_35 = arith.constant dense<0.000000e+00> : vector<1xf32>
      %74 = vector.multi_reduction <add>, %73, %cst_35 [1, 2] : vector<1x6x1xf32> to vector<1xf32>
      %75 = vector.shape_cast %74 : vector<1xf32> to vector<1x1x1xf32>
      %76 = vector.extract %75[0, 0, 0] : f32 from vector<1x1x1xf32>
      %77 = vector.broadcast %76 : f32 to vector<1x1xf32>
      %c0_36 = arith.constant 0 : index
      %c0_37 = arith.constant 0 : index
      %78 = vector.load %arg6[%c0_36, %c0_37] : memref<1x1xf32, #tpu.memory_space<vmem>>, vector<1x1xf32>
      %cst_38 = arith.constant -2.000000e+00 : f32
      %79 = vector.broadcast %cst_38 : f32 to vector<1x1xf32>
      %80 = arith.mulf %79, %78 : vector<1x1xf32>
      %81 = arith.addf %80, %77 : vector<1x1xf32>
      %c0_39 = arith.constant 0 : index
      %c0_40 = arith.constant 0 : index
      %82 = vector.load %arg7[%c0_39, %c0_40] : memref<1x1xf32, #tpu.memory_space<vmem>>, vector<1x1xf32>
      %83 = arith.addf %81, %82 : vector<1x1xf32>
      %cst_41 = arith.constant 9.99999993E-9 : f32
      %84 = vector.broadcast %cst_41 : f32 to vector<1x1xf32>
      %85 = arith.mulf %84, %83 : vector<1x1xf32>
      %86 = vector.shape_cast %85 : vector<1x1xf32> to vector<1x1x1xf32>
      %c0_42 = arith.constant 0 : index
      %c0_43 = arith.constant 0 : index
      %c0_44 = arith.constant 0 : index
      %87 = vector.load %arg4[%c0_42, %c0_43, %c0_44] : memref<1x1x1xf32, #tpu.memory_space<vmem>>, vector<1x1x1xf32>
      tpu.vector_store %arg4[%c0_42, %c0_43, %c0_44], %86 {strides = array<i32>} : memref<1x1x1xf32, #tpu.memory_space<vmem>>, vector<1x1x1xf32>,
    } else {
    }
    return
  }
  func.func @transform_0(%arg0: i32, %arg1: i32) -> (i32, i32, i32) {
    %c0_i32 = arith.constant 0 : i32
    %c0_i32_0 = arith.constant 0 : i32
    %c0_i32_1 = arith.constant 0 : i32
    return %arg0, %c0_i32, %c0_i32_0 : i32, i32, i32
  }
  func.func @transform_1(%arg0: i32, %arg1: i32) -> (i32, i32, i32) {
    %c0_i32 = arith.constant 0 : i32
    %c0_i32_0 = arith.constant 0 : i32
    return %arg0, %arg1, %c0_i32 : i32, i32, i32
  }
  func.func @transform_2(%arg0: i32, %arg1: i32) -> (i32, i32, i32) {
    %c0_i32 = arith.constant 0 : i32
    %c0_i32_0 = arith.constant 0 : i32
    %c0_i32_1 = arith.constant 0 : i32
    return %arg0, %c0_i32, %c0_i32_0 : i32, i32, i32
  }
}

module attributes {stable_mosaic.version = 11 : i64} {
  func.func @_scores_kernel(%arg0: i32, %arg1: memref<8x192xf32, #tpu.memory_space<vmem>>, %arg2: memref<8x192xf32, #tpu.memory_space<vmem>>, %arg3: memref<8x8xf32, #tpu.memory_space<vmem>>, %arg4: memref<8x8xf32, #tpu.memory_space<vmem>>, %arg5: memref<8x1xf32, #tpu.memory_space<vmem>>) attributes {dimension_semantics = [#tpu.dimension_semantics<parallel>], iteration_bounds = array<i64: 1>, scalar_prefetch = 0 : i64, scratch_operands = 0 : i64, tpu.core_type = #tpu.core_type<tc>, window_params = [{transform_indices = @transform_0, window_bounds = array<i64: 8, 192>}, {transform_indices = @transform_1, window_bounds = array<i64: 8, 192>}, {transform_indices = @transform_2, window_bounds = array<i64: 8, 8>}, {transform_indices = @transform_3, window_bounds = array<i64: 8, 8>}, {transform_indices = @transform_4, window_bounds = array<i64: 8, 1>}]} {
    %c0 = arith.constant 0 : index
    %c0_0 = arith.constant 0 : index
    %0 = vector.load %arg3[%c0, %c0_0] : memref<8x8xf32, #tpu.memory_space<vmem>>, vector<8x8xf32>
    %cst = arith.constant dense<0xFF800000> : vector<8xf32>
    %1 = vector.multi_reduction <maximumf>, %0, %cst [1] : vector<8x8xf32> to vector<8xf32>
    %2 = vector.shape_cast %1 : vector<8xf32> to vector<8x1xf32>
    %3 = vector.broadcast %2 : vector<8x1xf32> to vector<8x8xf32>
    %4 = arith.subf %0, %3 : vector<8x8xf32>
    %5 = math.exp %4 : vector<8x8xf32>
    %cst_1 = arith.constant dense<0.000000e+00> : vector<8xf32>
    %6 = vector.multi_reduction <add>, %5, %cst_1 [1] : vector<8x8xf32> to vector<8xf32>
    %7 = vector.shape_cast %6 : vector<8xf32> to vector<8x1xf32>
    %8 = tpu.reciprocal %7 {approx = true} : vector<8x1xf32> -> vector<8x1xf32>
    %9 = vector.broadcast %8 : vector<8x1xf32> to vector<8x8xf32>
    %10 = arith.mulf %5, %9 : vector<8x8xf32>
    %c0_2 = arith.constant 0 : index
    %c0_3 = arith.constant 0 : index
    %11 = vector.load %arg4[%c0_2, %c0_3] : memref<8x8xf32, #tpu.memory_space<vmem>>, vector<8x8xf32>
    %cst_4 = arith.constant dense<0xFF800000> : vector<8xf32>
    %12 = vector.multi_reduction <maximumf>, %11, %cst_4 [1] : vector<8x8xf32> to vector<8xf32>
    %13 = vector.shape_cast %12 : vector<8xf32> to vector<8x1xf32>
    %14 = vector.broadcast %13 : vector<8x1xf32> to vector<8x8xf32>
    %15 = arith.subf %11, %14 : vector<8x8xf32>
    %16 = math.exp %15 : vector<8x8xf32>
    %cst_5 = arith.constant dense<0.000000e+00> : vector<8xf32>
    %17 = vector.multi_reduction <add>, %16, %cst_5 [1] : vector<8x8xf32> to vector<8xf32>
    %18 = vector.shape_cast %17 : vector<8xf32> to vector<8x1xf32>
    %19 = tpu.reciprocal %18 {approx = true} : vector<8x1xf32> -> vector<8x1xf32>
    %20 = vector.broadcast %19 : vector<8x1xf32> to vector<8x8xf32>
    %21 = arith.mulf %16, %20 : vector<8x8xf32>
    %c0_6 = arith.constant 0 : index
    %c0_7 = arith.constant 0 : index
    %22 = vector.load %arg1[%c0_6, %c0_7] : memref<8x192xf32, #tpu.memory_space<vmem>>, vector<8x192xf32>
    %c0_8 = arith.constant 0 : index
    %c0_9 = arith.constant 0 : index
    %23 = vector.load %arg2[%c0_8, %c0_9] : memref<8x192xf32, #tpu.memory_space<vmem>>, vector<8x192xf32>
    %24 = arith.mulf %22, %23 : vector<8x192xf32>
    %cst_10 = arith.constant dense<0.000000e+00> : vector<8xf32>
    %25 = vector.multi_reduction <add>, %24, %cst_10 [1] : vector<8x192xf32> to vector<8xf32>
    %26 = vector.shape_cast %25 : vector<8xf32> to vector<8x1xf32>
    %27 = arith.mulf %10, %21 : vector<8x8xf32>
    %cst_11 = arith.constant dense<0.000000e+00> : vector<8xf32>
    %28 = vector.multi_reduction <add>, %27, %cst_11 [1] : vector<8x8xf32> to vector<8xf32>
    %29 = vector.shape_cast %28 : vector<8xf32> to vector<8x1xf32>
    %30 = arith.addf %26, %29 : vector<8x1xf32>
    %31 = arith.negf %30 : vector<8x1xf32>
    %32 = math.exp %31 : vector<8x1xf32>
    %cst_12 = arith.constant 1.000000e+00 : f32
    %33 = vector.broadcast %cst_12 : f32 to vector<8x1xf32>
    %34 = arith.addf %33, %32 : vector<8x1xf32>
    %35 = arith.divf %33, %34 : vector<8x1xf32>
    %c0_13 = arith.constant 0 : index
    %c0_14 = arith.constant 0 : index
    %36 = vector.load %arg5[%c0_13, %c0_14] : memref<8x1xf32, #tpu.memory_space<vmem>>, vector<8x1xf32>
    tpu.vector_store %arg5[%c0_13, %c0_14], %35 {strides = array<i32>} : memref<8x1xf32, #tpu.memory_space<vmem>>, vector<8x1xf32>,
    return
  }
  func.func @transform_0(%arg0: i32) -> (i32, i32) {
    %c0_i32 = arith.constant 0 : i32
    %c0_i32_0 = arith.constant 0 : i32
    return %arg0, %c0_i32 : i32, i32
  }
  func.func @transform_1(%arg0: i32) -> (i32, i32) {
    %c0_i32 = arith.constant 0 : i32
    %c0_i32_0 = arith.constant 0 : i32
    return %arg0, %c0_i32 : i32, i32
  }
  func.func @transform_2(%arg0: i32) -> (i32, i32) {
    %c0_i32 = arith.constant 0 : i32
    %c0_i32_0 = arith.constant 0 : i32
    return %arg0, %c0_i32 : i32, i32
  }
  func.func @transform_3(%arg0: i32) -> (i32, i32) {
    %c0_i32 = arith.constant 0 : i32
    %c0_i32_0 = arith.constant 0 : i32
    return %arg0, %c0_i32 : i32, i32
  }
  func.func @transform_4(%arg0: i32) -> (i32, i32) {
    %c0_i32 = arith.constant 0 : i32
    %c0_i32_0 = arith.constant 0 : i32
    return %arg0, %c0_i32 : i32, i32
  }
}

</mosaic_0001>

<bundles_post_ra>
// kernel: fgkan_forward.5
= control target key start
LH: loop header
LB: loop body
LE: loop exit
PB: predicated region body
PF: predicated region fallthrough
CT: control target
= control target key end

     0   :  { %vm18_vm0 = vcmask 64512   ;;  %vm48_vm1 = vcmask 523264   ;;  %vm77_vm4 = vcmask 7168   ;;  %s147_s2 = inlined_call_operand.vmem [shape: f32[8,8], index: 2, kind: input, shape index: {}]   ;;  %s148_s3 = inlined_call_operand.vmem [shape: f32[8,8], index: 3, kind: input, shape index: {}]   ;;  %s149_s0 = inlined_call_operand.vmem [shape: f32[8,192], index: 0, kind: input, shape index: {}]   ;;  %s150_s1 = inlined_call_operand.vmem [shape: f32[8,192], index: 1, kind: input, shape index: {}]   ;;  %s151_s4 = inlined_call_operand.vmem [shape: f32[8,1], index: 4, kind: output, shape index: {}]  }
   0x1   :  { %v17_v0 = vld [vmem:[%s147_s2] sm:$0xff]  ;;  %v43_v14 = vld [vmem:[%s149_s0 + $0x8] sm:$0xff] }
   0x2   :  { %v19_v1 = vsel %vm18_vm0, %v17_v0, -inf  ;;  %v30_v2 = vld [vmem:[%s148_s3] sm:$0xff]  ;;  %v45_v15 = vld [vmem:[%s150_s1 + $0x8] sm:$0xff] }
   0x3   :  { %20 = vmax.xlane.f32.xlu0 %v19_v1  ;;  %v31_v3 = vsel %vm18_vm0, %v30_v2, -inf  ;;  %v42_v16 = vld [vmem:[%s149_s0] sm:$0xff]  ;;  %v47_v18 = vmul.f32 %v45_v15, %v43_v14 }
   0x4   :  { %v44_v17 = vld [vmem:[%s150_s1] sm:$0xff] }
   0x5   :  { %v46_v19 = vmul.f32 %v44_v17, %v42_v16  ;;  %v49_v20 = vsel %vm48_vm1, %v47_v18, 0.0 }
   0x7   :  { %v50_v21 = vadd.f32 %v49_v20, %v46_v19 }
   0x9   :  { %51 = vadd.xlane.f32.xlu2 %v50_v21 }
   0xb   :  { %32 = vmax.xlane.f32.xlu0 %v31_v3 }
  0x76   :  { %v21_v4 = vpop.xlane.xlu0 %20 }
  0x77   :  { %v22_v5 = vsub.f32 %v17_v0, %v21_v4 }
  0x79   :  { %v23_v6 = vmul.f32 1.442695, %v22_v5 }
  0x7b   :  { %84 = vpow2.f32 %v23_v6 }
  0x7c   :  { %v52_v30 = vpop.xlane.xlu2 %51 }
  0x7e   :  { %v33_v7 = vpop.xlane.xlu0 %32 }
  0x7f   :  { %v34_v8 = vsub.f32 %v30_v2, %v33_v7 }
  0x81   :  { %v85_v9 = vpop.eup %84  ;;  %v35_v10 = vmul.f32 1.442695, %v34_v8 }
  0x82   :  { %v25_v11 = vsel %vm18_vm0, %v85_v9, 0.0 }
  0x83   :  { %86 = vpow2.f32 %v35_v10  ;;  %26 = vadd.xlane.f32.xlu1 %v25_v11 }
  0x89   :  { %v87_v12 = vpop.eup %86 }
  0x8a   :  { %v37_v13 = vsel %vm18_vm0, %v87_v12, 0.0 }
  0x8b   :  { %38 = vadd.xlane.f32.xlu1 %v37_v13 }
  0xf6   :  { %v27_v22 = vpop.xlane.xlu1 %26 }
  0xf7   :  { %88 = vrcp.f32 %v27_v22 }
  0xfd   :  { %v89_v24 = vpop.eup %88 }
  0xfe   :  { %v39_v23 = vpop.xlane.xlu1 %38  ;;  %v29_v26 = vmul.f32 %v89_v24, %v85_v9 }
  0xff   :  { %90 = vrcp.f32 %v39_v23 }
 0x105   :  { %v91_v25 = vpop.eup %90 }
 0x106   :  { %v41_v27 = vmul.f32 %v91_v25, %v87_v12 }
 0x108   :  { %v53_v28 = vmul.f32 %v41_v27, %v29_v26 }
 0x10a   :  { %v54_v29 = vsel %vm18_vm0, %v53_v28, 0.0 }
 0x10b   :  { %55 = vadd.xlane.f32.xlu2 %v54_v29 }
 0x17e   :  { %v56_v31 = vpop.xlane.xlu2 %55 }
 0x17f   :  { %v57_v32 = vadd.f32 %v56_v31, %v52_v30 }
 0x181   :  { %v83_v33 = vmul.f32 -1.442695, %v57_v32 }
 0x183   :  { %92 = vpow2.f32 %v83_v33 }
 0x189   :  { %v93_v34 = vpop.eup %92 }
 0x18a   :  { %v61_v35 = vadd.f32 1.0, %v93_v34 }
 0x18c   :  { %94 = vrcp.f32 %v61_v35  ;;  %v73_v39 = vand.u32 2147483648, %v61_v35  ;;  %v71_v41 = vand.u32 2147483647, %v61_v35  ;;  %vm67_vm3 = vweird.f32 %v61_v35 }
 0x18e   :  { %v74_v43 = vor.u32 1.1754944e-38, %v73_v39  ;;  %vm72_vm6 = vcmp.eq.f32.partialorder %v71_v41, 8.507059e+37 }
 0x192   :  { %v95_v36 = vpop.eup %94 }
 0x193   :  { %v63_v37 = vmul.f32 %v95_v36, %v61_v35  ;;  %vm68_vm2 = vweird.f32 %v95_v36 }
 0x194   :  { %vm69_vm5 = vmor %vm67_vm3, %vm68_vm2 }
 0x195   :  { %v64_v38 = vsub.f32 1.0, %v63_v37 }
 0x197   :  { %v65_v40 = vmul.f32 %v95_v36, %v64_v38 }
 0x199   :  { %v66_v42 = vadd.f32 %v95_v36, %v65_v40 }
 0x19b   :  { %v70_v44 = vsel %vm69_vm5, %v95_v36, %v66_v42 }
 0x19c   :  { %v75_v45 = vsel %vm72_vm6, %v74_v43, %v70_v44 }
 0x19d   :  { %78 = vst.msk [vmem:[%s151_s4] sm:$0xff] %vm77_vm4, %v75_v45 }

// kernel: fgkan_forward.4
= control target key start
LH: loop header
LB: loop body
LE: loop exit
PB: predicated region body
PF: predicated region fallthrough
CT: control target
= control target key end

     0   :  { %s544_s9 = smov 0   ;;  %s546_s10 = smov 0   ;;  %s599_s0 = inlined_call_operand.vmem [shape: f32[2,6,32], index: 0, kind: input, shape index: {}]   ;;  %s600_s1 = inlined_call_operand.vmem [shape: f32[2,6,32], index: 1, kind: input, shape index: {}]   ;;  %s601_s2 = inlined_call_operand.vmem [shape: f32[2,1,1], index: 2, kind: output, shape index: {}]  }
   0x1   :  { %s548_s11 = smov 0  }
   0x2 LB: > { %s24_s12 = sadd.s32 1, %s521_s10  ;;  %p448_p0 = scmp.ge.s32.totalorder %s525_s11, 1  ;;  %s525_s11 = sphi %s548_s11, %s12_s11   ;;  %s521_s10 = sphi %s546_s10, %s603_s10   ;;  %s517_s9 = sphi %s544_s9, %s602_s9  }
   0x3   : > { %p26_p1 = scmp.ge.s32.totalorder %s24_s12, 2  ;;  %p137_p2 = scmp.lt.s32.totalorder %s525_s11, 3 }
   0x5   : > { %s605_s12 = smov (%p26_p1, %s24_s12), 0  ;;  %p138_p3 = pnand %p448_p0, %p137_p2 }
   0x6   : > { %p163_p4 = scmp.lt.s32.totalorder (!%p138_p3), %s517_s9, 1 }
   0x7   : > { %141 = sbr.rel (%p138_p3) target bundleno = 646 (0x286), region = 28 }
   0xc   : > { %s607_s9 = smov (!%p163_p4, %s517_s9), 1  ;;  %vm189_vm0 = vcmask 259072   ;;  %vm253_vm9 = vcmask 261120   ;;  %v527_v52 = vmov 0.05   ;;  %v288_v57 = vlaneseq }
   0xd   : > { %s449_s13 = sshll.u32 %s607_s9, 3  ;;  %s176_s25 = scalar_lea.vmem %s601_s2, %s607_s9 }
   0xe   : > { %s173_s16 = scalar_lea.vmem %s600_s1, %s449_s13  ;;  %s166_s19 = scalar_lea.vmem %s599_s0, %s449_s13  ;;  %v289_v59 = vshrl.u32 %v288_v57, 7  ;;  %v291_v60 = vand.u32 127, %v288_v57 }
   0xf   : > { %v187_v0 = vld [vmem:[%s173_s16] sm:$0x3f] }
  0x10   : > { %v221_v1 = vmul.f32 %v187_v0, %v187_v0  ;;  %v571_v2 = vld [vmem:[%s166_s19] sm:$0x3f]  ;;  %vm335_vm15 = vcmp.eq.s32.totalorder %v289_v59, %v291_v60 }
  0x11   : > { %v188_v4 = vmul.f32 %v571_v2, %v571_v2 }
  0x12   : > { %v222_v3 = vsel %vm189_vm0, %v221_v1, 0.0 }
  0x13   : > { %223 = vadd.xlane.f32.xlu0 %v222_v3  ;;  %v190_v5 = vsel %vm189_vm0, %v188_v4, 0.0  ;;  %vm302_vm0 = vcmask 46080  }
  0x1b   : > { %191 = vadd.xlane.f32.xlu0 %v190_v5 }
  0x86   : > { %v224_v6 = vpop.xlane.xlu0 %223 }
  0x87   : > { %487 = vrsqrt.f32 %v224_v6  ;;  %vm232_vm1 = vcmp.eq.f32.partialorder %v224_v6, inf  ;;  %v235_v18 = vand.u32 2147483648, %v224_v6  ;;  %vm234_vm2 = vcmp.eq.f32.partialorder %v224_v6, 0.0 }
  0x8d   : > { %v488_v7 = vpop.eup %487 }
  0x8e   : > { %v226_v8 = vmul.f32 %v488_v7, %v224_v6  ;;  %v192_v9 = vpop.xlane.xlu0 %191 }
  0x8f   : > { %489 = vrsqrt.f32 %v192_v9  ;;  %vm200_vm3 = vcmp.eq.f32.partialorder %v192_v9, inf  ;;  %v203_v26 = vand.u32 2147483648, %v192_v9  ;;  %vm202_vm4 = vcmp.eq.f32.partialorder %v192_v9, 0.0 }
  0x90   : > { %v227_v10 = vmul.f32 %v488_v7, %v226_v8 }
  0x92   : > { %v228_v11 = vmul.f32 0.5, %v227_v10 }
  0x94   : > { %v229_v12 = vsub.f32 1.5, %v228_v11 }
  0x95   : > { %v490_v13 = vpop.eup %489 }
  0x96   : > { %v230_v14 = vmul.f32 %v488_v7, %v229_v12  ;;  %v194_v15 = vmul.f32 %v490_v13, %v192_v9 }
  0x98   : > { %v231_v16 = vmul.f32 %v230_v14, %v224_v6  ;;  %v195_v17 = vmul.f32 %v490_v13, %v194_v15 }
  0x9a   : > { %v233_v19 = vsel %vm232_vm1, %v224_v6, %v231_v16  ;;  %v196_v20 = vmul.f32 0.5, %v195_v17  ;;  %vm295_vm1 = vcmp.lt.s32.totalorder %v291_v60, 6  ;;  %v528_v16 = vmov 0.0  }
  0x9b   : > { %v236_v21 = vsel %vm234_vm2, %v235_v18, %v233_v19  ;;  %vm319_vm2 = vcmask 40960  }
  0x9c   : > { %v197_v22 = vsub.f32 1.5, %v196_v20  ;;  %v237_v23 = vmax.f32 %v236_v21, 1e-12 }
  0x9e   : > { %v198_v24 = vmul.f32 %v490_v13, %v197_v22  ;;  %491 = vrcp.f32 %v237_v23  ;;  %v249_v33 = vand.u32 2147483648, %v237_v23  ;;  %v247_v35 = vand.u32 2147483647, %v237_v23 }
  0x9f   : > { %vm243_vm6 = vweird.f32 %v237_v23 }
  0xa0   : > { %v199_v25 = vmul.f32 %v198_v24, %v192_v9  ;;  %v250_v38 = vor.u32 1.1754944e-38, %v249_v33  ;;  %vm248_vm8 = vcmp.eq.f32.partialorder %v247_v35, 8.507059e+37 }
  0xa2   : > { %v201_v27 = vsel %vm200_vm3, %v192_v9, %v199_v25  ;;  %vm181_vm3 = vcmask 5120  }
  0xa3   : > { %v204_v28 = vsel %vm202_vm4, %v203_v26, %v201_v27  ;;  %182 = vst.msk [vmem:[#allocation2] sm:$0x3f] %vm181_vm3, %v528_v16  ;;  %vm183_vm4 = vcmask 0  }
  0xa4   : > { %v492_v29 = vpop.eup %491  ;;  %v205_v30 = vmax.f32 %v204_v28, 1e-12  ;;  %185 = vst.msk [vmem:[#allocation4] sm:$0x1] %vm183_vm4, %v528_v16 }
  0xa5   : > { %v239_v31 = vmul.f32 %v492_v29, %v237_v23  ;;  %vm244_vm5 = vweird.f32 %v492_v29  ;;  %184 = vst.msk [vmem:[#allocation3] sm:$0x1] %vm183_vm4, %v528_v16 }
  0xa6   : > { %493 = vrcp.f32 %v205_v30  ;;  %vm245_vm7 = vmor %vm243_vm6, %vm244_vm5  ;;  %v217_v44 = vand.u32 2147483648, %v205_v30  ;;  %v215_v46 = vand.u32 2147483647, %v205_v30  ;;  %vm211_vm11 = vweird.f32 %v205_v30 }
  0xa7   : > { %v240_v32 = vsub.f32 1.0, %v239_v31  ;;  %495 = vrcp.f32 %v527_v52 }
  0xa8   : > { %v218_v48 = vor.u32 1.1754944e-38, %v217_v44  ;;  %vm216_vm13 = vcmp.eq.f32.partialorder %v215_v46, 8.507059e+37 }
  0xa9   : > { %v241_v34 = vmul.f32 %v492_v29, %v240_v32 }
  0xaa   : > { %v301_v17 = vld [vmem:[#allocation2] sm:$0x3f] }
  0xab   : > { %v242_v36 = vadd.f32 %v492_v29, %v241_v34 }
  0xac   : > { %v494_v37 = vpop.eup %493 }
  0xad   : > { %v246_v39 = vsel %vm245_vm7, %v492_v29, %v242_v36  ;;  %v207_v40 = vmul.f32 %v494_v37, %v205_v30  ;;  %vm212_vm10 = vweird.f32 %v494_v37  ;;  %v496_v53 = vpop.eup %495 }
  0xae   : > { %v251_v41 = vsel %vm248_vm8, %v250_v38, %v246_v39  ;;  %vm213_vm12 = vmor %vm211_vm11, %vm212_vm10  ;;  %v281_v54 = vmul.f32 0.05, %v496_v53  ;;  %vm285_vm14 = vweird.f32 %v496_v53  ;;  %v315_v38 = vld [vmem:[#allocation4] sm:$0x1]  ;;  %v334_v39 = vld [vmem:[#allocation3] sm:$0x1] }
  0xaf   : > { %v252_v42 = vmul.f32 %v251_v41, %v187_v0  ;;  %v208_v43 = vsub.f32 1.0, %v207_v40 }
  0xb0   : > { %v282_v55 = vsub.f32 1.0, %v281_v54 }
  0xb1   : > { %451 = vmatpush.xpose.msk.msra.mxu0 %vm253_vm9, %v252_v42  ;;  %v209_v45 = vmul.f32 %v494_v37, %v208_v43 }
  0xb2   : > { %v283_v56 = vmul.f32 %v496_v53, %v282_v55 }
  0xb3   : > { %v210_v47 = vadd.f32 %v494_v37, %v209_v45 }
  0xb4   : > { %v284_v58 = vadd.f32 %v496_v53, %v283_v56 }
  0xb5   : > { %v214_v49 = vsel %vm213_vm12, %v494_v37, %v210_v47 }
  0xb6   : > { %v219_v50 = vsel %vm216_vm13, %v218_v48, %v214_v49  ;;  %v286_v61 = vsel %vm285_vm14, %v496_v53, %v284_v58 }
  0xb7   : > { %v220_v51 = vmul.f32 %v219_v50, %v571_v2 }
  0xb9   : > { %452 = vmatmul.msk.f32.vlgmr.msra.gmra.mxu0 %vm253_vm9, %v220_v51 }
 0x136   : > { %v277_v62 = vpop.f32.mrf.mxu0 }
 0x137   : > { %v287_v63 = vmul.f32 %v286_v61, %v277_v62 }
 0x139   : > { %v296_v0 = vmul.f32 1.442695, %v287_v63  ;;  %v336_v1 = vsel %vm335_vm15, %v287_v63, 0.0 }
 0x13a   : > { %v337_v2 = vsel %vm302_vm0, %v336_v1, 0.0 }
 0x13b   : > { %497 = vpow2.f32 %v296_v0  ;;  %338 = vadd.xlane.f32.xlu2 %v337_v2 }
 0x141   : > { %v498_v3 = vpop.eup %497 }
 0x142   : > { %v300_v4 = vsel %vm295_vm1, %v498_v3, 0.0 }
 0x143   : > { %v303_v5 = vsel %vm302_vm0, %v300_v4, 0.0 }
 0x144   : > { %304 = vadd.xlane.f32.xlu1 %v303_v5  ;;  %v309_v6 = vrot.slane %v303_v5, 4 }
 0x146   : > { %v310_v7 = vadd.f32 %v309_v6, %v303_v5 }
 0x148   : > { %v311_v8 = vrot.slane %v310_v7, 2 }
 0x14a   : > { %v312_v9 = vadd.f32 %v311_v8, %v310_v7 }
 0x14c   : > { %v313_v10 = vrot.slane %v312_v9, 1 }
 0x14e   : > { %v314_v11 = vadd.f32 %v313_v10, %v312_v9 }
 0x150   : > { %499 = vlog2.f32 %v314_v11 }
 0x156   : > { %v500_v12 = vpop.eup %499 }
 0x157   : > { %v317_v13 = vmul.f32 0.6931472, %v500_v12 }
 0x159   : > { %v318_v14 = vsel %vm295_vm1, %v317_v13, 0.0 }
 0x15a   : > { %v320_v15 = vsel %vm319_vm2, %v318_v14, 0.0 }
 0x15b   : > { %321 = vadd.xlane.f32.xlu1 %v320_v15 }
 0x1ae   : > { %v339_v21 = vpop.xlane.xlu2 %338 }
 0x1af   : > { %v340_v22 = vrot.slane %v339_v21, 4 }
 0x1b1   : > { %v341_v25 = vadd.f32 %v340_v22, %v339_v21 }
 0x1b3   : > { %v342_v27 = vrot.slane %v341_v25, 2 }
 0x1b5   : > { %v343_v31 = vadd.f32 %v342_v27, %v341_v25 }
 0x1b7   : > { %v305_v18 = vpop.xlane.xlu1 %304  ;;  %v344_v34 = vrot.slane %v343_v31, 1 }
 0x1b8   : > { %v306_v19 = vadd.f32 %v305_v18, %v301_v17 }
 0x1b9   : > { %v345_v37 = vadd.f32 %v344_v34, %v343_v31 }
 0x1ba   : > { %308 = vst.msk [vmem:[#allocation2] sm:$0x3f] %vm181_vm3, %v306_v19 }
 0x1c1   : > { %v353_v20 = vld [vmem:[#allocation2] sm:$0x3f] }
 0x1c2   : > { %501 = vlog2.f32 %v353_v20 }
 0x1c8   : > { %v502_v23 = vpop.eup %501 }
 0x1c9   : > { %v355_v24 = vmul.f32 0.6931472, %v502_v23 }
 0x1cb   : > { %v356_v26 = vsel %vm181_vm3, %v355_v24, 0.0 }
 0x1cc   : > { %357 = vadd.xlane.f32.xlu2 %v356_v26 }
 0x1ce   : > { %v322_v28 = vpop.xlane.xlu1 %321 }
 0x1cf   : > { %v323_v29 = vrot.slane %v322_v28, 4 }
 0x1d1   : > { %v324_v30 = vadd.f32 %v323_v29, %v322_v28 }
 0x1d3   : > { %v325_v32 = vrot.slane %v324_v30, 2 }
 0x1d5   : > { %v326_v33 = vadd.f32 %v325_v32, %v324_v30 }
 0x1d7   : > { %v327_v35 = vrot.slane %v326_v33, 1 }
 0x1d9   : > { %v328_v36 = vadd.f32 %v327_v35, %v326_v33 }
 0x1db   : > { %455 = vpush %v328_v36 }
 0x1dc   : > { %457 = vpush %v345_v37 }
 0x20c   : > { %s456_s20 = spop %455 }
 0x20d   : > { %v330_v40 = vstv %s456_s20  ;;  %s458_s21 = spop %457 }
 0x20e   : > { %v331_v41 = vadd.f32 %v330_v40, %v315_v38  ;;  %v347_v42 = vstv %s458_s21 }
 0x20f   : > { %v348_v43 = vadd.f32 %v347_v42, %v334_v39 }
 0x210   : > { %333 = vst.msk [vmem:[#allocation4] sm:$0x1] %vm183_vm4, %v331_v41 }
 0x211   : > { %349 = vst.msk [vmem:[#allocation3] sm:$0x1] %vm183_vm4, %v348_v43 }
 0x217   : > { %v370_v55 = vld [vmem:[#allocation4] sm:$0x1] }
 0x218   : > { %v367_v51 = vld [vmem:[#allocation3] sm:$0x1] }
 0x219   : > { %v368_v52 = vmul.f32 -2.0, %v367_v51 }
 0x23f   : > { %v358_v44 = vpop.xlane.xlu2 %357 }
 0x240   : > { %v359_v45 = vrot.slane %v358_v44, 4 }
 0x242   : > { %v360_v46 = vadd.f32 %v359_v45, %v358_v44 }
 0x244   : > { %v361_v47 = vrot.slane %v360_v46, 2 }
 0x246   : > { %v362_v48 = vadd.f32 %v361_v47, %v360_v46 }
 0x248   : > { %v363_v49 = vrot.slane %v362_v48, 1 }
 0x24a   : > { %v364_v50 = vadd.f32 %v363_v49, %v362_v48 }
 0x24c   : > { %459 = vpush %v364_v50 }
 0x27d   : > { %s460_s22 = spop %459 }
 0x27e   : > { %v366_v53 = vstv %s460_s22 }
 0x27f   : > { %v369_v54 = vadd.f32 %v368_v52, %v366_v53 }
 0x281   : > { %v371_v56 = vadd.f32 %v370_v55, %v369_v54 }
 0x283   : > { %v372_v57 = vmul.f32 1e-08, %v371_v56 }
 0x285   : > { %373 = vst.msk [vmem:[%s176_s25] sm:$0x1] %vm183_vm4, %v372_v57 }
 0x286 PF: > { %s12_s11 = sadd.s32 1, %s525_s11   ;;  %s602_s9 = smov %s521_s10 }
 0x287   : > { %p9_p5 = scmp.ge.s32.totalorder %s12_s11, 4   ;;  %s603_s10 = smov %s605_s12 }
 0x289   :  { %11 = sbr.rel (!%p9_p5) target bundleno = 2 (0x2), region = 69 }

// kernel: fgkan_forward.3
= control target key start
LH: loop header
LB: loop body
LE: loop exit
PB: predicated region body
PF: predicated region fallthrough
CT: control target
= control target key end

     0   :  { %vm53_vm0 = vcmask 261120   ;;  %vm5796_vm6 = vcmask 130048   ;;  %s5786_s2 = inlined_call_operand.vmem [shape: f32[32,16], index: 2, kind: input, shape index: {}]   ;;  %s5787_s0 = inlined_call_operand.vmem [shape: f32[32,8,32], index: 0, kind: input, shape index: {}]   ;;  %s5788_s3 = inlined_call_operand.vmem [shape: f32[1,16], index: 3, kind: input, shape index: {}]   ;;  %s5789_s1 = inlined_call_operand.vmem [shape: f32[32,8,16], index: 1, kind: input, shape index: {}]   ;;  %s5790_s4 = inlined_call_operand.vmem [shape: f32[32,16], index: 4, kind: output, shape index: {}]  }
   0x1   :  { %v52_v0 = vld [vmem:[%s5786_s2 + $0x18] sm:$0xff]  ;;  %v51_v1 = vld [vmem:[%s5786_s2 + $0x10] sm:$0xff]  ;;  %v50_v2 = vld [vmem:[%s5786_s2 + $0x8] sm:$0xff] }
   0x2   :  { %162 = vmatpush.msra.mxu0 %v52_v0  ;;  %2818 = vmatpush.msra.mxu1 %v52_v0  ;;  %v49_v3 = vld [vmem:[%s5786_s2] sm:$0xff]  ;;  %v18_v8 = vld [vmem:[%s5787_s0 + $0x8] sm:$0xff]  ;;  %v19_v12 = vld [vmem:[%s5787_s0 + $0x10] sm:$0xff] }
   0x3   :  { %2819 = vmatpush.msra.mxu2 %v52_v0  ;;  %2820 = vmatpush.msra.mxu3 %v52_v0  ;;  %v17_v4 = vld [vmem:[%s5787_s0] sm:$0xff]  ;;  %v26_v9 = vld [vmem:[%s5787_s0 + $0x48] sm:$0xff]  ;;  %v27_v13 = vld [vmem:[%s5787_s0 + $0x50] sm:$0xff] }
   0x4   :  { %163 = vmatpush.msra.mxu0 %v51_v1  ;;  %2821 = vmatpush.msra.mxu1 %v51_v1  ;;  %v25_v5 = vld [vmem:[%s5787_s0 + $0x40] sm:$0xff]  ;;  %v34_v10 = vld [vmem:[%s5787_s0 + $0x88] sm:$0xff]  ;;  %v43_v14 = vld [vmem:[%s5787_s0 + $0xd0] sm:$0xff] }
   0x5   :  { %2822 = vmatpush.msra.mxu2 %v51_v1  ;;  %2823 = vmatpush.msra.mxu3 %v51_v1  ;;  %v33_v6 = vld [vmem:[%s5787_s0 + $0x80] sm:$0xff]  ;;  %v42_v11 = vld [vmem:[%s5787_s0 + $0xc8] sm:$0xff]  ;;  %v35_v15 = vld [vmem:[%s5787_s0 + $0x90] sm:$0xff] }
   0x6   :  { %164 = vmatpush.msra.mxu0 %v50_v2  ;;  %2824 = vmatpush.msra.mxu1 %v50_v2  ;;  %v41_v7 = vld [vmem:[%s5787_s0 + $0xc0] sm:$0xff]  ;;  %v20_v16 = vld [vmem:[%s5787_s0 + $0x18] sm:$0xff]  ;;  %v22_v24 = vld [vmem:[%s5787_s0 + $0x28] sm:$0xff] }
   0x7   :  { %2825 = vmatpush.msra.mxu2 %v50_v2  ;;  %2826 = vmatpush.msra.mxu3 %v50_v2  ;;  %v28_v17 = vld [vmem:[%s5787_s0 + $0x58] sm:$0xff]  ;;  %v21_v20 = vld [vmem:[%s5787_s0 + $0x20] sm:$0xff]  ;;  %v30_v25 = vld [vmem:[%s5787_s0 + $0x68] sm:$0xff] }
   0x8   :  { %165 = vmatpush.msra.mxu0 %v49_v3  ;;  %2827 = vmatpush.msra.mxu1 %v49_v3  ;;  %v36_v18 = vld [vmem:[%s5787_s0 + $0x98] sm:$0xff]  ;;  %v29_v21 = vld [vmem:[%s5787_s0 + $0x60] sm:$0xff]  ;;  %v38_v26 = vld [vmem:[%s5787_s0 + $0xa8] sm:$0xff] }
   0x9   :  { %2828 = vmatpush.msra.mxu2 %v49_v3  ;;  %2829 = vmatpush.msra.mxu3 %v49_v3  ;;  %v44_v19 = vld [vmem:[%s5787_s0 + $0xd8] sm:$0xff]  ;;  %v37_v22 = vld [vmem:[%s5787_s0 + $0xa0] sm:$0xff]  ;;  %v46_v27 = vld [vmem:[%s5787_s0 + $0xe8] sm:$0xff] }
   0xa   :  { %2722 = vmatmul.msk.f32.vlgmr.msra.gmra.mxu0 %vm53_vm0, %v17_v4  ;;  %2730 = vmatmul.msk.f32.vlgmr.msra.gmra.mxu1 %vm53_vm0, %v25_v5  ;;  %v45_v23 = vld [vmem:[%s5787_s0 + $0xe0] sm:$0xff]  ;;  %v23_v28 = vld [vmem:[%s5787_s0 + $0x30] sm:$0xff]  ;;  %v24_v32 = vld [vmem:[%s5787_s0 + $0x38] sm:$0xff] }
   0xb   :  { %2738 = vmatmul.msk.f32.vlgmr.msra.gmra.mxu2 %vm53_vm0, %v33_v6  ;;  %2746 = vmatmul.msk.f32.vlgmr.msra.gmra.mxu3 %vm53_vm0, %v41_v7  ;;  %v31_v29 = vld [vmem:[%s5787_s0 + $0x70] sm:$0xff]  ;;  %v32_v33 = vld [vmem:[%s5787_s0 + $0x78] sm:$0xff] }
   0xc   :  { %v39_v30 = vld [vmem:[%s5787_s0 + $0xb0] sm:$0xff]  ;;  %v40_v34 = vld [vmem:[%s5787_s0 + $0xb8] sm:$0xff] }
   0xd   :  { %v47_v31 = vld [vmem:[%s5787_s0 + $0xf0] sm:$0xff]  ;;  %v48_v35 = vld [vmem:[%s5787_s0 + $0xf8] sm:$0xff] }
  0x12   :  { %2723 = vmatmul.msk.f32.gmra.mxu0 %vm53_vm0, %v18_v8  ;;  %2731 = vmatmul.msk.f32.gmra.mxu1 %vm53_vm0, %v26_v9 }
  0x13   :  { %2739 = vmatmul.msk.f32.gmra.mxu2 %vm53_vm0, %v34_v10  ;;  %2747 = vmatmul.msk.f32.gmra.mxu3 %vm53_vm0, %v42_v11 }
  0x1a   :  { %2724 = vmatmul.msk.f32.gmra.mxu0 %vm53_vm0, %v19_v12  ;;  %2732 = vmatmul.msk.f32.gmra.mxu1 %vm53_vm0, %v27_v13 }
  0x1b   :  { %2748 = vmatmul.msk.f32.gmra.mxu3 %vm53_vm0, %v43_v14  ;;  %2740 = vmatmul.msk.f32.gmra.mxu2 %vm53_vm0, %v35_v15 }
  0x22   :  { %2725 = vmatmul.msk.f32.gmra.mxu0 %vm53_vm0, %v20_v16  ;;  %2733 = vmatmul.msk.f32.gmra.mxu1 %vm53_vm0, %v28_v17 }
  0x23   :  { %2741 = vmatmul.msk.f32.gmra.mxu2 %vm53_vm0, %v36_v18  ;;  %2749 = vmatmul.msk.f32.gmra.mxu3 %vm53_vm0, %v44_v19 }
  0x2a   :  { %2726 = vmatmul.msk.f32.gmra.mxu0 %vm53_vm0, %v21_v20  ;;  %2734 = vmatmul.msk.f32.gmra.mxu1 %vm53_vm0, %v29_v21 }
  0x2b   :  { %2742 = vmatmul.msk.f32.gmra.mxu2 %vm53_vm0, %v37_v22  ;;  %2750 = vmatmul.msk.f32.gmra.mxu3 %vm53_vm0, %v45_v23 }
  0x32   :  { %2727 = vmatmul.msk.f32.gmra.mxu0 %vm53_vm0, %v22_v24  ;;  %2735 = vmatmul.msk.f32.gmra.mxu1 %vm53_vm0, %v30_v25 }
  0x33   :  { %2743 = vmatmul.msk.f32.gmra.mxu2 %vm53_vm0, %v38_v26  ;;  %2751 = vmatmul.msk.f32.gmra.mxu3 %vm53_vm0, %v46_v27 }
  0x3a   :  { %2728 = vmatmul.msk.f32.gmra.mxu0 %vm53_vm0, %v23_v28  ;;  %2736 = vmatmul.msk.f32.gmra.mxu1 %vm53_vm0, %v31_v29 }
  0x3b   :  { %2744 = vmatmul.msk.f32.gmra.mxu2 %vm53_vm0, %v39_v30  ;;  %2752 = vmatmul.msk.f32.gmra.mxu3 %vm53_vm0, %v47_v31 }
  0x42   :  { %2729 = vmatmul.msk.f32.gmra.mxu0 %vm53_vm0, %v24_v32  ;;  %2737 = vmatmul.msk.f32.gmra.mxu1 %vm53_vm0, %v32_v33 }
  0x43   :  { %2745 = vmatmul.msk.f32.gmra.mxu2 %vm53_vm0, %v40_v34  ;;  %2753 = vmatmul.msk.f32.gmra.mxu3 %vm53_vm0, %v48_v35 }
  0x87   :  { %v167_v36 = vpop.f32.mrf.mxu0  ;;  %v191_v37 = vpop.f32.mrf.mxu1 }
  0x88   :  { %v2754_v38 = vmul.f32 -1.442695, %v167_v36  ;;  %v2762_v39 = vmul.f32 -1.442695, %v191_v37  ;;  %v3398_v37 = vld [vmem:[%s5788_s3] ss:$0 sm:$0xff] }
  0x8a   :  { %2835 = vpow2.f32 %v2754_v38 }
  0x8b   :  { %2837 = vpow2.f32 %v2762_v39 }
  0x8e   :  { %v215_v40 = vpop.f32.mrf.mxu2  ;;  %v239_v41 = vpop.f32.mrf.mxu3 }
  0x8f   :  { %v2770_v42 = vmul.f32 -1.442695, %v215_v40  ;;  %v2778_v43 = vmul.f32 -1.442695, %v239_v41  ;;  %v170_v44 = vpop.f32.mrf.mxu0  ;;  %v194_v45 = vpop.f32.mrf.mxu1 }
  0x90   :  { %v2836_v46 = vpop.eup %2835  ;;  %v2755_v49 = vmul.f32 -1.442695, %v170_v44  ;;  %v2763_v51 = vmul.f32 -1.442695, %v194_v45 }
  0x91   :  { %v2838_v47 = vpop.eup %2837  ;;  %v3330_v48 = vadd.f32 1.0, %v2836_v46  ;;  %2839 = vpow2.f32 %v2770_v42 }
  0x92   :  { %v3332_v50 = vadd.f32 1.0, %v2838_v47  ;;  %2841 = vpow2.f32 %v2778_v43 }
  0x93   :  { %2843 = vrcp.f32 %v3330_v48  ;;  %v402_v52 = vand.u32 2147483648, %v3330_v48  ;;  %v400_v61 = vand.u32 2147483647, %v3330_v48  ;;  %vm396_vm2 = vweird.f32 %v3330_v48 }
  0x94   :  { %2845 = vrcp.f32 %v3332_v50  ;;  %v520_v55 = vand.u32 2147483647, %v3332_v50  ;;  %v522_v56 = vand.u32 2147483648, %v3332_v50  ;;  %vm516_vm1 = vweird.f32 %v3332_v50 }
  0x95   :  { %2847 = vpow2.f32 %v2755_v49  ;;  %v3348_v4 = vor.u32 1.1754944e-38, %v402_v52  ;;  %vm3363_vm5 = vcmp.eq.f32.partialorder %v400_v61, 8.507059e+37 }
  0x96   :  { %2849 = vpow2.f32 %v2763_v51  ;;  %v218_v53 = vpop.f32.mrf.mxu2  ;;  %v242_v54 = vpop.f32.mrf.mxu3  ;;  %vm3353_vm3 = vcmp.eq.f32.partialorder %v520_v55, 8.507059e+37  ;;  %v523_v7 = vor.u32 1.1754944e-38, %v522_v56 }
  0x97   :  { %v2840_v57 = vpop.eup %2839  ;;  %v2771_v58 = vmul.f32 -1.442695, %v218_v53  ;;  %v173_v59 = vpop.f32.mrf.mxu0  ;;  %v2779_v0 = vmul.f32 -1.442695, %v242_v54 }
  0x98   :  { %v197_v60 = vpop.f32.mrf.mxu1  ;;  %v2842_v62 = vpop.eup %2841  ;;  %v3340_v63 = vadd.f32 1.0, %v2840_v57  ;;  %v2756_v3 = vmul.f32 -1.442695, %v173_v59 }
  0x99   :  { %v3344_v1 = vpop.eup %2843  ;;  %v3346_v2 = vadd.f32 1.0, %v2842_v62  ;;  %2851 = vpow2.f32 %v2771_v58  ;;  %v2764_v10 = vmul.f32 -1.442695, %v197_v60 }
  0x9a   :  { %v3350_v5 = vpop.eup %2845  ;;  %2853 = vrcp.f32 %v3340_v63  ;;  %v392_v8 = vmul.f32 %v3344_v1, %v3330_v48  ;;  %vm397_vm4 = vweird.f32 %v3344_v1  ;;  %v642_v16 = vand.u32 2147483648, %v3340_v63 }
  0x9b   :  { %v2848_v9 = vpop.eup %2847  ;;  %2855 = vrcp.f32 %v3346_v2  ;;  %v512_v11 = vmul.f32 %v3350_v5, %v3332_v50  ;;  %vm517_vm7 = vweird.f32 %v3350_v5  ;;  %v640_v22 = vand.u32 2147483647, %v3340_v63  ;;  %vm3408_vm9 = vmor %vm396_vm2, %vm397_vm4 }
  0x9c   :  { %v2850_v13 = vpop.eup %2849  ;;  %v3367_v14 = vadd.f32 1.0, %v2848_v9  ;;  %2857 = vpow2.f32 %v2779_v0  ;;  %v393_v15 = vsub.f32 1.0, %v392_v8  ;;  %v3376_v23 = vor.u32 1.1754944e-38, %v642_v16  ;;  %vm3388_vm8 = vmor %vm516_vm1, %vm517_vm7 }
  0x9d   :  { %v3370_v17 = vadd.f32 1.0, %v2850_v13  ;;  %2859 = vpow2.f32 %v2756_v3  ;;  %v513_v18 = vsub.f32 1.0, %v512_v11  ;;  %vm636_vm10 = vweird.f32 %v3340_v63 }
  0x9e   :  { %2861 = vrcp.f32 %v3367_v14  ;;  %v245_v19 = vpop.f32.mrf.mxu3  ;;  %v221_v20 = vpop.f32.mrf.mxu2  ;;  %v394_v21 = vmul.f32 %v3344_v1, %v393_v15  ;;  %vm756_vm13 = vweird.f32 %v3346_v2  ;;  %vm3435_vm14 = vcmp.eq.f32.partialorder %v640_v22, 8.507059e+37 }
  0x9f   :  { %v2852_v24 = vpop.eup %2851  ;;  %2863 = vrcp.f32 %v3370_v17  ;;  %v2780_v25 = vmul.f32 -1.442695, %v245_v19  ;;  %v176_v26 = vpop.f32.mrf.mxu0  ;;  %v2772_v27 = vmul.f32 -1.442695, %v221_v20  ;;  %v514_v29 = vmul.f32 %v3350_v5, %v513_v18 }
  0xa0   :  { %v200_v28 = vpop.f32.mrf.mxu1  ;;  %v3380_v30 = vpop.eup %2853  ;;  %v3382_v31 = vadd.f32 1.0, %v2852_v24  ;;  %2865 = vpow2.f32 %v2764_v10  ;;  %v2757_v32 = vmul.f32 -1.442695, %v176_v26  ;;  %v395_v38 = vadd.f32 %v3344_v1, %v394_v21 }
  0xa1   :  { %v2765_v33 = vmul.f32 -1.442695, %v200_v28  ;;  %v3392_v35 = vpop.eup %2855  ;;  %2867 = vpow2.f32 %v2780_v25  ;;  %v515_v36 = vadd.f32 %v3350_v5, %v514_v29  ;;  %v632_v39 = vmul.f32 %v3380_v30, %v3340_v63 }
  0xa2   :  { %v2858_v40 = vpop.eup %2857  ;;  %2869 = vrcp.f32 %v3382_v31  ;;  %vm637_vm11 = vweird.f32 %v3380_v30  ;;  %v752_v42 = vmul.f32 %v3392_v35, %v3346_v2  ;;  %vm757_vm12 = vweird.f32 %v3392_v35 }
  0xa3   :  { %v2860_v43 = vpop.eup %2859  ;;  %v3417_v44 = vadd.f32 1.0, %v2858_v40  ;;  %2871 = vpow2.f32 %v2757_v32  ;;  %v519_v45 = vsel %vm3388_vm8, %v3350_v5, %v515_v36  ;;  %v399_v46 = vsel %vm3408_vm9, %v3344_v1, %v395_v38  ;;  %vm638_vm0 = vmor %vm636_vm10, %vm637_vm11 }
  0xa4   :  { %v3426_v47 = vpop.eup %2861  ;;  %v3428_v48 = vadd.f32 1.0, %v2860_v43  ;;  %2873 = vpow2.f32 %v2772_v27  ;;  %v524_v49 = vsel %vm3353_vm3, %v523_v7, %v519_v45  ;;  %v404_v50 = vsel %vm3363_vm5, %v3348_v4, %v399_v46  ;;  %vm758_vm1 = vmor %vm756_vm13, %vm757_vm12 }
  0xa5   :  { %v3439_v52 = vpop.eup %2863  ;;  %2875 = vrcp.f32 %v3417_v44  ;;  %v883_v53 = vmul.f32 %v3398_v37, %v524_v49  ;;  %v875_v54 = vmul.f32 %v3398_v37, %v404_v50  ;;  %v633_v55 = vsub.f32 1.0, %v632_v39 }
  0xa6   :  { %v2866_v56 = vpop.eup %2865  ;;  %2877 = vrcp.f32 %v3428_v48  ;;  %v224_v57 = vpop.f32.mrf.mxu2  ;;  %v753_v59 = vsub.f32 1.0, %v752_v42  ;;  %v760_v60 = vand.u32 2147483647, %v3346_v2  ;;  %v762_v61 = vand.u32 2147483648, %v3346_v2 }
  0xa7   :  { %v248_v58 = vpop.f32.mrf.mxu3  ;;  %v2868_v62 = vpop.eup %2867  ;;  %v3447_v0 = vadd.f32 1.0, %v2866_v56  ;;  %2879 = vpow2.f32 %v2765_v33  ;;  %v932_v1 = vsel %vm5796_vm6, %v883_v53, 0.0  ;;  %v908_v3 = vsel %vm5796_vm6, %v875_v54, 0.0 }
  0xa8   :  { %v179_v4 = vpop.f32.mrf.mxu0  ;;  %v3451_v5 = vpop.eup %2869  ;;  %v3453_v6 = vadd.f32 1.0, %v2868_v62  ;;  %933 = vadd.xlane.f32.xlu2 %v932_v1  ;;  %909 = vadd.xlane.f32.xlu0 %v908_v3  ;;  %v2773_v7 = vmul.f32 -1.442695, %v224_v57  ;;  %v2781_v8 = vmul.f32 -1.442695, %v248_v58  ;;  %v634_v9 = vmul.f32 %v3380_v30, %v633_v55 }
  0xa9   :  { %v203_v10 = vpop.f32.mrf.mxu1  ;;  %v2872_v11 = vpop.eup %2871  ;;  %2881 = vrcp.f32 %v3447_v0  ;;  %v2758_v12 = vmul.f32 -1.442695, %v179_v4  ;;  %v754_v13 = vmul.f32 %v3392_v35, %v753_v59  ;;  %vm3458_vm15 = vcmp.eq.f32.partialorder %v760_v60, 8.507059e+37 }
  0xaa   :  { %v2874_v16 = vpop.eup %2873  ;;  %2883 = vrcp.f32 %v3453_v6  ;;  %v3463_v18 = vadd.f32 1.0, %v2872_v11  ;;  %v635_v19 = vadd.f32 %v3380_v30, %v634_v9  ;;  %v763_v20 = vor.u32 1.1754944e-38, %v762_v61 }
  0xab   :  { %v3466_v21 = vpop.eup %2875  ;;  %v3468_v22 = vadd.f32 1.0, %v2874_v16  ;;  %2885 = vpow2.f32 %v2773_v7  ;;  %v755_v24 = vadd.f32 %v3392_v35, %v754_v13  ;;  %v2766_v25 = vmul.f32 -1.442695, %v203_v10 }
  0xac   :  { %v3475_v26 = vpop.eup %2877  ;;  %2887 = vrcp.f32 %v3463_v18  ;;  %v639_v27 = vsel %vm638_vm0, %v3380_v30, %v635_v19  ;;  %v767_v28 = vmul.f32 %v3466_v21, %v3417_v44  ;;  %vm771_vm2 = vweird.f32 %v3417_v44 }
  0xad   :  { %v2880_v63 = vpop.eup %2879  ;;  %2889 = vrcp.f32 %v3468_v22  ;;  %v644_v29 = vsel %vm3435_vm14, %v3376_v23, %v639_v27  ;;  %v759_v32 = vsel %vm758_vm1, %v3392_v35, %v755_v24  ;;  %vm772_vm3 = vweird.f32 %v3466_v21 }
  0xae   :  { %v3492_v30 = vadd.f32 1.0, %v2880_v63  ;;  %2891 = vpow2.f32 %v2781_v8  ;;  %v891_v2 = vmul.f32 %v3398_v37, %v644_v29  ;;  %v764_v33 = vsel %vm3458_vm15, %v763_v20, %v759_v32  ;;  %v227_v34 = vpop.f32.mrf.mxu2  ;;  %vm773_vm8 = vmor %vm771_vm2, %vm772_vm3 }
  0xaf   :  { %v251_v36 = vpop.f32.mrf.mxu3  ;;  %v3497_v38 = vpop.eup %2881  ;;  %2893 = vpow2.f32 %v2758_v12  ;;  %v899_v39 = vmul.f32 %v3398_v37, %v764_v33  ;;  %v2774_v23 = vmul.f32 -1.442695, %v227_v34  ;;  %v768_v42 = vsub.f32 1.0, %v767_v28 }
  0xb0   :  { %v2782_v40 = vmul.f32 -1.442695, %v251_v36  ;;  %v3500_v35 = vpop.eup %2883  ;;  %2895 = vrcp.f32 %v3492_v30  ;;  %v956_v41 = vsel %vm5796_vm6, %v891_v2, 0.0  ;;  %v775_v43 = vand.u32 2147483647, %v3417_v44  ;;  %v182_v63 = vpop.f32.mrf.mxu0 }
  0xb1   :  { %v2886_v45 = vpop.eup %2885  ;;  %957 = vadd.xlane.f32.xlu1 %v956_v41  ;;  %v980_v46 = vsel %vm5796_vm6, %v899_v39, 0.0  ;;  %2897 = vpow2.f32 %v2766_v25  ;;  %v777_v49 = vand.u32 2147483648, %v3417_v44  ;;  %v647_v50 = vmul.f32 %v3451_v5, %v3382_v31  ;;  %v206_v29 = vpop.f32.mrf.mxu1 }
  0xb2   :  { %v3509_v51 = vpop.eup %2887  ;;  %v3511_v53 = vadd.f32 1.0, %v2886_v45  ;;  %981 = vadd.xlane.f32.xlu0 %v980_v46  ;;  %2899 = vpow2.f32 %v2774_v23  ;;  %v769_v54 = vmul.f32 %v3466_v21, %v768_v42  ;;  %vm3514_vm4 = vcmp.eq.f32.partialorder %v775_v43, 8.507059e+37 }
  0xb3   :  { %v3518_v56 = vpop.eup %2889  ;;  %2901 = vpow2.f32 %v2782_v40  ;;  %v778_v57 = vor.u32 1.1754944e-38, %v777_v49  ;;  %v648_v58 = vsub.f32 1.0, %v647_v50  ;;  %vm651_vm5 = vweird.f32 %v3382_v31 }
  0xb4   :  { %v2892_v59 = vpop.eup %2891  ;;  %2903 = vrcp.f32 %v3511_v53  ;;  %v770_v60 = vadd.f32 %v3466_v21, %v769_v54  ;;  %vm652_vm7 = vweird.f32 %v3451_v5  ;;  %v655_v61 = vand.u32 2147483647, %v3382_v31 }
  0xb5   :  { %v2894_v62 = vpop.eup %2893  ;;  %v3525_v1 = vadd.f32 1.0, %v2892_v59  ;;  %v649_v3 = vmul.f32 %v3451_v5, %v648_v58  ;;  %v657_v4 = vand.u32 2147483648, %v3382_v31  ;;  %v407_v7 = vmul.f32 %v3426_v47, %v3367_v14  ;;  %vm3542_vm9 = vmor %vm651_vm5, %vm652_vm7 }
  0xb6   :  { %v3535_v8 = vpop.eup %2895  ;;  %v3537_v9 = vadd.f32 1.0, %v2894_v62  ;;  %v774_v10 = vsel %vm773_vm8, %v3466_v21, %v770_v60  ;;  %vm3546_vm10 = vcmp.eq.f32.partialorder %v655_v61, 8.507059e+37  ;;  %vm411_vm11 = vweird.f32 %v3367_v14  ;;  %v230_v36 = vpop.f32.mrf.mxu2 }
  0xb7   :  { %v2898_v12 = vpop.eup %2897  ;;  %2905 = vrcp.f32 %v3525_v1  ;;  %v779_v13 = vsel %vm3514_vm4, %v778_v57, %v774_v10  ;;  %v650_v15 = vadd.f32 %v3451_v5, %v649_v3  ;;  %v658_v16 = vor.u32 1.1754944e-38, %v657_v4 }
  0xb8   :  { %v2900_v31 = vpop.eup %2899  ;;  %2907 = vrcp.f32 %v3537_v9  ;;  %v3556_v19 = vadd.f32 1.0, %v2898_v12  ;;  %v900_v20 = vmul.f32 %v3398_v37, %v779_v13  ;;  %v408_v21 = vsub.f32 1.0, %v407_v7 }
  0xb9   :  { %v2902_v24 = vpop.eup %2901  ;;  %v3559_v25 = vadd.f32 1.0, %v2900_v31  ;;  %v654_v27 = vsel %vm3542_vm9, %v3451_v5, %v650_v15  ;;  %vm412_vm12 = vweird.f32 %v3426_v47  ;;  %v415_v28 = vand.u32 2147483647, %v3367_v14 }
  0xba   :  { %v3566_v32 = vpop.eup %2903  ;;  %2909 = vrcp.f32 %v3556_v19  ;;  %v3569_v2 = vadd.f32 1.0, %v2902_v24  ;;  %v983_v33 = vsel %vm5796_vm6, %v900_v20, 0.0  ;;  %v659_v34 = vsel %vm3546_vm10, %v658_v16, %v654_v27  ;;  %vm413_vm14 = vmor %vm411_vm11, %vm412_vm12 }
  0xbb   :  { %2911 = vrcp.f32 %v3559_v25  ;;  %984 = vadd.xlane.f32.xlu1 %v983_v33  ;;  %v892_v5 = vmul.f32 %v3398_v37, %v659_v34  ;;  %v409_v39 = vmul.f32 %v3426_v47, %v408_v21  ;;  %vm3577_vm13 = vcmp.eq.f32.partialorder %v415_v28, 8.507059e+37 }
  0xbc   :  { %2913 = vrcp.f32 %v3569_v2  ;;  %v417_v40 = vand.u32 2147483648, %v3367_v14  ;;  %v2759_v41 = vmul.f32 -1.442695, %v182_v63  ;;  %v2767_v42 = vmul.f32 -1.442695, %v206_v29 }
  0xbd   :  { %v3583_v43 = vpop.eup %2905  ;;  %v959_v45 = vsel %vm5796_vm6, %v892_v5, 0.0  ;;  %v410_v46 = vadd.f32 %v3426_v47, %v409_v39  ;;  %v2775_v49 = vmul.f32 -1.442695, %v230_v36  ;;  %v782_v50 = vmul.f32 %v3500_v35, %v3453_v6 }
  0xbe   :  { %v3589_v54 = vpop.eup %2907  ;;  %960 = vadd.xlane.f32.xlu2 %v959_v45  ;;  %v418_v55 = vor.u32 1.1754944e-38, %v417_v40  ;;  %2915 = vpow2.f32 %v2759_v41  ;;  %vm786_vm15 = vweird.f32 %v3453_v6  ;;  %vm787_vm0 = vweird.f32 %v3500_v35  ;;  %v233_v45 = vpop.f32.mrf.mxu2 }
  0xbf   :  { %v414_v57 = vsel %vm413_vm14, %v3426_v47, %v410_v46  ;;  %2917 = vpow2.f32 %v2767_v42  ;;  %v783_v58 = vsub.f32 1.0, %v782_v50  ;;  %v790_v59 = vand.u32 2147483647, %v3453_v6  ;;  %vm3621_vm3 = vmor %vm786_vm15, %vm787_vm0  ;;  %v185_v42 = vpop.f32.mrf.mxu0 }
  0xc0   :  { %v3599_v60 = vpop.eup %2909  ;;  %v419_v61 = vsel %vm3577_vm13, %v418_v55, %v414_v57  ;;  %2919 = vpow2.f32 %v2775_v49  ;;  %v792_v14 = vand.u32 2147483648, %v3453_v6  ;;  %v422_v62 = vmul.f32 %v3475_v26, %v3428_v48  ;;  %v254_v55 = vpop.f32.mrf.mxu3 }
  0xc1   :  { %v3606_v3 = vpop.eup %2911  ;;  %v876_v4 = vmul.f32 %v3398_v37, %v419_v61  ;;  %v784_v47 = vmul.f32 %v3500_v35, %v783_v58  ;;  %vm3610_vm1 = vcmp.eq.f32.partialorder %v790_v59, 8.507059e+37  ;;  %vm426_vm2 = vweird.f32 %v3428_v48 }
  0xc2   :  { %v3615_v10 = vpop.eup %2913  ;;  %v793_v44 = vor.u32 1.1754944e-38, %v792_v14  ;;  %v423_v12 = vsub.f32 1.0, %v422_v62  ;;  %vm427_vm4 = vweird.f32 %v3475_v26  ;;  %v430_v13 = vand.u32 2147483647, %v3428_v48 }
  0xc3   :  { %v911_v15 = vsel %vm5796_vm6, %v876_v4, 0.0  ;;  %v785_v16 = vadd.f32 %v3500_v35, %v784_v47  ;;  %v432_v31 = vand.u32 2147483648, %v3428_v48  ;;  %v527_v20 = vmul.f32 %v3439_v52, %v3370_v17  ;;  %vm428_vm9 = vmor %vm426_vm2, %vm427_vm4 }
  0xc4   :  { %v2916_v6 = vpop.eup %2915  ;;  %912 = vadd.xlane.f32.xlu0 %v911_v15  ;;  %v424_v21 = vmul.f32 %v3475_v26, %v423_v12  ;;  %vm3633_vm5 = vcmp.eq.f32.partialorder %v430_v13, 8.507059e+37  ;;  %vm531_vm7 = vweird.f32 %v3370_v17  ;;  %vm532_vm8 = vweird.f32 %v3439_v52 }
  0xc5   :  { %v2918_v27 = vpop.eup %2917  ;;  %v3639_v28 = vadd.f32 1.0, %v2916_v6  ;;  %v789_v63 = vsel %vm3621_vm3, %v3500_v35, %v785_v16  ;;  %v433_v29 = vor.u32 1.1754944e-38, %v432_v31  ;;  %v528_v33 = vsub.f32 1.0, %v527_v20  ;;  %vm3665_vm10 = vmor %vm531_vm7, %vm532_vm8 }
  0xc6   :  { %v2920_v34 = vpop.eup %2919  ;;  %v3644_v36 = vadd.f32 1.0, %v2918_v27  ;;  %v794_v5 = vsel %vm3610_vm1, %v793_v44, %v789_v63  ;;  %v425_v39 = vadd.f32 %v3475_v26, %v424_v21  ;;  %v535_v23 = vand.u32 2147483647, %v3370_v17 }
  0xc7   :  { %2921 = vrcp.f32 %v3639_v28  ;;  %v3651_v40 = vadd.f32 1.0, %v2920_v34  ;;  %v901_v41 = vmul.f32 %v3398_v37, %v794_v5  ;;  %v529_v35 = vmul.f32 %v3439_v52, %v528_v33 }
  0xc8   :  { %2923 = vrcp.f32 %v3644_v36  ;;  %v429_v46 = vsel %vm428_vm9, %v3475_v26, %v425_v39  ;;  %vm3669_vm11 = vcmp.eq.f32.partialorder %v535_v23, 8.507059e+37  ;;  %v537_v48 = vand.u32 2147483648, %v3370_v17 }
  0xc9   :  { %2925 = vrcp.f32 %v3651_v40  ;;  %v986_v57 = vsel %vm5796_vm6, %v901_v41, 0.0  ;;  %v434_v26 = vsel %vm3633_vm5, %v433_v29, %v429_v46  ;;  %v530_v58 = vadd.f32 %v3439_v52, %v529_v35 }
  0xca   :  { %987 = vadd.xlane.f32.xlu2 %v986_v57  ;;  %v877_v59 = vmul.f32 %v3398_v37, %v434_v26  ;;  %v538_v61 = vor.u32 1.1754944e-38, %v537_v48  ;;  %v2760_v14 = vmul.f32 -1.442695, %v185_v42  ;;  %v2776_v62 = vmul.f32 -1.442695, %v233_v45  ;;  %v188_v57 = vpop.f32.mrf.mxu0 }
  0xcb   :  { %v534_v17 = vsel %vm3665_vm10, %v3439_v52, %v530_v58  ;;  %v2783_v4 = vmul.f32 -1.442695, %v254_v55  ;;  %v557_v47 = vmul.f32 %v3535_v8, %v3492_v30  ;;  %vm561_vm12 = vweird.f32 %v3492_v30 }
  0xcc   :  { %v914_v7 = vsel %vm5796_vm6, %v877_v59, 0.0  ;;  %v539_v11 = vsel %vm3669_vm11, %v538_v61, %v534_v17  ;;  %2927 = vpow2.f32 %v2760_v14  ;;  %vm562_vm13 = vweird.f32 %v3535_v8  ;;  %v209_v17 = vpop.f32.mrf.mxu1 }
  0xcd   :  { %v3690_v44 = vpop.eup %2921  ;;  %915 = vadd.xlane.f32.xlu1 %v914_v7  ;;  %v884_v12 = vmul.f32 %v3398_v37, %v539_v11  ;;  %2929 = vpow2.f32 %v2776_v62  ;;  %v558_v52 = vsub.f32 1.0, %v557_v47  ;;  %v565_v13 = vand.u32 2147483647, %v3492_v30  ;;  %vm3713_vm1 = vmor %vm561_vm12, %vm562_vm13  ;;  %v236_v47 = vpop.f32.mrf.mxu2 }
  0xce   :  { %v3694_v15 = vpop.eup %2923  ;;  %2931 = vpow2.f32 %v2783_v4  ;;  %v567_v16 = vand.u32 2147483648, %v3492_v30  ;;  %v542_v31 = vmul.f32 %v3497_v38, %v3447_v0  ;;  %vm546_vm14 = vweird.f32 %v3447_v0 }
  0xcf   :  { %v3700_v20 = vpop.eup %2925  ;;  %v935_v6 = vsel %vm5796_vm6, %v884_v12, 0.0  ;;  %v559_v21 = vmul.f32 %v3535_v8, %v558_v52  ;;  %vm3704_vm15 = vcmp.eq.f32.partialorder %v565_v13, 8.507059e+37  ;;  %vm547_vm0 = vweird.f32 %v3497_v38 }
  0xd0   :  { %936 = vadd.xlane.f32.xlu0 %v935_v6  ;;  %v568_v63 = vor.u32 1.1754944e-38, %v567_v16  ;;  %v543_v29 = vsub.f32 1.0, %v542_v31  ;;  %v550_v33 = vand.u32 2147483647, %v3447_v0  ;;  %v552_v34 = vand.u32 2147483648, %v3447_v0  ;;  %vm3739_vm5 = vmor %vm546_vm14, %vm547_vm0 }
  0xd1   :  { %v560_v5 = vadd.f32 %v3535_v8, %v559_v21  ;;  %v662_v39 = vmul.f32 %v3518_v56, %v3468_v22  ;;  %vm666_vm2 = vweird.f32 %v3468_v22  ;;  %vm667_vm3 = vweird.f32 %v3518_v56 }
  0xd2   :  { %v2928_v30 = vpop.eup %2927  ;;  %v544_v23 = vmul.f32 %v3497_v38, %v543_v29  ;;  %vm3725_vm4 = vcmp.eq.f32.partialorder %v550_v33, 8.507059e+37  ;;  %v553_v35 = vor.u32 1.1754944e-38, %v552_v34  ;;  %v670_v42 = vand.u32 2147483647, %v3468_v22  ;;  %vm3766_vm8 = vmor %vm666_vm2, %vm667_vm3 }
  0xd3   :  { %v2930_v45 = vpop.eup %2929  ;;  %v3730_v46 = vadd.f32 1.0, %v2928_v30  ;;  %v564_v49 = vsel %vm3713_vm1, %v3535_v8, %v560_v5  ;;  %v663_v48 = vsub.f32 1.0, %v662_v39  ;;  %v672_v55 = vand.u32 2147483648, %v3468_v22  ;;  %v257_v5 = vpop.f32.mrf.mxu3 }
  0xd4   :  { %v2932_v26 = vpop.eup %2931  ;;  %v3744_v58 = vadd.f32 1.0, %v2930_v45  ;;  %v569_v59 = vsel %vm3704_vm15, %v568_v63, %v564_v49  ;;  %v545_v8 = vadd.f32 %v3497_v38, %v544_v23  ;;  %vm3749_vm7 = vcmp.eq.f32.partialorder %v670_v42, 8.507059e+37 }
  0xd5   :  { %2933 = vrcp.f32 %v3730_v46  ;;  %v3754_v0 = vadd.f32 1.0, %v2932_v26  ;;  %v886_v14 = vmul.f32 %v3398_v37, %v569_v59  ;;  %v664_v62 = vmul.f32 %v3518_v56, %v663_v48 }
  0xd6   :  { %2935 = vrcp.f32 %v3744_v58  ;;  %v549_v4 = vsel %vm3739_vm5, %v3497_v38, %v545_v8  ;;  %v673_v7 = vor.u32 1.1754944e-38, %v672_v55  ;;  %v2761_v11 = vmul.f32 -1.442695, %v188_v57 }
  0xd7   :  { %2937 = vrcp.f32 %v3754_v0  ;;  %v941_v12 = vsel %vm5796_vm6, %v886_v14, 0.0  ;;  %v554_v52 = vsel %vm3725_vm4, %v553_v35, %v549_v4  ;;  %v665_v13 = vadd.f32 %v3518_v56, %v664_v62 }
  0xd8   :  { %942 = vadd.xlane.f32.xlu2 %v941_v12  ;;  %v885_v38 = vmul.f32 %v3398_v37, %v554_v52  ;;  %2939 = vpow2.f32 %v2761_v11  ;;  %v2768_v22 = vmul.f32 -1.442695, %v209_v17  ;;  %v437_v16 = vmul.f32 %v3509_v51, %v3463_v18 }
  0xd9   :  { %v669_v31 = vsel %vm3766_vm8, %v3518_v56, %v665_v13  ;;  %vm441_vm9 = vweird.f32 %v3463_v18  ;;  %vm442_vm10 = vweird.f32 %v3509_v51  ;;  %v445_v6 = vand.u32 2147483647, %v3463_v18 }
  0xda   :  { %v938_v21 = vsel %vm5796_vm6, %v885_v38, 0.0  ;;  %v674_v24 = vsel %vm3749_vm7, %v673_v7, %v669_v31  ;;  %2941 = vpow2.f32 %v2768_v22  ;;  %v438_v27 = vsub.f32 1.0, %v437_v16  ;;  %vm3810_vm14 = vmor %vm441_vm9, %vm442_vm10 }
  0xdb   :  { %v3787_v63 = vpop.eup %2933  ;;  %939 = vadd.xlane.f32.xlu1 %v938_v21  ;;  %v893_v29 = vmul.f32 %v3398_v37, %v674_v24  ;;  %vm3790_vm11 = vcmp.eq.f32.partialorder %v445_v6, 8.507059e+37  ;;  %v447_v33 = vand.u32 2147483648, %v3463_v18  ;;  %v452_v34 = vmul.f32 %v3589_v54, %v3537_v9 }
  0xdc   :  { %v3797_v39 = vpop.eup %2935  ;;  %v439_v30 = vmul.f32 %v3509_v51, %v438_v27  ;;  %vm456_vm12 = vweird.f32 %v3537_v9  ;;  %vm457_vm13 = vweird.f32 %v3589_v54  ;;  %v460_v23 = vand.u32 2147483647, %v3537_v9 }
  0xdd   :  { %v3803_v41 = vpop.eup %2937  ;;  %v962_v35 = vsel %vm5796_vm6, %v893_v29, 0.0  ;;  %v448_v45 = vor.u32 1.1754944e-38, %v447_v33  ;;  %v453_v49 = vsub.f32 1.0, %v452_v34  ;;  %v462_v50 = vand.u32 2147483648, %v3537_v9  ;;  %vm3833_vm1 = vmor %vm456_vm12, %vm457_vm13 }
  0xde   :  { %v2940_v48 = vpop.eup %2939  ;;  %963 = vadd.xlane.f32.xlu0 %v962_v35  ;;  %v440_v55 = vadd.f32 %v3509_v51, %v439_v30  ;;  %vm3816_vm15 = vcmp.eq.f32.partialorder %v460_v23, 8.507059e+37  ;;  %v2784_v26 = vmul.f32 -1.442695, %v257_v5  ;;  %v797_v18 = vmul.f32 %v3583_v43, %v3525_v1 }
  0xdf   :  { %v3822_v59 = vadd.f32 1.0, %v2940_v48  ;;  %v454_v8 = vmul.f32 %v3589_v54, %v453_v49  ;;  %v463_v61 = vor.u32 1.1754944e-38, %v462_v50  ;;  %vm801_vm0 = vweird.f32 %v3525_v1  ;;  %v212_v48 = vpop.f32.mrf.mxu1 }
  0xe0   :  { %v2942_v14 = vpop.eup %2941  ;;  %v444_v62 = vsel %vm3810_vm14, %v3509_v51, %v440_v55  ;;  %2943 = vpow2.f32 %v2784_v26  ;;  %v798_v4 = vsub.f32 1.0, %v797_v18  ;;  %vm802_vm2 = vweird.f32 %v3583_v43 }
  0xe1   :  { %2945 = vrcp.f32 %v3822_v59  ;;  %v3839_v7 = vadd.f32 1.0, %v2942_v14  ;;  %v449_v51 = vsel %vm3790_vm11, %v448_v45, %v444_v62  ;;  %v455_v11 = vadd.f32 %v3589_v54, %v454_v8  ;;  %vm3854_vm3 = vmor %vm801_vm0, %vm802_vm2 }
  0xe2   :  { %v878_v9 = vmul.f32 %v3398_v37, %v449_v51  ;;  %v799_v12 = vmul.f32 %v3583_v43, %v798_v4  ;;  %v805_v52 = vand.u32 2147483647, %v3525_v1  ;;  %v807_v13 = vand.u32 2147483648, %v3525_v1 }
  0xe3   :  { %2947 = vrcp.f32 %v3839_v7  ;;  %v459_v38 = vsel %vm3833_vm1, %v3589_v54, %v455_v11  ;;  %v2777_v16 = vmul.f32 -1.442695, %v236_v47  ;;  %v677_v31 = vmul.f32 %v3566_v32, %v3511_v53 }
  0xe4   :  { %v917_v6 = vsel %vm5796_vm6, %v878_v9, 0.0  ;;  %v464_v21 = vsel %vm3816_vm15, %v463_v61, %v459_v38  ;;  %v800_v24 = vadd.f32 %v3583_v43, %v799_v12  ;;  %vm806_vm4 = vcmp.eq.f32.partialorder %v805_v52, 8.507059e+37 }
  0xe5   :  { %918 = vadd.xlane.f32.xlu1 %v917_v6  ;;  %v879_v54 = vmul.f32 %v3398_v37, %v464_v21  ;;  %v808_v1 = vor.u32 1.1754944e-38, %v807_v13  ;;  %2949 = vpow2.f32 %v2777_v16  ;;  %v678_v27 = vsub.f32 1.0, %v677_v31  ;;  %v260_v13 = vpop.f32.mrf.mxu3 }
  0xe6   :  { %v2944_v29 = vpop.eup %2943  ;;  %v804_v56 = vsel %vm3854_vm3, %v3583_v43, %v800_v24  ;;  %vm681_vm5 = vweird.f32 %v3511_v53  ;;  %vm682_vm7 = vweird.f32 %v3566_v32  ;;  %v685_v33 = vand.u32 2147483647, %v3511_v53 }
  0xe7   :  { %v3871_v34 = vpop.eup %2945  ;;  %v920_v5 = vsel %vm5796_vm6, %v879_v54, 0.0  ;;  %v3874_v30 = vadd.f32 1.0, %v2944_v29  ;;  %v809_v23 = vsel %vm806_vm4, %v808_v1, %v804_v56  ;;  %v679_v35 = vmul.f32 %v3566_v32, %v678_v27  ;;  %vm3882_vm8 = vmor %vm681_vm5, %vm682_vm7 }
  0xe8   :  { %v3879_v42 = vmul.f32 %v3871_v34, %v3822_v59  ;;  %921 = vadd.xlane.f32.xlu2 %v920_v5  ;;  %v902_v43 = vmul.f32 %v3398_v37, %v809_v23  ;;  %vm3886_vm9 = vcmp.eq.f32.partialorder %v685_v33, 8.507059e+37  ;;  %v687_v50 = vand.u32 2147483648, %v3511_v53 }
  0xe9   :  { %v3891_v55 = vpop.eup %2947  ;;  %2951 = vrcp.f32 %v3874_v30  ;;  %v680_v57 = vadd.f32 %v3566_v32, %v679_v35  ;;  %v692_v26 = vmul.f32 %v3606_v3, %v3559_v25  ;;  %vm696_vm10 = vweird.f32 %v3559_v25 }
  0xea   :  { %v989_v18 = vsel %vm5796_vm6, %v902_v43, 0.0  ;;  %v688_v8 = vor.u32 1.1754944e-38, %v687_v50  ;;  %vm697_vm11 = vweird.f32 %v3606_v3  ;;  %v700_v61 = vand.u32 2147483647, %v3559_v25 }
  0xeb   :  { %v2950_v53 = vpop.eup %2949  ;;  %990 = vadd.xlane.f32.xlu0 %v989_v18  ;;  %v684_v14 = vsel %vm3882_vm8, %v3566_v32, %v680_v57  ;;  %v693_v62 = vsub.f32 1.0, %v692_v26  ;;  %v702_v17 = vand.u32 2147483648, %v3559_v25  ;;  %v2769_v4 = vmul.f32 -1.442695, %v212_v48  ;;  %vm3922_vm13 = vmor %vm696_vm10, %vm697_vm11 }
  0xec   :  { %v3905_v47 = vadd.f32 1.0, %v2950_v53  ;;  %v689_v51 = vsel %vm3886_vm9, %v688_v8, %v684_v14  ;;  %vm3909_vm12 = vcmp.eq.f32.partialorder %v700_v61, 8.507059e+37  ;;  %v572_v9 = vmul.f32 %v3599_v60, %v3556_v19 }
  0xed   :  { %v894_v12 = vmul.f32 %v3398_v37, %v689_v51  ;;  %v694_v32 = vmul.f32 %v3606_v3, %v693_v62  ;;  %v703_v52 = vor.u32 1.1754944e-38, %v702_v17  ;;  %2953 = vpow2.f32 %v2769_v4 }
  0xee   :  { %2955 = vrcp.f32 %v3905_v47  ;;  %v573_v22 = vsub.f32 1.0, %v572_v9  ;;  %vm576_vm14 = vweird.f32 %v3556_v19  ;;  %vm577_vm15 = vweird.f32 %v3599_v60 }
  0xef   :  { %v3928_v16 = vpop.eup %2951  ;;  %v965_v31 = vsel %vm5796_vm6, %v894_v12, 0.0  ;;  %v695_v6 = vadd.f32 %v3606_v3, %v694_v32  ;;  %v580_v21 = vand.u32 2147483647, %v3556_v19  ;;  %v582_v24 = vand.u32 2147483648, %v3556_v19  ;;  %vm3941_vm1 = vmor %vm576_vm14, %vm577_vm15 }
  0xf0   :  { %966 = vadd.xlane.f32.xlu1 %v965_v31  ;;  %v574_v25 = vmul.f32 %v3599_v60, %v573_v22  ;;  %v2785_v54 = vmul.f32 -1.442695, %v260_v13  ;;  %v812_v1 = vmul.f32 %v3615_v10, %v3569_v2  ;;  %vm816_vm0 = vweird.f32 %v3569_v2 }
  0xf1   :  { %v699_v27 = vsel %vm3922_vm13, %v3606_v3, %v695_v6  ;;  %vm3945_vm2 = vcmp.eq.f32.partialorder %v580_v21, 8.507059e+37  ;;  %v583_v19 = vor.u32 1.1754944e-38, %v582_v24  ;;  %vm817_vm3 = vweird.f32 %v3615_v10 }
  0xf2   :  { %v704_v33 = vsel %vm3909_vm12, %v703_v52, %v699_v27  ;;  %v575_v5 = vadd.f32 %v3599_v60, %v574_v25  ;;  %2957 = vpow2.f32 %v2785_v54  ;;  %v813_v23 = vsub.f32 1.0, %v812_v1  ;;  %vm3978_vm5 = vmor %vm816_vm0, %vm817_vm3 }
  0xf3   :  { %v2954_v35 = vpop.eup %2953  ;;  %v895_v3 = vmul.f32 %v3398_v37, %v704_v33  ;;  %v820_v43 = vand.u32 2147483647, %v3569_v2  ;;  %v822_v45 = vand.u32 2147483648, %v3569_v2  ;;  %v467_v49 = vmul.f32 %v3690_v44, %v3639_v28 }
  0xf4   :  { %v3958_v50 = vpop.eup %2955  ;;  %v3960_v48 = vadd.f32 1.0, %v2954_v35  ;;  %v579_v57 = vsel %vm3941_vm1, %v3599_v60, %v575_v5  ;;  %v814_v26 = vmul.f32 %v3615_v10, %v813_v23  ;;  %vm471_vm4 = vweird.f32 %v3639_v28 }
  0xf5   :  { %v3969_v18 = vmul.f32 %v3958_v50, %v3905_v47  ;;  %v968_v8 = vsel %vm5796_vm6, %v895_v3, 0.0  ;;  %v584_v61 = vsel %vm3945_vm2, %v583_v19, %v579_v57  ;;  %vm3982_vm7 = vcmp.eq.f32.partialorder %v820_v43, 8.507059e+37 }
  0xf6   :  { %969 = vadd.xlane.f32.xlu2 %v968_v8  ;;  %2959 = vrcp.f32 %v3960_v48  ;;  %v887_v14 = vmul.f32 %v3398_v37, %v584_v61  ;;  %v815_v62 = vadd.f32 %v3615_v10, %v814_v26  ;;  %v823_v17 = vor.u32 1.1754944e-38, %v822_v45 }
  0xf7   :  { %v468_v4 = vsub.f32 1.0, %v467_v49  ;;  %vm472_vm8 = vweird.f32 %v3690_v44  ;;  %v475_v2 = vand.u32 2147483647, %v3639_v28  ;;  %v477_v51 = vand.u32 2147483648, %v3639_v28 }
  0xf8   :  { %v2958_v11 = vpop.eup %2957  ;;  %v944_v9 = vsel %vm5796_vm6, %v887_v14, 0.0  ;;  %v819_v12 = vsel %vm3978_vm5, %v3615_v10, %v815_v62  ;;  %v707_v32 = vmul.f32 %v3700_v20, %v3651_v40  ;;  %vm711_vm9 = vweird.f32 %v3651_v40  ;;  %vm4011_vm11 = vmor %vm471_vm4, %vm472_vm8 }
  0xf9   :  { %945 = vadd.xlane.f32.xlu0 %v944_v9  ;;  %v3999_v52 = vadd.f32 1.0, %v2958_v11  ;;  %v824_v13 = vsel %vm3982_vm7, %v823_v17, %v819_v12  ;;  %v469_v38 = vmul.f32 %v3690_v44, %v468_v4  ;;  %vm4004_vm10 = vcmp.eq.f32.partialorder %v475_v2, 8.507059e+37 }
  0xfa   :  { %v903_v31 = vmul.f32 %v3398_v37, %v824_v13  ;;  %v478_v6 = vor.u32 1.1754944e-38, %v477_v51  ;;  %v708_v21 = vsub.f32 1.0, %v707_v32  ;;  %vm712_vm12 = vweird.f32 %v3700_v20 }
  0xfb   :  { %2961 = vrcp.f32 %v3999_v52  ;;  %v470_v24 = vadd.f32 %v3690_v44, %v469_v38  ;;  %v715_v25 = vand.u32 2147483647, %v3651_v40  ;;  %v717_v54 = vand.u32 2147483648, %v3651_v40  ;;  %vm4036_vm14 = vmor %vm711_vm9, %vm712_vm12 }
  0xfc   :  { %v4020_v1 = vpop.eup %2959  ;;  %v992_v28 = vsel %vm5796_vm6, %v903_v31, 0.0  ;;  %v709_v27 = vmul.f32 %v3700_v20, %v708_v21  ;;  %v587_v29 = vmul.f32 %v3694_v15, %v3644_v36  ;;  %vm591_vm13 = vweird.f32 %v3644_v36  ;;  %v4108_v31 = vld [vmem:[%s5788_s3] ss:$0 sm:$0xff] }
  0xfd   :  { %v4029_v56 = vmul.f32 %v4020_v1, %v3960_v48  ;;  %993 = vadd.xlane.f32.xlu1 %v992_v28  ;;  %v474_v19 = vsel %vm4011_vm11, %v3690_v44, %v470_v24  ;;  %vm4040_vm15 = vcmp.eq.f32.partialorder %v715_v25, 8.507059e+37  ;;  %v718_v23 = vor.u32 1.1754944e-38, %v717_v54 }
  0xfe   :  { %v479_v35 = vsel %vm4004_vm10, %v478_v6, %v474_v19  ;;  %v710_v3 = vadd.f32 %v3700_v20, %v709_v27  ;;  %v588_v43 = vsub.f32 1.0, %v587_v29  ;;  %vm592_vm0 = vweird.f32 %v3694_v15 }
  0xff   :  { %v880_v44 = vmul.f32 %v3398_v37, %v479_v35  ;;  %v595_v40 = vand.u32 2147483647, %v3644_v36  ;;  %v597_v45 = vand.u32 2147483648, %v3644_v36  ;;  %v827_v49 = vmul.f32 %v3803_v41, %v3754_v0  ;;  %vm4066_vm3 = vmor %vm591_vm13, %vm592_vm0 }
 0x100   :  { %v714_v57 = vsel %vm4036_vm14, %v3700_v20, %v710_v3  ;;  %v589_v26 = vmul.f32 %v3694_v15, %v588_v43  ;;  %vm831_vm1 = vweird.f32 %v3754_v0  ;;  %vm832_vm2 = vweird.f32 %v3803_v41 }
 0x101   :  { %v4059_v8 = vpop.eup %2961  ;;  %v923_v61 = vsel %vm5796_vm6, %v880_v44, 0.0  ;;  %v719_v53 = vsel %vm4040_vm15, %v718_v23, %v714_v57  ;;  %vm4070_vm4 = vcmp.eq.f32.partialorder %v595_v40, 8.507059e+37  ;;  %v598_v14 = vor.u32 1.1754944e-38, %v597_v45  ;;  %vm4097_vm8 = vmor %vm831_vm1, %vm832_vm2 }
 0x102   :  { %v4076_v62 = vmul.f32 %v4059_v8, %v3999_v52  ;;  %924 = vadd.xlane.f32.xlu2 %v923_v61  ;;  %v896_v17 = vmul.f32 %v3398_v37, %v719_v53  ;;  %v590_v4 = vadd.f32 %v3694_v15, %v589_v26  ;;  %v828_v2 = vsub.f32 1.0, %v827_v49 }
 0x103   :  { %v835_v36 = vand.u32 2147483647, %v3754_v0  ;;  %v837_v51 = vand.u32 2147483648, %v3754_v0  ;;  %v482_v11 = vmul.f32 %v3787_v63, %v3730_v46  ;;  %vm486_vm5 = vweird.f32 %v3730_v46 }
 0x104   :  { %v971_v9 = vsel %vm5796_vm6, %v896_v17, 0.0  ;;  %v594_v12 = vsel %vm4066_vm3, %v3694_v15, %v590_v4  ;;  %v829_v37 = vmul.f32 %v3803_v41, %v828_v2  ;;  %vm487_vm7 = vweird.f32 %v3787_v63 }
 0x105   :  { %972 = vadd.xlane.f32.xlu0 %v971_v9  ;;  %v599_v32 = vsel %vm4070_vm4, %v598_v14, %v594_v12  ;;  %vm4101_vm9 = vcmp.eq.f32.partialorder %v835_v36, 8.507059e+37  ;;  %v838_v15 = vor.u32 1.1754944e-38, %v837_v51  ;;  %v483_v22 = vsub.f32 1.0, %v482_v11  ;;  %vm4127_vm12 = vmor %vm486_vm5, %vm487_vm7 }
 0x106   :  { %v888_v10 = vmul.f32 %v4108_v31, %v599_v32  ;;  %v830_v6 = vadd.f32 %v3803_v41, %v829_v37  ;;  %v490_v0 = vand.u32 2147483647, %v3730_v46  ;;  %v492_v21 = vand.u32 2147483648, %v3730_v46 }
 0x107   :  { %v484_v24 = vmul.f32 %v3787_v63, %v483_v22  ;;  %v722_v25 = vmul.f32 %v3797_v39, %v3744_v58  ;;  %vm726_vm10 = vweird.f32 %v3744_v58  ;;  %vm727_vm11 = vweird.f32 %v3797_v39 }
 0x108   :  { %v947_v54 = vsel %vm5796_vm6, %v888_v10, 0.0  ;;  %v834_v28 = vsel %vm4097_vm8, %v3803_v41, %v830_v6  ;;  %vm4131_vm13 = vcmp.eq.f32.partialorder %v490_v0, 8.507059e+37  ;;  %v493_v19 = vor.u32 1.1754944e-38, %v492_v21  ;;  %vm4160_vm1 = vmor %vm726_vm10, %vm727_vm11 }
 0x109   :  { %948 = vadd.xlane.f32.xlu1 %v947_v54  ;;  %v839_v33 = vsel %vm4101_vm9, %v838_v15, %v834_v28  ;;  %v485_v5 = vadd.f32 %v3787_v63, %v484_v24  ;;  %v723_v41 = vsub.f32 1.0, %v722_v25  ;;  %v730_v23 = vand.u32 2147483647, %v3744_v58 }
 0x10a   :  { %v904_v46 = vmul.f32 %v4108_v31, %v839_v33  ;;  %v732_v35 = vand.u32 2147483648, %v3744_v58  ;;  %v602_v3 = vmul.f32 %v3891_v55, %v3839_v7  ;;  %vm606_vm14 = vweird.f32 %v3839_v7 }
 0x10b   :  { %v489_v43 = vsel %vm4127_vm12, %v3787_v63, %v485_v5  ;;  %v724_v44 = vmul.f32 %v3797_v39, %v723_v41  ;;  %vm4148_vm15 = vcmp.eq.f32.partialorder %v730_v23, 8.507059e+37  ;;  %vm607_vm0 = vweird.f32 %v3891_v55 }
 0x10c   :  { %v995_v45 = vsel %vm5796_vm6, %v904_v46, 0.0  ;;  %v494_v49 = vsel %vm4131_vm13, %v493_v19, %v489_v43  ;;  %v733_v63 = vor.u32 1.1754944e-38, %v732_v35  ;;  %v603_v26 = vsub.f32 1.0, %v602_v3  ;;  %vm4181_vm4 = vmor %vm606_vm14, %vm607_vm0 }
 0x10d   :  { %996 = vadd.xlane.f32.xlu2 %v995_v45  ;;  %v881_v61 = vmul.f32 %v4108_v31, %v494_v49  ;;  %v725_v53 = vadd.f32 %v3797_v39, %v724_v44  ;;  %v610_v60 = vand.u32 2147483647, %v3839_v7  ;;  %v612_v20 = vand.u32 2147483648, %v3839_v7 }
 0x10e   :  { %v604_v14 = vmul.f32 %v3891_v55, %v603_v26  ;;  %v842_v58 = vmul.f32 %v3928_v16, %v3874_v30  ;;  %vm846_vm2 = vweird.f32 %v3874_v30  ;;  %vm847_vm3 = vweird.f32 %v3928_v16 }
 0x10f   :  { %v926_v17 = vsel %vm5796_vm6, %v881_v61, 0.0  ;;  %v729_v4 = vsel %vm4160_vm1, %v3797_v39, %v725_v53  ;;  %vm4185_vm5 = vcmp.eq.f32.partialorder %v610_v60, 8.507059e+37  ;;  %v613_v51 = vor.u32 1.1754944e-38, %v612_v20  ;;  %vm4213_vm10 = vmor %vm846_vm2, %vm847_vm3 }
 0x110   :  { %927 = vadd.xlane.f32.xlu0 %v926_v17  ;;  %v734_v11 = vsel %vm4148_vm15, %v733_v63, %v729_v4  ;;  %v605_v9 = vadd.f32 %v3891_v55, %v604_v14  ;;  %v843_v39 = vsub.f32 1.0, %v842_v58  ;;  %v850_v12 = vand.u32 2147483647, %v3874_v30 }
 0x111   :  { %v897_v7 = vmul.f32 %v4108_v31, %v734_v11  ;;  %v852_v37 = vand.u32 2147483648, %v3874_v30  ;;  %v738_v32 = vsub.f32 1.0, %v3969_v18  ;;  %vm741_vm7 = vweird.f32 %v3905_v47 }
 0x112   :  { %v609_v13 = vsel %vm4181_vm4, %v3891_v55, %v605_v9  ;;  %v844_v38 = vmul.f32 %v3928_v16, %v843_v39  ;;  %vm4201_vm8 = vcmp.eq.f32.partialorder %v850_v12, 8.507059e+37  ;;  %vm742_vm9 = vweird.f32 %v3958_v50 }
 0x113   :  { %v974_v22 = vsel %vm5796_vm6, %v897_v7, 0.0  ;;  %v614_v10 = vsel %vm4185_vm5, %v613_v51, %v609_v13  ;;  %v853_v55 = vor.u32 1.1754944e-38, %v852_v37  ;;  %v739_v6 = vmul.f32 %v3958_v50, %v738_v32  ;;  %vm4220_vm11 = vmor %vm741_vm7, %vm742_vm9 }
 0x114   :  { %975 = vadd.xlane.f32.xlu1 %v974_v22  ;;  %v889_v0 = vmul.f32 %v4108_v31, %v614_v10  ;;  %v845_v21 = vadd.f32 %v3928_v16, %v844_v38  ;;  %v745_v25 = vand.u32 2147483647, %v3905_v47  ;;  %v747_v30 = vand.u32 2147483648, %v3905_v47 }
 0x115   :  { %v740_v54 = vadd.f32 %v3958_v50, %v739_v6  ;;  %v498_v28 = vsub.f32 1.0, %v3879_v42  ;;  %vm501_vm12 = vweird.f32 %v3822_v59  ;;  %vm502_vm13 = vweird.f32 %v3871_v34 }
 0x116   :  { %v950_v27 = vsel %vm5796_vm6, %v889_v0, 0.0  ;;  %v849_v29 = vsel %vm4213_vm10, %v3928_v16, %v845_v21  ;;  %vm746_vm14 = vcmp.eq.f32.partialorder %v745_v25, 8.507059e+37  ;;  %v748_v19 = vor.u32 1.1754944e-38, %v747_v30  ;;  %vm4242_vm15 = vmor %vm501_vm12, %vm502_vm13 }
 0x117   :  { %951 = vadd.xlane.f32.xlu2 %v950_v27  ;;  %v854_v47 = vsel %vm4201_vm8, %v853_v55, %v849_v29  ;;  %v744_v42 = vsel %vm4220_vm11, %v3958_v50, %v740_v54  ;;  %v499_v33 = vmul.f32 %v3871_v34, %v498_v28  ;;  %v505_v5 = vand.u32 2147483647, %v3822_v59 }
 0x118   :  { %v905_v41 = vmul.f32 %v4108_v31, %v854_v47  ;;  %v749_v23 = vsel %vm746_vm14, %v748_v19, %v744_v42  ;;  %v507_v16 = vand.u32 2147483648, %v3822_v59  ;;  %v618_v35 = vsub.f32 1.0, %v4029_v56 }
 0x119   :  { %v898_v3 = vmul.f32 %v4108_v31, %v749_v23  ;;  %v500_v43 = vadd.f32 %v3871_v34, %v499_v33  ;;  %vm506_vm0 = vcmp.eq.f32.partialorder %v505_v5, 8.507059e+37  ;;  %vm621_vm1 = vweird.f32 %v3960_v48 }
 0x11a   :  { %v998_v50 = vsel %vm5796_vm6, %v905_v41, 0.0  ;;  %v508_v44 = vor.u32 1.1754944e-38, %v507_v16  ;;  %v619_v40 = vmul.f32 %v4020_v1, %v618_v35  ;;  %vm622_vm2 = vweird.f32 %v4020_v1 }
 0x11b   :  { %999 = vadd.xlane.f32.xlu0 %v998_v50  ;;  %v977_v45 = vsel %vm5796_vm6, %v898_v3, 0.0  ;;  %v504_v59 = vsel %vm4242_vm15, %v3871_v34, %v500_v43  ;;  %vm4258_vm3 = vmor %vm621_vm1, %vm622_vm2  ;;  %v625_v49 = vand.u32 2147483647, %v3960_v48  ;;  %v627_v57 = vand.u32 2147483648, %v3960_v48  ;;  %v934_v58 = vpop.xlane.xlu2 %933 }
 0x11c   :  { %v509_v63 = vsel %vm506_vm0, %v508_v44, %v504_v59  ;;  %v620_v26 = vadd.f32 %v4020_v1, %v619_v40  ;;  %v858_v61 = vsub.f32 1.0, %v4076_v62  ;;  %vm861_vm4 = vweird.f32 %v3999_v52  ;;  %v910_v62 = vpop.xlane.xlu0 %909 }
 0x11d   :  { %v882_v53 = vmul.f32 %v4108_v31, %v509_v63  ;;  %vm626_vm5 = vcmp.eq.f32.partialorder %v625_v49, 8.507059e+37  ;;  %v628_v60 = vor.u32 1.1754944e-38, %v627_v57  ;;  %vm862_vm7 = vweird.f32 %v4059_v8 }
 0x11e   :  { %v624_v34 = vsel %vm4258_vm3, %v4020_v1, %v620_v26  ;;  %v859_v20 = vmul.f32 %v4059_v8, %v858_v61  ;;  %v865_v48 = vand.u32 2147483647, %v3999_v52  ;;  %v867_v14 = vand.u32 2147483648, %v3999_v52  ;;  %vm863_vm8 = vmor %vm861_vm4, %vm862_vm7 }
 0x11f   :  { %978 = vadd.xlane.f32.xlu2 %v977_v45  ;;  %v929_v17 = vsel %vm5796_vm6, %v882_v53, 0.0  ;;  %v629_v4 = vsel %vm626_vm5, %v628_v60, %v624_v34  ;;  %v2794_v51 = vmul.f32 -1.442695, %v934_v58  ;;  %v2786_v39 = vmul.f32 -1.442695, %v910_v62 }
 0x120   :  { %930 = vadd.xlane.f32.xlu1 %v929_v17  ;;  %v890_v2 = vmul.f32 %v4108_v31, %v629_v4  ;;  %v860_v36 = vadd.f32 %v4059_v8, %v859_v20  ;;  %vm866_vm9 = vcmp.eq.f32.partialorder %v865_v48, 8.507059e+37  ;;  %v868_v1 = vor.u32 1.1754944e-38, %v867_v14 }
 0x121   :  { %2963 = vpow2.f32 %v2794_v51  ;;  %v1644_v16 = vlaneseq }
 0x122   :  { %v953_v11 = vsel %vm5796_vm6, %v890_v2, 0.0  ;;  %v864_v9 = vsel %vm863_vm8, %v4059_v8, %v860_v36  ;;  %2965 = vpow2.f32 %v2786_v39 }
 0x123   :  { %954 = vadd.xlane.f32.xlu0 %v953_v11  ;;  %v869_v52 = vsel %vm866_vm9, %v868_v1, %v864_v9  ;;  %v4318_v63 = vand.u32 127, %v1644_v16 }
 0x124   :  { %v906_v12 = vmul.f32 %v4108_v31, %v869_v52  ;;  %v958_v7 = vpop.xlane.xlu1 %957 }
 0x125   :  { %v2802_v32 = vmul.f32 -1.442695, %v958_v7  ;;  %v982_v13 = vpop.xlane.xlu0 %981 }
 0x126   :  { %v1001_v37 = vsel %vm5796_vm6, %v906_v12, 0.0  ;;  %v2810_v15 = vmul.f32 -1.442695, %v982_v13 }
 0x127   :  { %v2964_v38 = vpop.eup %2963  ;;  %2967 = vpow2.f32 %v2802_v32 }
 0x128   :  { %1002 = vadd.xlane.f32.xlu1 %v1001_v37  ;;  %v2966_v22 = vpop.eup %2965  ;;  %v4282_v10 = vadd.f32 1.0, %v2964_v38  ;;  %2969 = vpow2.f32 %v2810_v15 }
 0x129   :  { %v4284_v55 = vadd.f32 1.0, %v2966_v22 }
 0x12a   :  { %2971 = vrcp.f32 %v4282_v10  ;;  %v1261_v44 = vand.u32 2147483647, %v4282_v10  ;;  %v1263_v56 = vand.u32 2147483648, %v4282_v10  ;;  %vm1257_vm10 = vweird.f32 %v4282_v10 }
 0x12b   :  { %v1141_v61 = vand.u32 2147483647, %v4284_v55  ;;  %v1143_v48 = vand.u32 2147483648, %v4284_v55  ;;  %vm1137_vm13 = vweird.f32 %v4284_v55 }
 0x12c   :  { %vm4326_vm11 = vcmp.eq.f32.partialorder %v1261_v44, 8.507059e+37  ;;  %v1264_v62 = vor.u32 1.1754944e-38, %v1263_v56 }
 0x12d   :  { %v2968_v6 = vpop.eup %2967  ;;  %vm4340_vm14 = vcmp.eq.f32.partialorder %v1141_v61, 8.507059e+37  ;;  %v1144_v52 = vor.u32 1.1754944e-38, %v1143_v48 }
 0x12e   :  { %v985_v8 = vpop.xlane.xlu1 %984  ;;  %v2970_v21 = vpop.eup %2969  ;;  %v4288_v24 = vadd.f32 1.0, %v2968_v6 }
 0x12f   :  { %v2811_v18 = vmul.f32 -1.442695, %v985_v8  ;;  %v4292_v54 = vadd.f32 1.0, %v2970_v21 }
 0x130   :  { %v4290_v30 = vpop.eup %2971  ;;  %v1381_v11 = vand.u32 2147483647, %v4288_v24  ;;  %vm1377_vm0 = vweird.f32 %v4288_v24  ;;  %v1383_v32 = vand.u32 2147483648, %v4288_v24 }
 0x131   :  { %v961_v31 = vpop.xlane.xlu2 %960  ;;  %2973 = vpow2.f32 %v2811_v18  ;;  %v1253_v42 = vmul.f32 %v4290_v30, %v4282_v10  ;;  %vm1258_vm12 = vweird.f32 %v4290_v30  ;;  %vm1497_vm3 = vweird.f32 %v4292_v54 }
 0x132   :  { %v2803_v0 = vmul.f32 -1.442695, %v961_v31  ;;  %2975 = vrcp.f32 %v4284_v55  ;;  %vm4353_vm1 = vmor %vm1257_vm10, %vm1258_vm12  ;;  %v1501_v10 = vand.u32 2147483647, %v4292_v54  ;;  %v1503_v8 = vand.u32 2147483648, %v4292_v54 }
 0x133   :  { %v1254_v35 = vsub.f32 1.0, %v1253_v42  ;;  %vm4377_vm5 = vcmp.eq.f32.partialorder %v1381_v11, 8.507059e+37 }
 0x134   :  { %2977 = vpow2.f32 %v2803_v0  ;;  %vm4393_vm7 = vcmp.eq.f32.partialorder %v1501_v10, 8.507059e+37 }
 0x135   :  { %2979 = vrcp.f32 %v4288_v24  ;;  %v1255_v26 = vmul.f32 %v4290_v30, %v1254_v35 }
 0x136   :  { %2981 = vrcp.f32 %v4292_v54 }
 0x137   :  { %v913_v25 = vpop.xlane.xlu0 %912  ;;  %v2974_v28 = vpop.eup %2973  ;;  %v1256_v36 = vadd.f32 %v4290_v30, %v1255_v26 }
 0x138   :  { %v2787_v27 = vmul.f32 -1.442695, %v913_v25  ;;  %v4295_v29 = vpop.eup %2975  ;;  %v4297_v19 = vadd.f32 1.0, %v2974_v28 }
 0x139   :  { %v1133_v33 = vmul.f32 %v4295_v29, %v4284_v55  ;;  %vm1138_vm15 = vweird.f32 %v4295_v29  ;;  %v1260_v15 = vsel %vm4353_vm1, %v4290_v30, %v1256_v36 }
 0x13a   :  { %v2978_v47 = vpop.eup %2977  ;;  %2983 = vpow2.f32 %v2787_v27  ;;  %vm4366_vm2 = vmor %vm1137_vm13, %vm1138_vm15  ;;  %v4390_v27 = vsel %vm4326_vm11, %v1264_v62, %v1260_v15  ;;  %vm1512_vm10 = vweird.f32 %v4297_v19 }
 0x13b   :  { %2985 = vrcp.f32 %v4297_v19  ;;  %v4305_v41 = vadd.f32 1.0, %v2978_v47  ;;  %v4307_v46 = vpop.eup %2979  ;;  %v1134_v43 = vsub.f32 1.0, %v1133_v33 }
 0x13c   :  { %v4310_v50 = vpop.eup %2981  ;;  %v1373_v40 = vmul.f32 %v4307_v46, %v4288_v24  ;;  %vm1378_vm4 = vweird.f32 %v4307_v46  ;;  %v1518_v24 = vand.u32 2147483648, %v4297_v19 }
 0x13d   :  { %v988_v5 = vpop.xlane.xlu2 %987  ;;  %2987 = vrcp.f32 %v4305_v41  ;;  %v1135_v53 = vmul.f32 %v4295_v29, %v1134_v43  ;;  %v1493_v60 = vmul.f32 %v4310_v50, %v4292_v54  ;;  %vm4409_vm8 = vmor %vm1377_vm0, %vm1378_vm4  ;;  %vm1498_vm9 = vweird.f32 %v4310_v50 }
 0x13e   :  { %v2812_v23 = vmul.f32 -1.442695, %v988_v5  ;;  %v1374_v14 = vsub.f32 1.0, %v1373_v40  ;;  %v1504_v5 = vor.u32 1.1754944e-38, %v1503_v8  ;;  %vm4444_vm13 = vmor %vm1497_vm3, %vm1498_vm9  ;;  %v1396_v48 = vand.u32 2147483647, %v4305_v41 }
 0x13f   :  { %v1136_v51 = vadd.f32 %v4295_v29, %v1135_v53  ;;  %v1494_v9 = vsub.f32 1.0, %v1493_v60  ;;  %v1519_v54 = vor.u32 1.1754944e-38, %v1518_v24  ;;  %v1398_v36 = vand.u32 2147483648, %v4305_v41 }
 0x140   :  { %v916_v3 = vpop.xlane.xlu1 %915  ;;  %2989 = vpow2.f32 %v2812_v23  ;;  %v2984_v59 = vpop.eup %2983  ;;  %v1375_v39 = vmul.f32 %v4307_v46, %v1374_v14  ;;  %v1516_v23 = vand.u32 2147483647, %v4297_v19  ;;  %vm1392_vm0 = vweird.f32 %v4305_v41 }
 0x141   :  { %v2788_v45 = vmul.f32 -1.442695, %v916_v3  ;;  %v4316_v57 = vpop.eup %2985  ;;  %v4335_v4 = vadd.f32 1.0, %v2984_v59  ;;  %v1140_v31 = vsel %vm4366_vm2, %v4295_v29, %v1136_v51  ;;  %v1495_v55 = vmul.f32 %v4310_v50, %v1494_v9 }
 0x142   :  { %v1508_v17 = vmul.f32 %v4316_v57, %v4297_v19  ;;  %v1376_v21 = vadd.f32 %v4307_v46, %v1375_v39  ;;  %v1384_v29 = vor.u32 1.1754944e-38, %v1383_v32  ;;  %v4403_v3 = vsel %vm4340_vm14, %v1144_v52, %v1140_v31 }
 0x143   :  { %v937_v49 = vpop.xlane.xlu0 %936  ;;  %2991 = vpow2.f32 %v2788_v45  ;;  %v4331_v58 = vpop.eup %2987  ;;  %v1496_v59 = vadd.f32 %v4310_v50, %v1495_v55  ;;  %vm1513_vm11 = vweird.f32 %v4316_v57  ;;  %vm4430_vm12 = vcmp.eq.f32.partialorder %v1516_v23, 8.507059e+37 }
 0x144   :  { %v2795_v34 = vmul.f32 -1.442695, %v937_v49  ;;  %v1509_v13 = vsub.f32 1.0, %v1508_v17  ;;  %v1388_v38 = vmul.f32 %v4331_v58, %v4305_v41  ;;  %v1380_v45 = vsel %vm4409_vm8, %v4307_v46, %v1376_v21  ;;  %vm4456_vm14 = vmor %vm1512_vm10, %vm1513_vm11 }
 0x145   :  { %v1500_v17 = vsel %vm4444_vm13, %v4310_v50, %v1496_v59  ;;  %vm1393_vm15 = vweird.f32 %v4331_v58  ;;  %vm4479_vm1 = vcmp.eq.f32.partialorder %v1396_v48, 8.507059e+37  ;;  %v1399_v15 = vor.u32 1.1754944e-38, %v1398_v36 }
 0x146   :  { %2993 = vpow2.f32 %v2795_v34  ;;  %v2990_v2 = vpop.eup %2989  ;;  %v1510_v47 = vmul.f32 %v4316_v57, %v1509_v13  ;;  %v1389_v42 = vsub.f32 1.0, %v1388_v38  ;;  %v4438_v34 = vsel %vm4377_vm5, %v1384_v29, %v1380_v45  ;;  %vm4491_vm2 = vmor %vm1392_vm0, %vm1393_vm15 }
 0x147   :  { %v4349_v12 = vadd.f32 1.0, %v2990_v2  ;;  %2995 = vrcp.f32 %v4335_v4  ;;  %5935 = vst [vmem:[#allocation2_spill] sm:$0xff] %v4438_v34  ;;  %v1662_v50 = vperm.slane %v4438_v34, %v4318_v63  ;;  %v1156_v22 = vand.u32 2147483647, %v4335_v4 }
 0x148   :  { %v1511_v49 = vadd.f32 %v4316_v57, %v1510_v47  ;;  %v1390_v26 = vmul.f32 %v4331_v58, %v1389_v42  ;;  %v1158_v10 = vand.u32 2147483648, %v4335_v4  ;;  %vm1152_vm3 = vweird.f32 %v4335_v4 }
 0x149   :  { %v2992_v7 = vpop.eup %2991  ;;  %2997 = vrcp.f32 %v4349_v12  ;;  %v1533_v6 = vand.u32 2147483648, %v4349_v12  ;;  %v1531_v42 = vand.u32 2147483647, %v4349_v12  ;;  %vm4509_vm5 = vcmp.eq.f32.partialorder %v1156_v22, 8.507059e+37 }
 0x14a   :  { %v4384_v25 = vadd.f32 1.0, %v2992_v7  ;;  %v1515_v51 = vsel %vm4456_vm14, %v4316_v57, %v1511_v49  ;;  %v1391_v11 = vadd.f32 %v4331_v58, %v1390_v26  ;;  %v4477_v7 = vsel %vm4393_vm7, %v1504_v5, %v1500_v17 }
 0x14b   :  { %v943_v0 = vpop.xlane.xlu2 %942  ;;  %5940 = vst [vmem:[#allocation3_spill] sm:$0xff] %v4477_v7  ;;  %v4487_v41 = vsel %vm4430_vm12, %v1519_v54, %v1515_v51  ;;  %v1159_v23 = vor.u32 1.1754944e-38, %v1158_v10  ;;  %vm1527_vm7 = vweird.f32 %v4349_v12  ;;  %v1534_v45 = vor.u32 1.1754944e-38, %v1533_v6 }
 0x14c   :  { %v2994_v18 = vpop.eup %2993  ;;  %2999 = vrcp.f32 %v4384_v25  ;;  %v2797_v16 = vmul.f32 -1.442695, %v943_v0  ;;  %5943 = vst [vmem:[#allocation4_spill] sm:$0xff] %v4487_v41  ;;  %vm4527_vm8 = vcmp.eq.f32.partialorder %v1531_v42, 8.507059e+37  ;;  %vm1167_vm9 = vweird.f32 %v4384_v25 }
 0x14d   :  { %v4386_v30 = vadd.f32 1.0, %v2994_v18  ;;  %v4399_v35 = vpop.eup %2995  ;;  %v1395_v18 = vsel %vm4491_vm2, %v4331_v58, %v1391_v11 }
 0x14e   :  { %v940_v28 = vpop.xlane.xlu1 %939  ;;  %v1148_v60 = vmul.f32 %v4399_v35, %v4335_v4  ;;  %vm1153_vm4 = vweird.f32 %v4399_v35  ;;  %v4519_v43 = vsel %vm4479_vm1, %v1399_v15, %v1395_v18 }
 0x14f   :  { %3001 = vrcp.f32 %v4386_v30  ;;  %v2796_v44 = vmul.f32 -1.442695, %v940_v28  ;;  %v4426_v61 = vpop.eup %2997  ;;  %5948 = vst [vmem:[#allocation5_spill] sm:$0xff] %v4519_v43  ;;  %v1663_v48 = vperm.slane %v4519_v43, %v4318_v63  ;;  %v1276_v17 = vand.u32 2147483647, %v4386_v30  ;;  %vm4543_vm10 = vmor %vm1152_vm3, %vm1153_vm4 }
 0x150   :  { %3003 = vpow2.f32 %v2797_v16  ;;  %v1523_v19 = vmul.f32 %v4426_v61, %v4349_v12  ;;  %v1149_v9 = vsub.f32 1.0, %v1148_v60  ;;  %v1171_v60 = vand.u32 2147483647, %v4384_v25 }
 0x151   :  { %v964_v56 = vpop.xlane.xlu0 %963  ;;  %3005 = vpow2.f32 %v2796_v44  ;;  %vm1528_vm11 = vweird.f32 %v4426_v61  ;;  %vm1272_vm0 = vweird.f32 %v4386_v30  ;;  %vm4592_vm2 = vcmp.eq.f32.partialorder %v1276_v17, 8.507059e+37 }
 0x152   :  { %v2804_v14 = vmul.f32 -1.442695, %v964_v56  ;;  %v4449_v62 = vpop.eup %2999  ;;  %v1524_v31 = vsub.f32 1.0, %v1523_v19  ;;  %v1150_v0 = vmul.f32 %v4399_v35, %v1149_v9  ;;  %vm4566_vm14 = vmor %vm1527_vm7, %vm1528_vm11  ;;  %vm4570_vm15 = vcmp.eq.f32.partialorder %v1171_v60, 8.507059e+37 }
 0x153   :  { %v1163_v52 = vmul.f32 %v4449_v62, %v4384_v25  ;;  %vm1168_vm12 = vweird.f32 %v4449_v62 }
 0x154   :  { %3007 = vpow2.f32 %v2804_v14  ;;  %v1525_v44 = vmul.f32 %v4426_v61, %v1524_v31  ;;  %v1151_v59 = vadd.f32 %v4399_v35, %v1150_v0  ;;  %v1173_v14 = vand.u32 2147483648, %v4384_v25  ;;  %vm4588_vm1 = vmor %vm1167_vm9, %vm1168_vm12 }
 0x155   :  { %v4462_v1 = vpop.eup %3001  ;;  %v1164_v21 = vsub.f32 1.0, %v1163_v52  ;;  %v1278_v52 = vand.u32 2147483648, %v4386_v30 }
 0x156   :  { %v1268_v37 = vmul.f32 %v4462_v1, %v4386_v30  ;;  %v3004_v13 = vpop.eup %3003  ;;  %v1526_v54 = vadd.f32 %v4426_v61, %v1525_v44  ;;  %v1155_v9 = vsel %vm4543_vm10, %v4399_v35, %v1151_v59  ;;  %vm1273_vm13 = vweird.f32 %v4462_v1 }
 0x157   :  { %v3006_v8 = vpop.eup %3005  ;;  %v4502_v28 = vadd.f32 1.0, %v3004_v13  ;;  %v1165_v24 = vmul.f32 %v4449_v62, %v1164_v21  ;;  %v1174_v13 = vor.u32 1.1754944e-38, %v1173_v14  ;;  %v4579_v22 = vsel %vm4509_vm5, %v1159_v23, %v1155_v9  ;;  %vm4603_vm3 = vmor %vm1272_vm0, %vm1273_vm13 }
 0x158   :  { %v919_v39 = vpop.xlane.xlu1 %918  ;;  %v4504_v29 = vadd.f32 1.0, %v3006_v8  ;;  %v1269_v33 = vsub.f32 1.0, %v1268_v37  ;;  %v1530_v12 = vsel %vm4566_vm14, %v4426_v61, %v1526_v54  ;;  %v1279_v25 = vor.u32 1.1754944e-38, %v1278_v52 }
 0x159   :  { %v2789_v32 = vmul.f32 -1.442695, %v919_v39  ;;  %v1166_v4 = vadd.f32 %v4449_v62, %v1165_v24  ;;  %v1308_v31 = vand.u32 2147483648, %v4502_v28  ;;  %v4621_v42 = vsel %vm4527_vm8, %v1534_v45, %v1530_v12 }
 0x15a   :  { %v3008_v47 = vpop.eup %3007  ;;  %v1270_v20 = vmul.f32 %v4462_v1, %v1269_v33  ;;  %5963 = vst [vmem:[#allocation6_spill] sm:$0xff] %v4621_v42  ;;  %v1293_v58 = vand.u32 2147483648, %v4504_v29  ;;  %vm1287_vm4 = vweird.f32 %v4504_v29  ;;  %v1291_v45 = vand.u32 2147483647, %v4504_v29 }
 0x15b   :  { %3009 = vpow2.f32 %v2789_v32  ;;  %v922_v55 = vpop.xlane.xlu2 %921  ;;  %v4525_v56 = vadd.f32 1.0, %v3008_v47  ;;  %v1170_v18 = vsel %vm4588_vm1, %v4449_v62, %v1166_v4  ;;  %v4638_v60 = vor.u32 1.1754944e-38, %v1308_v31 }
 0x15c   :  { %v2790_v5 = vmul.f32 -1.442695, %v922_v55  ;;  %3011 = vrcp.f32 %v4504_v29  ;;  %v1271_v39 = vadd.f32 %v4462_v1, %v1270_v20  ;;  %v4630_v59 = vsel %vm4570_vm15, %v1174_v13, %v1170_v18 }
 0x15d   :  { %3013 = vrcp.f32 %v4502_v28  ;;  %v1411_v20 = vand.u32 2147483647, %v4525_v56  ;;  %v1294_v9 = vor.u32 1.1754944e-38, %v1293_v58  ;;  %v1413_v4 = vand.u32 2147483648, %v4525_v56 }
 0x15e   :  { %v991_v49 = vpop.xlane.xlu0 %990  ;;  %3015 = vpow2.f32 %v2790_v5  ;;  %v1275_v55 = vsel %vm4603_vm3, %v4462_v1, %v1271_v39  ;;  %vm4652_vm5 = vcmp.eq.f32.partialorder %v1291_v45, 8.507059e+37  ;;  %vm1407_vm7 = vweird.f32 %v4525_v56 }
 0x15f   :  { %3017 = vrcp.f32 %v4525_v56  ;;  %v2813_v51 = vmul.f32 -1.442695, %v991_v49  ;;  %v4634_v24 = vsel %vm4592_vm2, %v1279_v25, %v1275_v55  ;;  %vm5811_vm8 = vcmask 1041409  }
 0x160   :  { %vm4662_vm11 = vcmp.eq.f32.partialorder %v1411_v20, 8.507059e+37  ;;  %v1414_v61 = vor.u32 1.1754944e-38, %v1413_v4  ;;  %vm1680_vm0 = vcmask 1042434  }
 0x161   :  { %v3010_v26 = vpop.eup %3009 }
 0x162   :  { %v4549_v36 = vadd.f32 1.0, %v3010_v26  ;;  %v4551_v19 = vpop.eup %3011 }
 0x163   :  { %v967_v11 = vpop.xlane.xlu1 %966  ;;  %v4562_v37 = vpop.eup %3013  ;;  %v1283_v38 = vmul.f32 %v4551_v19, %v4504_v29  ;;  %vm1288_vm9 = vweird.f32 %v4551_v19  ;;  %v4690_v29 = vsel %vm5811_vm8, %v1663_v48, %v1662_v50 }
 0x164   :  { %3019 = vrcp.f32 %v4549_v36  ;;  %v2805_v57 = vmul.f32 -1.442695, %v967_v11  ;;  %v3016_v15 = vpop.eup %3015  ;;  %v1298_v0 = vmul.f32 %v4562_v37, %v4502_v28  ;;  %v1188_v32 = vand.u32 2147483648, %v4549_v36  ;;  %vm4674_vm12 = vmor %vm1287_vm4, %vm1288_vm9 }
 0x165   :  { %3021 = vpow2.f32 %v2813_v51  ;;  %v4596_v8 = vpop.eup %3017  ;;  %v4608_v6 = vadd.f32 1.0, %v3016_v15  ;;  %v1284_v33 = vsub.f32 1.0, %v1283_v38  ;;  %vm1182_vm13 = vweird.f32 %v4549_v36 }
 0x166   :  { %v1403_v62 = vmul.f32 %v4596_v8, %v4525_v56  ;;  %3023 = vpow2.f32 %v2805_v57  ;;  %v1299_v46 = vsub.f32 1.0, %v1298_v0  ;;  %vm1408_vm10 = vweird.f32 %v4596_v8 }
 0x167   :  { %3025 = vrcp.f32 %v4608_v6  ;;  %v1285_v14 = vmul.f32 %v4551_v19, %v1284_v33  ;;  %v1186_v0 = vand.u32 2147483647, %v4549_v36  ;;  %vm4699_vm14 = vmor %vm1407_vm7, %vm1408_vm10  ;;  %v1203_v58 = vand.u32 2147483648, %v4608_v6 }
 0x168   :  { %v1404_v23 = vsub.f32 1.0, %v1403_v62  ;;  %v1300_v13 = vmul.f32 %v4562_v37, %v1299_v46  ;;  %v4680_v62 = vor.u32 1.1754944e-38, %v1188_v32  ;;  %v1201_v46 = vand.u32 2147483647, %v4608_v6 }
 0x169   :  { %v970_v21 = vpop.xlane.xlu2 %969  ;;  %v1286_v15 = vadd.f32 %v4551_v19, %v1285_v14  ;;  %vm4731_vm1 = vcmp.eq.f32.partialorder %v1186_v0, 8.507059e+37  ;;  %vm1197_vm4 = vweird.f32 %v4608_v6 }
 0x16a   :  { %v4624_v5 = vpop.eup %3019  ;;  %v2806_v44 = vmul.f32 -1.442695, %v970_v21  ;;  %v1405_v17 = vmul.f32 %v4596_v8, %v1404_v23  ;;  %v4693_v21 = vadd.f32 %v4562_v37, %v1300_v13 }
 0x16b   :  { %v3022_v26 = vpop.eup %3021  ;;  %v1178_v2 = vmul.f32 %v4624_v5, %v4549_v36  ;;  %v1290_v50 = vsel %vm4674_vm12, %v4551_v19, %v1286_v15  ;;  %vm1183_vm15 = vweird.f32 %v4624_v5 }
 0x16c   :  { %v946_v49 = vpop.xlane.xlu0 %945  ;;  %3027 = vpow2.f32 %v2806_v44  ;;  %v4645_v54 = vadd.f32 1.0, %v3022_v26  ;;  %v3024_v51 = vpop.eup %3023  ;;  %v1406_v12 = vadd.f32 %v4596_v8, %v1405_v17  ;;  %vm4760_vm3 = vmor %vm1182_vm13, %vm1183_vm15 }
 0x16d   :  { %v2798_v52 = vmul.f32 -1.442695, %v946_v49  ;;  %v4650_v39 = vpop.eup %3025  ;;  %v1179_v10 = vsub.f32 1.0, %v1178_v2  ;;  %v4668_v30 = vadd.f32 1.0, %v3024_v51  ;;  %v4725_v2 = vsel %vm4652_vm5, %v1294_v9, %v1290_v50 }
 0x16e   :  { %3029 = vrcp.f32 %v4645_v54  ;;  %v1193_v25 = vmul.f32 %v4650_v39, %v4608_v6  ;;  %v1410_v56 = vsel %vm4699_vm14, %v4596_v8, %v1406_v12  ;;  %v1548_v20 = vand.u32 2147483648, %v4645_v54 }
 0x16f   :  { %3031 = vpow2.f32 %v2798_v52  ;;  %v1180_v48 = vmul.f32 %v4624_v5, %v1179_v10  ;;  %v4729_v51 = vsel %vm4662_vm11, %v1414_v61, %v1410_v56  ;;  %v4735_v52 = vor.u32 1.1754944e-38, %v1203_v58 }
 0x170   :  { %v994_v35 = vpop.xlane.xlu1 %993  ;;  %3033 = vrcp.f32 %v4668_v30  ;;  %v1194_v26 = vsub.f32 1.0, %v1193_v25  ;;  %5972 = vst [vmem:[#allocation7_spill] sm:$0xff] %v4729_v51  ;;  %v1428_v9 = vand.u32 2147483648, %v4668_v30  ;;  %v4745_v10 = vor.u32 1.1754944e-38, %v1548_v20 }
 0x171   :  { %v2814_v31 = vmul.f32 -1.442695, %v994_v35  ;;  %v1181_v13 = vadd.f32 %v4624_v5, %v1180_v48  ;;  %vm1198_vm2 = vweird.f32 %v4650_v39  ;;  %v1426_v25 = vand.u32 2147483647, %v4668_v30 }
 0x172   :  { %v3028_v18 = vpop.eup %3027  ;;  %v1195_v12 = vmul.f32 %v4650_v39, %v1194_v26  ;;  %v1664_v55 = vperm.slane %v4729_v51, %v4318_v63  ;;  %vm1422_vm5 = vweird.f32 %v4668_v30  ;;  %vm4841_vm14 = vmor %vm1197_vm4, %vm1198_vm2  ;;  %vm4878_vm2 = vcmp.eq.f32.partialorder %v1201_v46, 8.507059e+37 }
 0x173   :  { %v4704_v23 = vadd.f32 1.0, %v3028_v18  ;;  %3035 = vpow2.f32 %v2814_v31  ;;  %v1185_v26 = vsel %vm4760_vm3, %v4624_v5, %v1181_v13  ;;  %vm4785_vm7 = vcmp.eq.f32.partialorder %v1426_v25, 8.507059e+37 }
 0x174   :  { %v4706_v45 = vpop.eup %3029  ;;  %v4777_v20 = vadd.f32 %v4650_v39, %v1195_v12  ;;  %v4794_v12 = vsel %vm1680_vm0, %v1664_v55, %v4690_v29  ;;  %v4804_v25 = vsel %vm4731_vm1, %v4680_v62, %v1185_v26  ;;  %vm5804_vm1 = vcmask 1043459  }
 0x175   :  { %v925_v44 = vpop.xlane.xlu2 %924  ;;  %3037 = vrcp.f32 %v4704_v23  ;;  %v1538_v14 = vmul.f32 %v4706_v45, %v4645_v54  ;;  %v3032_v17 = vpop.eup %3031  ;;  %vm1437_vm9 = vweird.f32 %v4704_v23  ;;  %5979 = vst [vmem:[#allocation8_spill] sm:$0xff] %v4804_v25  ;;  %vm5799_vm4 = vcmask 1044484  }
 0x176   :  { %v2791_v49 = vmul.f32 -1.442695, %v925_v44  ;;  %v4737_v35 = vpop.eup %3033  ;;  %v4742_v57 = vadd.f32 1.0, %v3032_v17  ;;  %v1443_v44 = vand.u32 2147483648, %v4704_v23  ;;  %v6033_v34 = vand.u32 2147483647, %v4645_v54 }
 0x177   :  { %v1418_v18 = vmul.f32 %v4737_v35, %v4668_v30  ;;  %v1539_v61 = vsub.f32 1.0, %v1538_v14  ;;  %vm1423_vm10 = vweird.f32 %v4737_v35 }
 0x178   :  { %3039 = vpow2.f32 %v2791_v49  ;;  %v973_v19 = vpop.xlane.xlu0 %972  ;;  %v4769_v49 = vor.u32 1.1754944e-38, %v1428_v9  ;;  %v4790_v5 = vor.u32 1.1754944e-38, %v1443_v44  ;;  %v1323_v55 = vand.u32 2147483648, %v4742_v57  ;;  %vm4830_vm13 = vmor %vm1422_vm5, %vm1423_vm10 }
 0x179   :  { %v2807_v32 = vmul.f32 -1.442695, %v973_v19  ;;  %v3036_v38 = vpop.eup %3035  ;;  %v1419_v58 = vsub.f32 1.0, %v1418_v18  ;;  %v1441_v19 = vand.u32 2147483647, %v4704_v23  ;;  %v1540_v17 = vmul.f32 %v4706_v45, %v1539_v61 }
 0x17a   :  { %v4765_v50 = vadd.f32 1.0, %v3036_v38  ;;  %v4845_v30 = vor.u32 1.1754944e-38, %v1323_v55  ;;  %vm1317_vm6 = vweird.f32 %v4742_v57  ;;  %v6010_v41 = vand.u32 2147483647, %v4742_v57 }
 0x17b   :  { %3041 = vpow2.f32 %v2807_v32  ;;  %v4754_v0 = vpop.eup %3037  ;;  %v1420_v14 = vmul.f32 %v4737_v35, %v1419_v58  ;;  %vm4807_vm11 = vcmp.eq.f32.partialorder %v1441_v19, 8.507059e+37 }
 0x17c   :  { %3043 = vrcp.f32 %v4742_v57  ;;  %v949_v31 = vpop.xlane.xlu1 %948  ;;  %v1433_v36 = vmul.f32 %v4754_v0, %v4704_v23  ;;  %vm1438_vm12 = vweird.f32 %v4754_v0  ;;  %v1563_v19 = vand.u32 2147483648, %v4765_v50 }
 0x17d   :  { %v2799_v56 = vmul.f32 -1.442695, %v949_v31  ;;  %3045 = vrcp.f32 %v4765_v50  ;;  %v1421_v58 = vadd.f32 %v4737_v35, %v1420_v14  ;;  %vm4859_vm15 = vmor %vm1437_vm9, %vm1438_vm12 }
 0x17e   :  { %v3040_v48 = vpop.eup %3039  ;;  %v1434_v32 = vsub.f32 1.0, %v1433_v36  ;;  %v4817_v36 = vadd.f32 %v4706_v45, %v1540_v17  ;;  %v1200_v17 = vsel %vm4841_vm14, %v4650_v39, %v4777_v20 }
 0x17f   :  { %v4783_v9 = vadd.f32 1.0, %v3040_v48  ;;  %3047 = vpow2.f32 %v2799_v56  ;;  %v1425_v11 = vsel %vm4830_vm13, %v4737_v35, %v1421_v58  ;;  %v4868_v35 = vor.u32 1.1754944e-38, %v1563_v19 }
 0x180   :  { %v997_v38 = vpop.xlane.xlu2 %996  ;;  %v1435_v33 = vmul.f32 %v4754_v0, %v1434_v32 }
 0x181   :  { %v3042_v18 = vpop.eup %3041  ;;  %v2815_v13 = vmul.f32 -1.442695, %v997_v38  ;;  %3049 = vrcp.f32 %v4783_v9 }
 0x182   :  { %v4796_v61 = vpop.eup %3043  ;;  %v4814_v56 = vadd.f32 1.0, %v3042_v18  ;;  %v1436_v14 = vadd.f32 %v4754_v0, %v1435_v33  ;;  %v4888_v33 = vsel %vm4785_vm7, %v4769_v49, %v1425_v11  ;;  %vm1212_vm7 = vweird.f32 %v4783_v9 }
 0x183   :  { %v1313_v29 = vmul.f32 %v4796_v61, %v4742_v57  ;;  %v928_v48 = vpop.xlane.xlu0 %927  ;;  %3051 = vpow2.f32 %v2815_v13  ;;  %v4820_v26 = vpop.eup %3045  ;;  %v1218_v13 = vand.u32 2147483648, %v4783_v9  ;;  %5990 = vst [vmem:[#allocation9_spill] sm:$0xff] %v4888_v33 }
 0x184   :  { %v2792_v4 = vmul.f32 -1.442695, %v928_v48  ;;  %3053 = vrcp.f32 %v4814_v56  ;;  %v1553_v18 = vmul.f32 %v4820_v26, %v4765_v50  ;;  %v1458_v48 = vand.u32 2147483648, %v4814_v56 }
 0x185   :  { %v3048_v32 = vpop.eup %3047  ;;  %v1314_v38 = vsub.f32 1.0, %v1313_v29  ;;  %v1440_v23 = vsel %vm4859_vm15, %v4754_v0, %v1436_v14  ;;  %v4883_v20 = vor.u32 1.1754944e-38, %v1218_v13  ;;  %vm1452_vm3 = vweird.f32 %v4814_v56 }
 0x186   :  { %3055 = vpow2.f32 %v2792_v4  ;;  %v4848_v16 = vadd.f32 1.0, %v3048_v32  ;;  %v1554_v55 = vsub.f32 1.0, %v1553_v18  ;;  %v1459_v13 = vor.u32 1.1754944e-38, %v1458_v48 }
 0x187   :  { %v976_v29 = vpop.xlane.xlu1 %975  ;;  %v4853_v4 = vpop.eup %3049  ;;  %v1315_v39 = vmul.f32 %v4796_v61, %v1314_v38  ;;  %v4899_v31 = vsel %vm4807_vm11, %v4790_v5, %v1440_v23  ;;  %v1456_v49 = vand.u32 2147483647, %v4814_v56  ;;  %vm5797_vm11 = vcmask 1045509  }
 0x188   :  { %v2808_v32 = vmul.f32 -1.442695, %v976_v29  ;;  %v1208_v58 = vmul.f32 %v4853_v4, %v4783_v9  ;;  %3057 = vrcp.f32 %v4848_v16  ;;  %v1555_v0 = vmul.f32 %v4820_v26, %v1554_v55  ;;  %5991 = vst [vmem:[#allocation10_spill] sm:$0xff] %v4899_v31 }
 0x189   :  { %v3052_v18 = vpop.eup %3051  ;;  %v1338_v6 = vand.u32 2147483648, %v4848_v16  ;;  %v1665_v55 = vperm.slane %v4888_v33, %v4318_v63  ;;  %v4911_v5 = vadd.f32 %v4796_v61, %v1315_v39  ;;  %vm4929_vm9 = vcmp.eq.f32.partialorder %v1456_v49, 8.507059e+37 }
 0x18a   :  { %3059 = vpow2.f32 %v2808_v32  ;;  %v952_v19 = vpop.xlane.xlu2 %951  ;;  %v3054_v40 = vpop.eup %3053  ;;  %v4892_v46 = vadd.f32 1.0, %v3052_v18  ;;  %v1209_v11 = vsub.f32 1.0, %v1208_v58  ;;  %v4914_v44 = vadd.f32 %v4820_v26, %v1555_v0 }
 0x18b   :  { %v2800_v14 = vmul.f32 -1.442695, %v952_v19  ;;  %v1448_v38 = vmul.f32 %v3054_v40, %v4814_v56  ;;  %v4916_v58 = vor.u32 1.1754944e-38, %v1338_v6  ;;  %vm1453_vm5 = vweird.f32 %v3054_v40 }
 0x18c   :  { %v3056_v15 = vpop.eup %3055  ;;  %3061 = vrcp.f32 %v4892_v46  ;;  %v1578_v18 = vand.u32 2147483648, %v4892_v46  ;;  %v1666_v0 = vperm.slane %v4899_v31, %v4318_v63  ;;  %v1701_v62 = vsel %vm5804_vm1, %v1665_v55, %v4794_v12  ;;  %vm1454_vm10 = vmor %vm1452_vm3, %vm1453_vm5 }
 0x18d   :  { %v1449_v32 = vsub.f32 1.0, %v1448_v38  ;;  %v4906_v19 = vadd.f32 1.0, %v3056_v15  ;;  %3063 = vpow2.f32 %v2800_v14  ;;  %v1210_v15 = vmul.f32 %v4853_v4, %v1209_v11 }
 0x18e   :  { %v1000_v48 = vpop.xlane.xlu0 %999  ;;  %v4908_v8 = vpop.eup %3057  ;;  %v4927_v6 = vor.u32 1.1754944e-38, %v1578_v18  ;;  %vm1213_vm13 = vweird.f32 %v4853_v4  ;;  %vm1303_vm5 = vweird.f32 %v4562_v37 }
 0x18f   :  { %v2816_v23 = vmul.f32 -1.442695, %v1000_v48  ;;  %v1450_v53 = vmul.f32 %v3054_v40, %v1449_v32  ;;  %v1328_v38 = vmul.f32 %v4908_v8, %v4848_v16  ;;  %3065 = vrcp.f32 %v4906_v19  ;;  %vm4983_vm15 = vmor %vm1212_vm7, %vm1213_vm13 }
 0x190   :  { %v3060_v47 = vpop.eup %3059  ;;  %5992 = vst [vmem:[#allocation11_spill] sm:$0xff] %v4927_v6  ;;  %vm1227_vm3 = vweird.f32 %v4906_v19  ;;  %vm1688_vm7 = vcmask 1046534   ;;  %vm1318_vm13 = vweird.f32 %v4796_v61 }
 0x191   :  { %v4923_v39 = vadd.f32 1.0, %v3060_v47  ;;  %3067 = vpow2.f32 %v2816_v23  ;;  %v1451_v32 = vadd.f32 %v3054_v40, %v1450_v53  ;;  %v4944_v53 = vsel %vm4878_vm2, %v4735_v52, %v1200_v17 }
 0x192   :  { %v979_v14 = vpop.xlane.xlu2 %978  ;;  %v4935_v11 = vpop.eup %3061  ;;  %v1329_v18 = vsub.f32 1.0, %v1328_v38 }
 0x193   :  { %3069 = vrcp.f32 %v4923_v39  ;;  %v2809_v47 = vmul.f32 -1.442695, %v979_v14  ;;  %v931_v23 = vpop.xlane.xlu1 %930  ;;  %v3064_v49 = vpop.eup %3063  ;;  %v1568_v12 = vmul.f32 %v4935_v11, %v4892_v46  ;;  %v1455_v1 = vsel %vm1454_vm10, %v3054_v40, %v1451_v32 }
 0x194   :  { %v2793_v55 = vmul.f32 -1.442695, %v931_v23  ;;  %v4948_v31 = vadd.f32 1.0, %v3064_v49  ;;  %v4952_v56 = vsel %vm4929_vm9, %v1459_v13, %v1455_v1  ;;  %v1702_v14 = vsel %vm5799_vm4, %v1666_v0, %v1701_v62 }
 0x195   :  { %3071 = vpow2.f32 %v2809_v47  ;;  %5995 = vst [vmem:[#allocation12_spill] sm:$0xff] %v4952_v56  ;;  %v4955_v43 = vpop.eup %3065  ;;  %v1569_v52 = vsub.f32 1.0, %v1568_v12  ;;  %v1471_v29 = vand.u32 2147483647, %v4923_v39  ;;  %v1473_v38 = vand.u32 2147483648, %v4923_v39 }
 0x196   :  { %3073 = vpow2.f32 %v2793_v55  ;;  %v955_v17 = vpop.xlane.xlu0 %954  ;;  %v1223_v40 = vmul.f32 %v4955_v43, %v4906_v19  ;;  %v1667_v1 = vperm.slane %v4952_v56, %v4318_v63  ;;  %v4965_v62 = vmul.f32 %v4908_v8, %v1329_v18 }
 0x197   :  { %v3068_v23 = vpop.eup %3067  ;;  %3075 = vrcp.f32 %v4948_v31  ;;  %v2801_v32 = vmul.f32 -1.442695, %v955_v17  ;;  %v4968_v13 = vmul.f32 %v4935_v11, %v1569_v52  ;;  %vm1467_vm12 = vweird.f32 %v4923_v39 }
 0x198   :  { %v4970_v0 = vadd.f32 1.0, %v3068_v23  ;;  %v1224_v47 = vsub.f32 1.0, %v1223_v40  ;;  %v1211_v49 = vadd.f32 %v4853_v4, %v1210_v15  ;;  %vm4977_vm14 = vcmp.eq.f32.partialorder %v1471_v29, 8.507059e+37 }
 0x199   :  { %v3070_v48 = vpop.eup %3069  ;;  %3077 = vpow2.f32 %v2801_v32  ;;  %v1474_v55 = vor.u32 1.1754944e-38, %v1473_v38  ;;  %v1216_v17 = vand.u32 2147483647, %v4783_v9  ;;  %v4990_v32 = vsel %vm5797_vm11, %v1667_v1, %v1702_v14 }
 0x19a   :  { %5996 = vst [vmem:[#allocation13_spill] sm:$0xff] %v4970_v0  ;;  %v1463_v12 = vmul.f32 %v3070_v48, %v4923_v39  ;;  %3079 = vrcp.f32 %v4970_v0  ;;  %v1225_v23 = vmul.f32 %v4955_v43, %v1224_v47  ;;  %vm1468_vm2 = vweird.f32 %v3070_v48 }
 0x19b   :  { %v3072_v15 = vpop.eup %3071  ;;  %v1003_v40 = vpop.xlane.xlu1 %1002  ;;  %v1215_v29 = vsel %vm4983_vm15, %v4853_v4, %v1211_v49  ;;  %vm1217_vm9 = vcmp.eq.f32.partialorder %v1216_v17, 8.507059e+37  ;;  %vm1228_vm10 = vweird.f32 %v4955_v43  ;;  %v1231_v49 = vand.u32 2147483647, %v4906_v19 }
 0x19c   :  { %v3074_v38 = vpop.eup %3073  ;;  %v1464_v56 = vsub.f32 1.0, %v1463_v12  ;;  %v4995_v51 = vadd.f32 1.0, %v3072_v15  ;;  %v2817_v33 = vmul.f32 -1.442695, %v1003_v40  ;;  %v1226_v14 = vadd.f32 %v4955_v43, %v1225_v23  ;;  %vm5026_vm11 = vmor %vm1227_vm3, %vm1228_vm10 }
 0x19d   :  { %v4998_v9 = vpop.eup %3075  ;;  %v5001_v47 = vadd.f32 1.0, %v3074_v38  ;;  %vm1302_vm15 = vweird.f32 %v4502_v28  ;;  %v5015_v15 = vsel %vm1217_vm9, %v4883_v20, %v1215_v29  ;;  %vm1469_vm9 = vmor %vm1467_vm12, %vm1468_vm2  ;;  %vm5048_vm10 = vcmp.eq.f32.partialorder %v1231_v49, 8.507059e+37 }
 0x19e   :  { %v1465_v4 = vmul.f32 %v3070_v48, %v1464_v56  ;;  %v1343_v1 = vmul.f32 %v4998_v9, %v4948_v31  ;;  %3081 = vrcp.f32 %v4995_v51  ;;  %v1486_v52 = vand.u32 2147483647, %v4995_v51  ;;  %6001 = vst [vmem:[#allocation14_spill] sm:$0xff] %v5015_v15 }
 0x19f   :  { %v3078_v12 = vpop.eup %3077  ;;  %3083 = vrcp.f32 %v5001_v47  ;;  %v1488_v17 = vand.u32 2147483648, %v4995_v51  ;;  %vm5055_vm12 = vcmp.eq.f32.partialorder %v6010_v41, 8.507059e+37  ;;  %vm1690_vm2 = vcmask 1047559  }
 0x1a0   :  { %v5017_v56 = vpop.eup %3079  ;;  %v1344_v23 = vsub.f32 1.0, %v1343_v1  ;;  %v5020_v40 = vadd.f32 1.0, %v3078_v12  ;;  %3085 = vpow2.f32 %v2817_v33  ;;  %v1466_v38 = vadd.f32 %v3070_v48, %v1465_v4 }
 0x1a1   :  { %6002 = vst [vmem:[#allocation15_spill] sm:$0xff] %v5017_v56  ;;  %v1583_v20 = vmul.f32 %v5017_v56, %v4970_v0  ;;  %v5036_v29 = vor.u32 1.1754944e-38, %v1488_v17  ;;  %v1230_v33 = vsel %vm5026_vm11, %v4955_v43, %v1226_v14  ;;  %v6005_v4 = vand.u32 2147483647, %v4502_v28 }
 0x1a2   :  { %3087 = vrcp.f32 %v5020_v40  ;;  %v1470_v12 = vsel %vm1469_vm9, %v3070_v48, %v1466_v38  ;;  %v1233_v17 = vand.u32 2147483648, %v4906_v19  ;;  %v5060_v43 = vmul.f32 %v4998_v9, %v1344_v23  ;;  %v6050_v48 = vld [vmem:[#allocation13_spill] sm:$0xff] }
 0x1a3   :  { %vm5043_vm3 = vcmp.eq.f32.partialorder %v6005_v4, 8.507059e+37  ;;  %v1584_v14 = vsub.f32 1.0, %v1583_v20  ;;  %v5064_v4 = vsel %vm4977_vm14, %v1474_v55, %v1470_v12  ;;  %vm5066_vm11 = vcmp.eq.f32.partialorder %v1486_v52, 8.507059e+37 }
 0x1a4   :  { %6013 = vst [vmem:[#allocation16_spill] sm:$0xff] %v5064_v4  ;;  %v1246_v19 = vand.u32 2147483647, %v5001_v47  ;;  %v3082_v49 = vpop.eup %3081  ;;  %v1668_v41 = vperm.slane %v5064_v4, %v4318_v63  ;;  %v1234_v38 = vor.u32 1.1754944e-38, %v1233_v17  ;;  %v1248_v23 = vand.u32 2147483648, %v5001_v47 }
 0x1a5   :  { %v5075_v20 = vpop.eup %3083  ;;  %v5079_v18 = vmul.f32 %v5017_v56, %v1584_v14  ;;  %v1478_v55 = vmul.f32 %v3082_v49, %v4995_v51  ;;  %vm1483_vm9 = vweird.f32 %v3082_v49  ;;  %v1649_v52 = vperm.slane %v4804_v25, %v4318_v63  ;;  %v6054_v14 = vld [vmem:[#allocation11_spill] sm:$0xff] }
 0x1a6   :  { %v3086_v12 = vpop.eup %3085  ;;  %v1238_v17 = vmul.f32 %v5075_v20, %v5001_v47  ;;  %v1704_v4 = vsel %vm1688_vm7, %v1668_v41, %v4990_v32  ;;  %v5090_v7 = vsel %vm5048_vm10, %v1234_v38, %v1230_v33  ;;  %vm1243_vm14 = vweird.f32 %v5075_v20  ;;  %vm5107_vm10 = vmor %vm1302_vm15, %vm1303_vm5 }
 0x1a7   :  { %vm5093_vm1 = vcmp.eq.f32.partialorder %v1246_v19, 8.507059e+37  ;;  %v1479_v42 = vsub.f32 1.0, %v1478_v55  ;;  %v5097_v25 = vadd.f32 1.0, %v3086_v12  ;;  %vm1717_vm4 = vcmask 64512   ;;  %vm5127_vm15 = vmor %vm1317_vm6, %vm1318_vm13 }
 0x1a8   :  { %v1249_v6 = vor.u32 1.1754944e-38, %v1248_v23  ;;  %v1650_v0 = vperm.slane %v4944_v53, %v4318_v63  ;;  %v5101_v56 = vpop.eup %3087  ;;  %v1239_v33 = vsub.f32 1.0, %v1238_v17  ;;  %v1651_v39 = vperm.slane %v5015_v15, %v4318_v63 }
 0x1a9   :  { %v1652_v19 = vperm.slane %v5090_v7, %v4318_v63  ;;  %v6020_v41 = vperm.slane %v4403_v3, %v4318_v63  ;;  %v6021_v38 = vperm.slane %v4579_v22, %v4318_v63  ;;  %v1358_v55 = vmul.f32 %v5101_v56, %v5020_v40 }
 0x1aa   :  { %3089 = vrcp.f32 %v5097_v25  ;;  %v1480_v12 = vmul.f32 %v3082_v49, %v1479_v42  ;;  %v6024_v17 = vperm.slane %v4630_v59, %v4318_v63  ;;  %vm6028_vm6 = vcmask 1043459  }
 0x1ab   :  { %v1679_v23 = vsel %vm5811_vm8, %v6021_v38, %v6020_v41  ;;  %vm6025_vm8 = vweird.f32 %v4995_v51  ;;  %v1240_v38 = vmul.f32 %v5075_v20, %v1239_v33  ;;  %v1305_v42 = vsel %vm5107_vm10, %v4562_v37, %v4693_v21 }
 0x1ac   :  { %v1681_v41 = vsel %vm1680_vm0, %v6024_v17, %v1679_v23  ;;  %vm5141_vm5 = vmor %vm6025_vm8, %vm1483_vm9  ;;  %v1320_v23 = vsel %vm5127_vm15, %v4796_v61, %v4911_v5  ;;  %vm1542_vm13 = vweird.f32 %v4645_v54  ;;  %vm1558_vm8 = vweird.f32 %v4820_v26 }
 0x1ad   :  { %v1683_v15 = vsel %vm6028_vm6, %v1649_v52, %v1681_v41  ;;  %v1359_v51 = vsub.f32 1.0, %v1358_v55  ;;  %v1481_v17 = vadd.f32 %v3082_v49, %v1480_v12  ;;  %vm6029_vm9 = vcmask 1044484  }
 0x1ae   :  { %v1685_v33 = vsel %vm6029_vm9, %v1650_v0, %v1683_v15  ;;  %v5161_v52 = vsel %vm5043_vm3, %v4638_v60, %v1305_v42  ;;  %v1241_v37 = vadd.f32 %v5075_v20, %v1240_v38  ;;  %vm6030_vm10 = vcmask 1045509  }
 0x1af   :  { %v1687_v21 = vsel %vm6030_vm10, %v1651_v39, %v1685_v33  ;;  %v5168_v61 = vsel %vm5055_vm12, %v4845_v30, %v1320_v23  ;;  %v1331_v5 = vadd.f32 %v4908_v8, %v4965_v62  ;;  %vm1557_vm15 = vweird.f32 %v4765_v50 }
 0x1b0   :  { %v1485_v0 = vsel %vm5141_vm5, %v3082_v49, %v1481_v17  ;;  %vm6031_vm3 = vweird.f32 %v5001_v47  ;;  %v1689_v60 = vsel %vm1688_vm7, %v1652_v19, %v1687_v21  ;;  %vm1333_vm9 = vweird.f32 %v4908_v8  ;;  %v5193_v1 = vpop.eup %3089 }
 0x1b1   :  { %vm1244_vm6 = vmor %vm6031_vm3, %vm1243_vm14  ;;  %v1336_v30 = vand.u32 2147483647, %v4848_v16  ;;  %v5185_v62 = vsel %vm5066_vm11, %v5036_v29, %v1485_v0  ;;  %vm6032_vm12 = vweird.f32 %v4848_v16  ;;  %v1346_v47 = vadd.f32 %v4998_v9, %v5060_v43 }
 0x1b2   :  { %v1245_v15 = vsel %vm1244_vm6, %v5075_v20, %v1241_v37  ;;  %vm1334_vm5 = vmor %vm6032_vm12, %vm1333_vm9  ;;  %vm1347_vm14 = vweird.f32 %v4948_v31  ;;  %vm5197_vm10 = vcmp.eq.f32.partialorder %v6033_v34, 8.507059e+37  ;;  %v6036_v29 = vand.u32 2147483647, %v4765_v50 }
 0x1b3   :  { %vm1572_vm3 = vweird.f32 %v4892_v46  ;;  %v1669_v16 = vperm.slane %v5185_v62, %v4318_v63  ;;  %v5212_v43 = vsel %vm5093_vm1, %v1249_v6, %v1245_v15  ;;  %v1335_v20 = vsel %vm1334_vm5, %v4908_v8, %v1331_v5 }
 0x1b4   :  { %vm5203_vm11 = vcmp.eq.f32.partialorder %v6036_v29, 8.507059e+37  ;;  %vm1337_vm6 = vcmp.eq.f32.partialorder %v1336_v30, 8.507059e+37  ;;  %v1598_v32 = vmul.f32 %v5193_v1, %v5097_v25  ;;  %v1653_v39 = vperm.slane %v5212_v43, %v4318_v63 }
 0x1b5   :  { %v5220_v19 = vsel %vm1337_vm6, %v4916_v58, %v1335_v20  ;;  %vm1348_vm9 = vweird.f32 %v4998_v9  ;;  %v1705_v28 = vsel %vm1690_vm2, %v1669_v16, %v1704_v4  ;;  %v1351_v8 = vand.u32 2147483647, %v4948_v31 }
 0x1b6   :  { %vm5224_vm12 = vmor %vm1347_vm14, %vm1348_vm9  ;;  %v1353_v6 = vand.u32 2147483648, %v4948_v31  ;;  %v1360_v55 = vmul.f32 %v5101_v56, %v1359_v51  ;;  %v1599_v12 = vsub.f32 1.0, %v1598_v32  ;;  %v1724_v41 = vsel %vm1717_vm4, %v1705_v28, -inf }
 0x1b7   :  { %v1691_v58 = vsel %vm1690_vm2, %v1653_v39, %v1689_v60  ;;  %v1350_v57 = vsel %vm5224_vm12, %v4998_v9, %v1346_v47  ;;  %1725 = vmax.xlane.f32.xlu1 %v1724_v41  ;;  %vm1352_vm1 = vcmp.eq.f32.partialorder %v1351_v8, 8.507059e+37  ;;  %vm6041_vm5 = vweird.f32 %v4706_v45 }
 0x1b8   :  { %v1718_v4 = vsel %vm1717_vm4, %v1691_v58, -inf  ;;  %v1354_v38 = vor.u32 1.1754944e-38, %v1353_v6  ;;  %v1361_v42 = vadd.f32 %v5101_v56, %v1360_v55  ;;  %vm5242_vm14 = vmor %vm1542_vm13, %vm6041_vm5  ;;  %vm1362_vm6 = vweird.f32 %v5020_v40 }
 0x1b9   :  { %1719 = vmax.xlane.f32.xlu2 %v1718_v4  ;;  %vm1363_vm9 = vweird.f32 %v5101_v56  ;;  %v1366_v9 = vand.u32 2147483647, %v5020_v40  ;;  %v1368_v23 = vand.u32 2147483648, %v5020_v40  ;;  %v1656_v17 = vperm.slane %v4725_v2, %v4318_v63  ;;  %vm1559_vm13 = vmor %vm1557_vm15, %vm1558_vm8 }
 0x1ba   :  { %v5250_v51 = vsel %vm1352_vm1, %v1354_v38, %v1350_v57  ;;  %vm1364_vm12 = vmor %vm1362_vm6, %vm1363_vm9  ;;  %v1657_v54 = vperm.slane %v5161_v52, %v4318_v63  ;;  %v1658_v33 = vperm.slane %v5168_v61, %v4318_v63  ;;  %v1659_v21 = vperm.slane %v5220_v19, %v4318_v63  ;;  %v6055_v57 = vld [vmem:[#allocation6_spill] sm:$0xff]  ;;  %v6056_v38 = vld [vmem:[#allocation3_spill] sm:$0xff] }
 0x1bb   :  { %v1365_v37 = vsel %vm1364_vm12, %v5101_v56, %v1361_v42  ;;  %vm1367_vm5 = vcmp.eq.f32.partialorder %v1366_v9, 8.507059e+37  ;;  %v1369_v40 = vor.u32 1.1754944e-38, %v1368_v23  ;;  %v1660_v5 = vperm.slane %v5250_v51, %v4318_v63 }
 0x1bc   :  { %v6044_v0 = vperm.slane %v4390_v27, %v4318_v63  ;;  %v6045_v60 = vperm.slane %v4634_v24, %v4318_v63  ;;  %vm6046_vm1 = vcmask 1041409   ;;  %v1545_v50 = vsel %vm5242_vm14, %v4706_v45, %v4817_v36 }
 0x1bd   :  { %v1560_v56 = vsel %vm1559_vm13, %v4820_v26, %v4914_v44  ;;  %v5280_v15 = vsel %vm1367_vm5, %v1369_v40, %v1365_v37  ;;  %v5286_v34 = vsel %vm5197_vm10, %v4745_v10, %v1545_v50  ;;  %vm6047_vm8 = vcmask 1043459  }
 0x1be   :  { %v1692_v30 = vsel %vm6046_vm1, %v6045_v60, %v6044_v0  ;;  %v5291_v29 = vsel %vm5203_vm11, %v4868_v35, %v1560_v56  ;;  %v1661_v45 = vperm.slane %v5280_v15, %v4318_v63  ;;  %v1571_v26 = vadd.f32 %v4935_v11, %v4968_v13  ;;  %v6049_v35 = vld [vmem:[#allocation15_spill] sm:$0xff] }
 0x1bf   :  { %v1693_v47 = vsel %vm1680_vm0, %v1656_v17, %v1692_v30  ;;  %vm1573_vm15 = vweird.f32 %v4935_v11  ;;  %vm6048_vm14 = vcmask 1044484   ;;  %v1576_v10 = vand.u32 2147483647, %v4892_v46 }
 0x1c0   :  { %v1694_v36 = vsel %vm6047_vm8, %v1657_v54, %v1693_v47  ;;  %vm1574_vm10 = vmor %vm1572_vm3, %vm1573_vm15  ;;  %v1586_v49 = vadd.f32 %v6049_v35, %v5079_v18  ;;  %vm1587_vm11 = vweird.f32 %v6050_v48  ;;  %vm6051_vm6 = vcmask 1045509  }
 0x1c1   :  { %v1695_v44 = vsel %vm6048_vm14, %v1658_v33, %v1694_v36  ;;  %v1575_v20 = vsel %vm1574_vm10, %v4935_v11, %v1571_v26  ;;  %vm1588_vm9 = vweird.f32 %v6049_v35  ;;  %v1591_v13 = vand.u32 2147483647, %v6050_v48  ;;  %v6057_v33 = vld [vmem:[#allocation4_spill] sm:$0xff] }
 0x1c2   :  { %v1696_v16 = vsel %vm6051_vm6, %v1659_v21, %v1695_v44  ;;  %vm1577_vm12 = vcmp.eq.f32.partialorder %v1576_v10, 8.507059e+37  ;;  %vm5311_vm13 = vmor %vm1587_vm11, %vm1588_vm9  ;;  %v1593_v46 = vand.u32 2147483648, %v6050_v48  ;;  %v1600_v18 = vmul.f32 %v5193_v1, %v1599_v12 }
 0x1c3   :  { %v1697_v32 = vsel %vm1688_vm7, %v1660_v5, %v1696_v16  ;;  %v5319_v8 = vsel %vm1577_vm12, %v6054_v14, %v1575_v20  ;;  %v1590_v11 = vsel %vm5311_vm13, %v6049_v35, %v1586_v49  ;;  %vm1592_vm3 = vcmp.eq.f32.partialorder %v1591_v13, 8.507059e+37 }
 0x1c4   :  { %v1698_v28 = vsel %vm1690_vm2, %v1661_v45, %v1697_v32  ;;  %v1594_v55 = vor.u32 1.1754944e-38, %v1593_v46  ;;  %v1601_v41 = vadd.f32 %v5193_v1, %v1600_v18  ;;  %vm1602_vm5 = vweird.f32 %v5097_v25 }
 0x1c5   :  { %v1721_v6 = vsel %vm1717_vm4, %v1698_v28, -inf  ;;  %vm1603_vm1 = vweird.f32 %v5193_v1  ;;  %v1606_v12 = vand.u32 2147483647, %v5097_v25  ;;  %v1608_v58 = vand.u32 2147483648, %v5097_v25 }
 0x1c6   :  { %1722 = vmax.xlane.f32.xlu0 %v1721_v6  ;;  %v1672_v4 = vperm.slane %v6055_v57, %v4318_v63  ;;  %v1670_v42 = vperm.slane %v6056_v38, %v4318_v63  ;;  %v5334_v31 = vsel %vm1592_vm3, %v1594_v55, %v1590_v11  ;;  %vm1604_vm8 = vmor %vm1602_vm5, %vm1603_vm1  ;;  %v1673_v9 = vperm.slane %v5286_v34, %v4318_v63  ;;  %v6062_v11 = vld [vmem:[#allocation8_spill] sm:$0xff] }
 0x1c7   :  { %v1605_v23 = vsel %vm1604_vm8, %v5193_v1, %v1601_v41  ;;  %vm1607_vm15 = vcmp.eq.f32.partialorder %v1606_v12, 8.507059e+37  ;;  %v1609_v17 = vor.u32 1.1754944e-38, %v1608_v58  ;;  %v1674_v54 = vperm.slane %v5291_v29, %v4318_v63  ;;  %vm6074_vm3 = vmmov %vm6051_vm6 }
 0x1c8   :  { %v1675_v25 = vperm.slane %v5319_v8, %v4318_v63  ;;  %v6058_v37 = vperm.slane %v6057_v33, %v4318_v63  ;;  %vm6059_vm14 = vcmask 1041409   ;;  %v1676_v5 = vperm.slane %v5334_v31, %v4318_v63 }
 0x1c9   :  { %v5347_v21 = vsel %vm1607_vm15, %v1609_v17, %v1605_v23  ;;  %vm6060_vm10 = vcmask 1043459   ;;  %vm6061_vm11 = vcmask 1044484   ;;  %v3164_v36 = vmov 0   ;;  %v6063_v23 = vld [vmem:[#allocation14_spill] sm:$0xff]  ;;  %vm6071_vm9 = vmmov %vm6059_vm14 }
 0x1ca   :  { %v1706_v40 = vsel %vm6059_vm14, %v6058_v37, %v1670_v42  ;;  %v1677_v0 = vperm.slane %v5347_v21, %v4318_v63  ;;  %2833 = vset.pattern.permute.xlu2 %v3164_v36  ;;  %2832 = vset.pattern.permute.xlu1 %v3164_v36  ;;  %vm6072_vm12 = vmmov %vm6060_vm10 }
 0x1cb   :  { %v1707_v1 = vsel %vm1680_vm0, %v1672_v4, %v1706_v40  ;;  %2831 = vset.pattern.permute.xlu0 %v3164_v36  ;;  %vm6073_vm13 = vmmov %vm6061_vm11 }
 0x1cc   :  { %v1708_v60 = vsel %vm6060_vm10, %v1673_v9, %v1707_v1  ;;  %vm6075_vm5 = vmmov %vm6071_vm9 }
 0x1cd   :  { %v1709_v30 = vsel %vm6061_vm11, %v1674_v54, %v1708_v60  ;;  %vm6076_vm1 = vmmov %vm6060_vm10 }
 0x1ce   :  { %v1710_v50 = vsel %vm6051_vm6, %v1675_v25, %v1709_v30  ;;  %vm6077_vm8 = vmmov %vm6061_vm11 }
 0x1cf   :  { %v1711_v56 = vsel %vm1688_vm7, %v1676_v5, %v1710_v50  ;;  %vm6078_vm15 = vmmov %vm6074_vm3 }
 0x1d0   :  { %v1712_v47 = vsel %vm1690_vm2, %v1677_v0, %v1711_v56  ;;  %vm6079_vm14 = vmmov %vm6075_vm5 }
 0x1d1   :  { %v1727_v45 = vsel %vm1717_vm4, %v1712_v47, -inf  ;;  %vm6080_vm10 = vmmov %vm6076_vm1 }
 0x1d2   :  { %1728 = vmax.xlane.f32.xlu2 %v1727_v45  ;;  %vm6081_vm11 = vmmov %vm6077_vm8 }
 0x1d3   :  { %vm6082_vm6 = vmmov %vm6074_vm3 }
 0x22a   :  { %v5395_v50 = vpop.xlane.xlu1 %1725 }
 0x22c   :  { %v1720_v26 = vpop.xlane.xlu2 %1719 }
 0x22d   :  { %v1735_v44 = vperm.slane %v1720_v26, 1  ;;  %v1734_v10 = vperm.slane %v1720_v26, 0  ;;  %v1736_v35 = vperm.slane %v1720_v26, 2  ;;  %v1738_v20 = vperm.slane %v1720_v26, 4 }
 0x22e   :  { %v1741_v13 = vperm.slane %v1720_v26, 7  ;;  %v1737_v32 = vperm.slane %v1720_v26, 3  ;;  %v1740_v55 = vperm.slane %v1720_v26, 6  ;;  %v1739_v4 = vperm.slane %v1720_v26, 5 }
 0x22f   :  { %v1799_v49 = vsub.f32 %v4579_v22, %v1735_v44  ;;  %v1798_v48 = vsub.f32 %v4403_v3, %v1734_v10  ;;  %v1800_v16 = vsub.f32 %v4630_v59, %v1736_v35  ;;  %v1802_v28 = vsub.f32 %v4944_v53, %v1738_v20 }
 0x230   :  { %v1805_v14 = vsub.f32 %v5212_v43, %v1741_v13  ;;  %v1801_v6 = vsub.f32 %v6062_v11, %v1737_v32  ;;  %v1804_v43 = vsub.f32 %v5090_v7, %v1740_v55  ;;  %v1803_v17 = vsub.f32 %v6063_v23, %v1739_v4  ;;  %v6065_v11 = vld [vmem:[#allocation9_spill] sm:$0xff] }
 0x231   :  { %v1832_v39 = vmul.f32 1.442695, %v1799_v49  ;;  %v1830_v46 = vmul.f32 1.442695, %v1798_v48  ;;  %v1834_v18 = vmul.f32 1.442695, %v1800_v16 }
 0x232   :  { %v1838_v3 = vmul.f32 1.442695, %v1802_v28  ;;  %v1844_v59 = vmul.f32 1.442695, %v1805_v14  ;;  %v1836_v58 = vmul.f32 1.442695, %v1801_v6 }
 0x233   :  { %3091 = vpow2.f32 %v1832_v39  ;;  %v1842_v54 = vmul.f32 1.442695, %v1804_v43  ;;  %v1840_v1 = vmul.f32 1.442695, %v1803_v17  ;;  %v1750_v26 = vperm.slane %v5395_v50, 0  ;;  %v6064_v49 = vld [vmem:[#allocation2_spill] sm:$0xff] }
 0x234   :  { %3093 = vpow2.f32 %v1830_v46  ;;  %v1753_v39 = vperm.slane %v5395_v50, 3  ;;  %v1752_v55 = vperm.slane %v5395_v50, 2  ;;  %v1751_v43 = vperm.slane %v5395_v50, 1  ;;  %v6067_v17 = vld [vmem:[#allocation16_spill] sm:$0xff] }
 0x235   :  { %3095 = vpow2.f32 %v1834_v18  ;;  %v1814_v48 = vsub.f32 %v6064_v49, %v1750_v26  ;;  %v6070_v49 = vld [vmem:[#allocation10_spill] sm:$0xff] }
 0x236   :  { %3097 = vpow2.f32 %v1838_v3  ;;  %v1817_v6 = vsub.f32 %v6065_v11, %v1753_v39 }
 0x237   :  { %3099 = vpow2.f32 %v1844_v59  ;;  %v1862_v32 = vmul.f32 1.442695, %v1814_v48 }
 0x238   :  { %3101 = vpow2.f32 %v1836_v58  ;;  %v1868_v59 = vmul.f32 1.442695, %v1817_v6 }
 0x239   :  { %v5366_v22 = vpop.xlane.xlu0 %1722  ;;  %v5369_v12 = vpop.eup %3091  ;;  %3103 = vpow2.f32 %v1842_v54 }
 0x23a   :  { %v1744_v41 = vperm.slane %v5366_v22, 2  ;;  %v5371_v42 = vpop.eup %3093  ;;  %1930 = vperm.xlu1 %2832, %v5369_v12   ;;  %v1743_v25 = vperm.slane %v5366_v22, 1  ;;  %v1747_v40 = vperm.slane %v5366_v22, 5  ;;  %v1742_v0 = vperm.slane %v5366_v22, 0 }
 0x23b   :  { %v5374_v53 = vpop.eup %3095  ;;  %1927 = vperm.xlu0 %2831, %v5371_v42   ;;  %v1746_v45 = vperm.slane %v5366_v22, 4  ;;  %v1749_v13 = vperm.slane %v5366_v22, 7  ;;  %v1748_v28 = vperm.slane %v5366_v22, 6 }
 0x23c   :  { %1933 = vperm.xlu2 %2833, %v5374_v53   ;;  %v1808_v9 = vsub.f32 %v4725_v2, %v1744_v41  ;;  %v5383_v5 = vpop.eup %3097  ;;  %v1807_v2 = vsub.f32 %v4634_v24, %v1743_v25  ;;  %v1811_v30 = vsub.f32 %v5220_v19, %v1747_v40  ;;  %v1806_v56 = vsub.f32 %v4390_v27, %v1742_v0 }
 0x23d   :  { %v5386_v7 = vpop.eup %3099  ;;  %v1745_v24 = vperm.slane %v5366_v22, 3  ;;  %v1810_v27 = vsub.f32 %v5168_v61, %v1746_v45  ;;  %v1812_v3 = vsub.f32 %v5250_v51, %v1748_v28  ;;  %v1756_v41 = vperm.slane %v5395_v50, 6  ;;  %v6066_v51 = vld [vmem:[#allocation7_spill] sm:$0xff] }
 0x23e   :  { %v1850_v37 = vmul.f32 1.442695, %v1808_v9  ;;  %v5389_v60 = vpop.eup %3101  ;;  %v1848_v47 = vmul.f32 1.442695, %v1807_v2  ;;  %v1856_v36 = vmul.f32 1.442695, %v1811_v30  ;;  %v1816_v23 = vsub.f32 %v6066_v51, %v1752_v55 }
 0x23f   :  { %v5400_v44 = vpop.eup %3103  ;;  %v1846_v10 = vmul.f32 1.442695, %v1806_v56  ;;  %v1809_v16 = vsub.f32 %v5161_v52, %v1745_v24  ;;  %v1854_v20 = vmul.f32 1.442695, %v1810_v27  ;;  %v1813_v52 = vsub.f32 %v5280_v15, %v1749_v13 }
 0x240   :  { %3105 = vpow2.f32 %v1850_v37  ;;  %v1858_v4 = vmul.f32 1.442695, %v1812_v3  ;;  %v1820_v54 = vsub.f32 %v6067_v17, %v1756_v41  ;;  %v6068_v37 = vld [vmem:[#allocation5_spill] sm:$0xff]  ;;  %v1755_v0 = vperm.slane %v5395_v50, 5 }
 0x241   :  { %3107 = vpow2.f32 %v1840_v1  ;;  %v1852_v18 = vmul.f32 1.442695, %v1809_v16  ;;  %v1860_v22 = vmul.f32 1.442695, %v1813_v52  ;;  %v1815_v40 = vsub.f32 %v6068_v37, %v1751_v43 }
 0x242   :  { %1939 = vperm.xlu1 %2832, %v5383_v5   ;;  %3109 = vpow2.f32 %v1848_v47  ;;  %v1866_v1 = vmul.f32 1.442695, %v1816_v23  ;;  %v1874_v2 = vmul.f32 1.442695, %v1820_v54  ;;  %v1754_v45 = vperm.slane %v5395_v50, 4 }
 0x243   :  { %1948 = vperm.xlu0 %2831, %v5386_v7   ;;  %3111 = vpow2.f32 %v1856_v36  ;;  %v1864_v47 = vmul.f32 1.442695, %v1815_v40  ;;  %v1757_v28 = vperm.slane %v5395_v50, 7 }
 0x244   :  { %1936 = vperm.xlu2 %2833, %v5389_v60   ;;  %3113 = vpow2.f32 %v1846_v10  ;;  %v6069_v10 = vld [vmem:[#allocation12_spill] sm:$0xff]  ;;  %v1818_v48 = vsub.f32 %v6070_v49, %v1754_v45 }
 0x245   :  { %3115 = vpow2.f32 %v1854_v20  ;;  %v5442_v25 = vpop.xlane.xlu2 %1728  ;;  %v1819_v24 = vsub.f32 %v6069_v10, %v1755_v0  ;;  %v1821_v3 = vsub.f32 %v5185_v62, %v1757_v28 }
 0x246   :  { %v5403_v35 = vpop.eup %3105  ;;  %3117 = vpow2.f32 %v1862_v32  ;;  %v1759_v30 = vperm.slane %v5442_v25, 1  ;;  %v1758_v20 = vperm.slane %v5442_v25, 0  ;;  %v1762_v32 = vperm.slane %v5442_v25, 4 }
 0x247   :  { %v5406_v19 = vpop.eup %3107  ;;  %3119 = vpow2.f32 %v1852_v18  ;;  %v1872_v16 = vmul.f32 1.442695, %v1819_v24  ;;  %v1870_v18 = vmul.f32 1.442695, %v1818_v48  ;;  %v1760_v43 = vperm.slane %v5442_v25, 2 }
 0x248   :  { %v5415_v46 = vpop.eup %3109  ;;  %3121 = vpow2.f32 %v1860_v22  ;;  %v1823_v27 = vsub.f32 %v6057_v33, %v1759_v30  ;;  %v1822_v33 = vsub.f32 %v6056_v38, %v1758_v20  ;;  %v1826_v6 = vsub.f32 %v5291_v29, %v1762_v32 }
 0x249   :  { %v5418_v61 = vpop.eup %3111  ;;  %3123 = vpow2.f32 %v1868_v59  ;;  %v1761_v22 = vperm.slane %v5442_v25, 3  ;;  %v1765_v59 = vperm.slane %v5442_v25, 7  ;;  %v1824_v23 = vsub.f32 %v6055_v57, %v1760_v43 }
 0x24a   :  { %1945 = vperm.xlu1 %2832, %v5400_v44   ;;  %v5421_v14 = vpop.eup %3113  ;;  %3125 = vpow2.f32 %v1858_v4  ;;  %v1880_v13 = vmul.f32 1.442695, %v1823_v27  ;;  %v1878_v50 = vmul.f32 1.442695, %v1822_v33  ;;  %v1886_v55 = vmul.f32 1.442695, %v1826_v6 }
 0x24b   :  { %1957 = vperm.xlu0 %2831, %v5403_v35   ;;  %v5430_v58 = vpop.eup %3115  ;;  %3127 = vpow2.f32 %v1866_v1  ;;  %v1876_v4 = vmul.f32 1.442695, %v1821_v3  ;;  %v1825_v62 = vsub.f32 %v5286_v34, %v1761_v22  ;;  %v1829_v29 = vsub.f32 %v5347_v21, %v1765_v59 }
 0x24c   :  { %1942 = vperm.xlu2 %2833, %v5406_v19   ;;  %v5433_v15 = vpop.eup %3117  ;;  %3129 = vpow2.f32 %v1874_v2  ;;  %v1764_v54 = vperm.slane %v5442_v25, 6  ;;  %v1882_v1 = vmul.f32 1.442695, %v1824_v23  ;;  %v1763_v0 = vperm.slane %v5442_v25, 5 }
 0x24d   :  { %v5436_v9 = vpop.eup %3119  ;;  %3131 = vpow2.f32 %v1864_v47  ;;  %v1884_v17 = vmul.f32 1.442695, %v1825_v62  ;;  %v1892_v37 = vmul.f32 1.442695, %v1829_v29 }
 0x24e   :  { %v5447_v56 = vpop.eup %3121  ;;  %3133 = vpow2.f32 %v1872_v16  ;;  %v1828_v57 = vsub.f32 %v5334_v31, %v1764_v54  ;;  %v1827_v21 = vsub.f32 %v5319_v8, %v1763_v0 }
 0x24f   :  { %v5450_v36 = vpop.eup %3123  ;;  %3135 = vpow2.f32 %v1880_v13 }
 0x250   :  { %v5453_v26 = vpop.eup %3125  ;;  %3137 = vpow2.f32 %v1870_v18  ;;  %v1890_v30 = vmul.f32 1.442695, %v1828_v57  ;;  %v1888_v25 = vmul.f32 1.442695, %v1827_v21 }
 0x251   :  { %v5462_v39 = vpop.eup %3127  ;;  %3139 = vpow2.f32 %v1878_v50 }
 0x252   :  { %1954 = vperm.xlu1 %2832, %v5415_v46   ;;  %v5465_v52 = vpop.eup %3129  ;;  %3141 = vpow2.f32 %v1886_v55 }
 0x253   :  { %1966 = vperm.xlu0 %2831, %v5418_v61   ;;  %v5468_v11 = vpop.eup %3131  ;;  %3143 = vpow2.f32 %v1876_v4 }
 0x254   :  { %1951 = vperm.xlu2 %2833, %v5421_v14   ;;  %v5477_v41 = vpop.eup %3133  ;;  %3145 = vpow2.f32 %v1884_v17 }
 0x255   :  { %v5480_v38 = vpop.eup %3135  ;;  %3147 = vpow2.f32 %v1892_v37 }
 0x256   :  { %v5483_v51 = vpop.eup %3137  ;;  %3149 = vpow2.f32 %v1882_v1 }
 0x257   :  { %v5491_v40 = vpop.eup %3139  ;;  %3151 = vpow2.f32 %v1890_v30 }
 0x258   :  { %v5494_v2 = vpop.eup %3141  ;;  %3153 = vpow2.f32 %v1888_v25 }
 0x259   :  { %v5497_v34 = vpop.eup %3143 }
 0x25a   :  { %1963 = vperm.xlu1 %2832, %v5430_v58   ;;  %v5503_v47 = vpop.eup %3145 }
 0x25b   :  { %1975 = vperm.xlu0 %2831, %v5433_v15   ;;  %v5505_v45 = vpop.eup %3147 }
 0x25c   :  { %1960 = vperm.xlu2 %2833, %v5436_v9   ;;  %v5508_v10 = vpop.eup %3149 }
 0x25d   :  { %v5512_v31 = vpop.eup %3151 }
 0x25e   :  { %v5515_v8 = vpop.eup %3153 }
 0x262   :  { %1972 = vperm.xlu1 %2832, %v5447_v56  }
 0x263   :  { %1984 = vperm.xlu0 %2831, %v5450_v36  }
 0x264   :  { %1969 = vperm.xlu2 %2833, %v5453_v26  }
 0x26a   :  { %1981 = vperm.xlu1 %2832, %v5462_v39  }
 0x26b   :  { %1993 = vperm.xlu0 %2831, %v5465_v52  }
 0x26c   :  { %1978 = vperm.xlu2 %2833, %v5468_v11  }
 0x272   :  { %1990 = vperm.xlu1 %2832, %v5477_v41  }
 0x273   :  { %2002 = vperm.xlu0 %2831, %v5480_v38  }
 0x274   :  { %1987 = vperm.xlu2 %2833, %v5483_v51  }
 0x27a   :  { %1999 = vperm.xlu1 %2832, %v5491_v40  }
 0x27b   :  { %2011 = vperm.xlu0 %2831, %v5494_v2  }
 0x27c   :  { %1996 = vperm.xlu2 %2833, %v5497_v34  }
 0x282   :  { %2008 = vperm.xlu1 %2832, %v5503_v47  }
 0x283   :  { %2020 = vperm.xlu0 %2831, %v5505_v45  }
 0x284   :  { %2005 = vperm.xlu2 %2833, %v5508_v10  }
 0x28a   :  { %2017 = vperm.xlu1 %2832, %v5512_v31  }
 0x28c   :  { %2014 = vperm.xlu2 %2833, %v5515_v8  }
 0x296   :  { %v1934_v24 = vpop.permute.xlu2 %1933 }
 0x297   :  { %v2024_v33 = vperm.slane %v1934_v24, %v4318_v63 }
 0x29e   :  { %v1937_v27 = vpop.permute.xlu2 %1936 }
 0x29f   :  { %v2025_v22 = vperm.slane %v1937_v27, %v4318_v63 }
 0x2a6   :  { %v1943_v49 = vpop.permute.xlu2 %1942 }
 0x2a7   :  { %v2027_v4 = vperm.slane %v1943_v49, %v4318_v63 }
 0x2ac   :  { %v1931_v48 = vpop.permute.xlu1 %1930 }
 0x2ad   :  { %v1928_v16 = vpop.permute.xlu0 %1927  ;;  %v2023_v13 = vperm.slane %v1931_v48, %v4318_v63 }
 0x2ae   :  { %v2022_v20 = vperm.slane %v1928_v16, %v4318_v63  ;;  %v1952_v32 = vpop.permute.xlu2 %1951 }
 0x2af   :  { %v2030_v24 = vperm.slane %v1952_v32, %v4318_v63 }
 0x2b0   :  { %v2054_v18 = vsel %vm6071_vm9, %v2023_v13, %v2022_v20  ;;  %vm6083_vm9 = vmmov %vm6075_vm5 }
 0x2b1   :  { %v2055_v3 = vsel %vm1680_vm0, %v2024_v33, %v2054_v18 }
 0x2b2   :  { %v2056_v55 = vsel %vm6072_vm12, %v2025_v22, %v2055_v3  ;;  %vm6084_vm12 = vmmov %vm6076_vm1 }
 0x2b4   :  { %v1940_v28 = vpop.permute.xlu1 %1939 }
 0x2b5   :  { %v1949_v6 = vpop.permute.xlu0 %1948  ;;  %v2026_v50 = vperm.slane %v1940_v28, %v4318_v63 }
 0x2b6   :  { %v1961_v43 = vpop.permute.xlu2 %1960  ;;  %v2029_v17 = vperm.slane %v1949_v6, %v4318_v63 }
 0x2b7   :  { %v2057_v59 = vsel %vm6073_vm13, %v2026_v50, %v2056_v55  ;;  %v2033_v20 = vperm.slane %v1961_v43, %v4318_v63  ;;  %vm6085_vm13 = vmmov %vm6077_vm8 }
 0x2b8   :  { %v2058_v54 = vsel %vm6074_vm3, %v2027_v4, %v2057_v59 }
 0x2bc   :  { %v1946_v62 = vpop.permute.xlu1 %1945 }
 0x2bd   :  { %v1958_v29 = vpop.permute.xlu0 %1957  ;;  %v2028_v23 = vperm.slane %v1946_v62, %v4318_v63 }
 0x2be   :  { %v1970_v25 = vpop.permute.xlu2 %1969  ;;  %v2032_v49 = vperm.slane %v1958_v29, %v4318_v63 }
 0x2bf   :  { %v2059_v37 = vsel %vm1688_vm7, %v2028_v23, %v2058_v54  ;;  %v2036_v50 = vperm.slane %v1970_v25, %v4318_v63 }
 0x2c0   :  { %v2060_v1 = vsel %vm1690_vm2, %v2029_v17, %v2059_v37 }
 0x2c1   :  { %v2086_v0 = vsel %vm1717_vm4, %v2060_v1, 0.0 }
 0x2c2   :  { %2087 = vadd.xlane.f32.xlu2 %v2086_v0 }
 0x2c4   :  { %v1955_v57 = vpop.permute.xlu1 %1954 }
 0x2c5   :  { %v1967_v21 = vpop.permute.xlu0 %1966  ;;  %v2031_v30 = vperm.slane %v1955_v57, %v4318_v63 }
 0x2c6   :  { %v1979_v33 = vpop.permute.xlu2 %1978  ;;  %v2035_v3 = vperm.slane %v1967_v21, %v4318_v63 }
 0x2c7   :  { %v2061_v27 = vsel %vm6075_vm5, %v2031_v30, %v2030_v24  ;;  %v2039_v54 = vperm.slane %v1979_v33, %v4318_v63 }
 0x2c8   :  { %v2062_v48 = vsel %vm1680_vm0, %v2032_v49, %v2061_v27 }
 0x2c9   :  { %v2063_v28 = vsel %vm6076_vm1, %v2033_v20, %v2062_v48 }
 0x2cc   :  { %v1964_v16 = vpop.permute.xlu1 %1963 }
 0x2cd   :  { %v1976_v13 = vpop.permute.xlu0 %1975  ;;  %v2034_v18 = vperm.slane %v1964_v16, %v4318_v63 }
 0x2ce   :  { %v1988_v29 = vpop.permute.xlu2 %1987  ;;  %v2038_v23 = vperm.slane %v1976_v13, %v4318_v63 }
 0x2cf   :  { %v2064_v6 = vsel %vm6077_vm8, %v2034_v18, %v2063_v28  ;;  %v2042_v25 = vperm.slane %v1988_v29, %v4318_v63 }
 0x2d0   :  { %v2065_v32 = vsel %vm6078_vm15, %v2035_v3, %v2064_v6  ;;  %v2068_v0 = vsel %vm6079_vm14, %v2039_v54, %v2038_v23 }
 0x2d1   :  { %v2066_v4 = vsel %vm1688_vm7, %v2036_v50, %v2065_v32 }
 0x2d4   :  { %v1973_v22 = vpop.permute.xlu1 %1972 }
 0x2d5   :  { %v1985_v55 = vpop.permute.xlu0 %1984  ;;  %v2037_v59 = vperm.slane %v1973_v22, %v4318_v63 }
 0x2d6   :  { %v2041_v21 = vperm.slane %v1985_v55, %v4318_v63  ;;  %v1997_v24 = vpop.permute.xlu2 %1996 }
 0x2d7   :  { %v2067_v43 = vsel %vm1690_vm2, %v2037_v59, %v2066_v4  ;;  %v2045_v20 = vperm.slane %v1997_v24, %v4318_v63 }
 0x2d8   :  { %v2089_v62 = vsel %vm1717_vm4, %v2067_v43, 0.0 }
 0x2d9   :  { %2090 = vadd.xlane.f32.xlu1 %v2089_v62 }
 0x2dc   :  { %v1982_v17 = vpop.permute.xlu1 %1981 }
 0x2dd   :  { %v1994_v37 = vpop.permute.xlu0 %1993  ;;  %v2040_v1 = vperm.slane %v1982_v17, %v4318_v63 }
 0x2de   :  { %v2044_v48 = vperm.slane %v1994_v37, %v4318_v63  ;;  %v2006_v32 = vpop.permute.xlu2 %2005 }
 0x2df   :  { %v2069_v57 = vsel %vm1680_vm0, %v2040_v1, %v2068_v0  ;;  %v2048_v43 = vperm.slane %v2006_v32, %v4318_v63 }
 0x2e0   :  { %v2070_v30 = vsel %vm6080_vm10, %v2041_v21, %v2069_v57 }
 0x2e1   :  { %v2071_v16 = vsel %vm6081_vm11, %v2042_v25, %v2070_v30  ;;  %vm6093_vm11 = vmmov %vm6083_vm9 }
 0x2e4   :  { %v1991_v27 = vpop.permute.xlu1 %1990 }
 0x2e5   :  { %v2043_v49 = vperm.slane %v1991_v27, %v4318_v63  ;;  %v2003_v13 = vpop.permute.xlu0 %2002 }
 0x2e6   :  { %v2047_v55 = vperm.slane %v2003_v13, %v4318_v63  ;;  %v2015_v17 = vpop.permute.xlu2 %2014 }
 0x2e7   :  { %v2072_v18 = vsel %vm6082_vm6, %v2043_v49, %v2071_v16  ;;  %v2051_v0 = vperm.slane %v2015_v17, %v4318_v63 }
 0x2e8   :  { %v2073_v28 = vsel %vm1688_vm7, %v2044_v48, %v2072_v18 }
 0x2e9   :  { %v2074_v33 = vsel %vm1690_vm2, %v2045_v20, %v2073_v28 }
 0x2ea   :  { %v2092_v6 = vsel %vm1717_vm4, %v2074_v33, 0.0 }
 0x2eb   :  { %2093 = vadd.xlane.f32.xlu0 %v2092_v6 }
 0x2ec   :  { %v2000_v3 = vpop.permute.xlu1 %1999 }
 0x2ed   :  { %v2046_v50 = vperm.slane %v2000_v3, %v4318_v63  ;;  %v2012_v22 = vpop.permute.xlu0 %2011 }
 0x2ee   :  { %v2050_v54 = vperm.slane %v2012_v22, %v4318_v63 }
 0x2ef   :  { %v2075_v59 = vsel %vm6083_vm9, %v2047_v55, %v2046_v50 }
 0x2f0   :  { %v2076_v29 = vsel %vm1680_vm0, %v2048_v43, %v2075_v59 }
 0x2f4   :  { %v2009_v4 = vpop.permute.xlu1 %2008 }
 0x2f5   :  { %v2049_v62 = vperm.slane %v2009_v4, %v4318_v63  ;;  %v2021_v37 = vpop.permute.xlu0 %2020 }
 0x2f6   :  { %v2053_v30 = vperm.slane %v2021_v37, %v4318_v63 }
 0x2f7   :  { %v2077_v23 = vsel %vm6084_vm12, %v2049_v62, %v2076_v29 }
 0x2f8   :  { %v2078_v1 = vsel %vm6085_vm13, %v2050_v54, %v2077_v23  ;;  %vm6097_vm13 = vcmask 1043459  }
 0x2f9   :  { %v2079_v25 = vsel %vm6074_vm3, %v2051_v0, %v2078_v1  ;;  %vm6098_vm3 = vcmask 1044484  }
 0x2fc   :  { %v2018_v57 = vpop.permute.xlu1 %2017 }
 0x2fd   :  { %v2052_v21 = vperm.slane %v2018_v57, %v4318_v63 }
 0x2ff   :  { %v2080_v24 = vsel %vm1688_vm7, %v2052_v21, %v2079_v25 }
 0x300   :  { %v2081_v27 = vsel %vm1690_vm2, %v2053_v30, %v2080_v24 }
 0x301   :  { %v2095_v49 = vsel %vm1717_vm4, %v2081_v27, 0.0  ;;  %vm6086_vm4 = vcmask 130048  }
 0x302   :  { %2096 = vadd.xlane.f32.xlu2 %v2095_v49  ;;  %vm6087_vm5 = vmmov %vm6086_vm4 }
 0x303   :  { %vm6088_vm1 = vmmov %vm6086_vm4 }
 0x304   :  { %vm6089_vm8 = vmmov %vm6088_vm1 }
 0x305   :  { %vm6090_vm15 = vmmov %vm6088_vm1 }
 0x306   :  { %vm6091_vm14 = vmmov %vm6088_vm1 }
 0x307   :  { %vm6092_vm10 = vmmov %vm6088_vm1 }
 0x308   :  { %vm6094_vm6 = vmmov %vm6088_vm1 }
 0x309   :  { %vm6095_vm9 = vmmov %vm6088_vm1 }
 0x30a   :  { %vm6096_vm12 = vmmov %vm6088_vm1 }
 0x335   :  { %v2088_v48 = vpop.xlane.xlu2 %2087 }
 0x336   :  { %3155 = vrcp.f32 %v2088_v48 }
 0x33c   :  { %v3156_v16 = vpop.eup %3155 }
 0x33d   :  { %v2106_v20 = vperm.slane %v3156_v16, 0  ;;  %v2108_v13 = vperm.slane %v3156_v16, 2  ;;  %v2107_v18 = vperm.slane %v3156_v16, 1  ;;  %v2109_v6 = vperm.slane %v3156_v16, 3 }
 0x33e   :  { %v2110_v3 = vperm.slane %v3156_v16, 4  ;;  %v2111_v32 = vperm.slane %v3156_v16, 5  ;;  %v2113_v59 = vperm.slane %v3156_v16, 7 }
 0x33f   :  { %v2170_v28 = vmul.f32 %v5371_v42, %v2106_v20  ;;  %v2172_v33 = vmul.f32 %v5374_v53, %v2108_v13  ;;  %v2171_v63 = vmul.f32 %v5369_v12, %v2107_v18  ;;  %v2173_v50 = vmul.f32 %v5389_v60, %v2109_v6 }
 0x340   :  { %v2174_v22 = vmul.f32 %v5383_v5, %v2110_v3  ;;  %v2175_v55 = vmul.f32 %v5406_v19, %v2111_v32  ;;  %v2112_v42 = vperm.slane %v3156_v16, 6  ;;  %v2177_v4 = vmul.f32 %v5386_v7, %v2113_v59 }
 0x341   :  { %2236 = vperm.xlu1 %2832, %v2170_v28   ;;  %2246 = vperm.xlu0 %2831, %v2172_v33  }
 0x342   :  { %2241 = vperm.xlu2 %2833, %v2171_v63   ;;  %v2176_v12 = vmul.f32 %v5400_v44, %v2112_v42 }
 0x349   :  { %2251 = vperm.xlu1 %2832, %v2173_v50   ;;  %2256 = vperm.xlu0 %2831, %v2174_v22  }
 0x34a   :  { %2261 = vperm.xlu2 %2833, %v2175_v55   ;;  %v2203_v55 = vld [vmem:[%s5789_s1 + $0x8] sm:$0xff] }
 0x34c   :  { %v2091_v53 = vpop.xlane.xlu1 %2090 }
 0x34d   :  { %3157 = vrcp.f32 %v2091_v53 }
 0x351   :  { %2266 = vperm.xlu1 %2832, %v2176_v12   ;;  %2271 = vperm.xlu0 %2831, %v2177_v4   ;;  %v2202_v12 = vld [vmem:[%s5789_s1] sm:$0xff] }
 0x353   :  { %v3158_v43 = vpop.eup %3157 }
 0x354   :  { %v2114_v62 = vperm.slane %v3158_v43, 0  ;;  %v2116_v60 = vperm.slane %v3158_v43, 2  ;;  %v2115_v29 = vperm.slane %v3158_v43, 1  ;;  %v2117_v17 = vperm.slane %v3158_v43, 3 }
 0x355   :  { %v2119_v54 = vperm.slane %v3158_v43, 5  ;;  %v2118_v44 = vperm.slane %v3158_v43, 4 }
 0x356   :  { %v2178_v5 = vmul.f32 %v5421_v14, %v2114_v62  ;;  %v2180_v19 = vmul.f32 %v5403_v35, %v2116_v60  ;;  %v2179_v23 = vmul.f32 %v5415_v46, %v2115_v29  ;;  %v2181_v7 = vmul.f32 %v5436_v9, %v2117_v17 }
 0x357   :  { %v2183_v1 = vmul.f32 %v5418_v61, %v2119_v54  ;;  %v2182_v0 = vmul.f32 %v5430_v58, %v2118_v44  ;;  %v2120_v35 = vperm.slane %v3158_v43, 6  ;;  %v2121_v14 = vperm.slane %v3158_v43, 7 }
 0x358   :  { %2276 = vperm.xlu2 %2833, %v2178_v5  }
 0x359   :  { %2286 = vperm.xlu0 %2831, %v2180_v19   ;;  %2281 = vperm.xlu1 %2832, %v2179_v23   ;;  %v2184_v57 = vmul.f32 %v5453_v26, %v2120_v35  ;;  %v2185_v30 = vmul.f32 %v5447_v56, %v2121_v14  ;;  %v2206_v35 = vld [vmem:[%s5789_s1 + $0x20] sm:$0xff]  ;;  %v2205_v14 = vld [vmem:[%s5789_s1 + $0x18] sm:$0xff] }
 0x35e   :  { %v2094_v37 = vpop.xlane.xlu0 %2093 }
 0x35f   :  { %3159 = vrcp.f32 %v2094_v37 }
 0x360   :  { %2291 = vperm.xlu2 %2833, %v2181_v7  }
 0x361   :  { %2301 = vperm.xlu0 %2831, %v2183_v1   ;;  %2296 = vperm.xlu1 %2832, %v2182_v0  }
 0x365   :  { %v3160_v46 = vpop.eup %3159 }
 0x366   :  { %v2122_v21 = vperm.slane %v3160_v46, 0  ;;  %v2123_v9 = vperm.slane %v3160_v46, 1  ;;  %v2124_v61 = vperm.slane %v3160_v46, 2  ;;  %v2125_v24 = vperm.slane %v3160_v46, 3 }
 0x367   :  { %v2126_v26 = vperm.slane %v3160_v46, 4  ;;  %v2127_v48 = vperm.slane %v3160_v46, 5  ;;  %v2129_v32 = vperm.slane %v3160_v46, 7 }
 0x368   :  { %2306 = vperm.xlu2 %2833, %v2184_v57   ;;  %v2186_v25 = vmul.f32 %v5433_v15, %v2122_v21  ;;  %v2187_v58 = vmul.f32 %v5468_v11, %v2123_v9  ;;  %v2188_v27 = vmul.f32 %v5462_v39, %v2124_v61  ;;  %v2189_v49 = vmul.f32 %v5450_v36, %v2125_v24 }
 0x369   :  { %2311 = vperm.xlu1 %2832, %v2185_v30   ;;  %v2190_v15 = vmul.f32 %v5483_v51, %v2126_v26  ;;  %v2191_v16 = vmul.f32 %v5477_v41, %v2127_v48  ;;  %v2193_v50 = vmul.f32 %v5497_v34, %v2129_v32  ;;  %v2207_v34 = vld [vmem:[%s5789_s1 + $0x28] sm:$0xff] }
 0x36a   :  { %2316 = vperm.xlu0 %2831, %v2186_v25  }
 0x370   :  { %2321 = vperm.xlu2 %2833, %v2187_v58  }
 0x371   :  { %2326 = vperm.xlu1 %2832, %v2188_v27  }
 0x372   :  { %2331 = vperm.xlu0 %2831, %v2189_v49  }
 0x375   :  { %v2097_v56 = vpop.xlane.xlu2 %2096 }
 0x376   :  { %3161 = vrcp.f32 %v2097_v56 }
 0x378   :  { %2336 = vperm.xlu2 %2833, %v2190_v15  }
 0x379   :  { %2341 = vperm.xlu1 %2832, %v2191_v16  }
 0x37c   :  { %v3162_v20 = vpop.eup %3161 }
 0x37d   :  { %v2130_v13 = vperm.slane %v3162_v20, 0  ;;  %v2132_v11 = vperm.slane %v3162_v20, 2  ;;  %v2131_v18 = vperm.slane %v3162_v20, 1  ;;  %v2133_v33 = vperm.slane %v3162_v20, 3 }
 0x37e   :  { %v2135_v63 = vperm.slane %v3162_v20, 5  ;;  %v2134_v51 = vperm.slane %v3162_v20, 4 }
 0x37f   :  { %v2194_v39 = vmul.f32 %v5491_v40, %v2130_v13  ;;  %v2196_v36 = vmul.f32 %v5508_v10, %v2132_v11  ;;  %v2195_v28 = vmul.f32 %v5480_v38, %v2131_v18  ;;  %v2197_v41 = vmul.f32 %v5503_v47, %v2133_v33  ;;  %v2208_v33 = vld [vmem:[%s5789_s1 + $0x30] sm:$0xff] }
 0x380   :  { %v2199_v6 = vmul.f32 %v5515_v8, %v2135_v63  ;;  %v2198_v3 = vmul.f32 %v5494_v2, %v2134_v51  ;;  %v2128_v40 = vperm.slane %v3160_v46, 6  ;;  %v2136_v10 = vperm.slane %v3162_v20, 6  ;;  %v2210_v46 = vld [vmem:[%s5789_s1 + $0x40] sm:$0xff] }
 0x381   :  { %2356 = vperm.xlu0 %2831, %v2194_v39   ;;  %2366 = vperm.xlu1 %2832, %v2196_v36   ;;  %v2137_v47 = vperm.slane %v3162_v20, 7 }
 0x382   :  { %2361 = vperm.xlu2 %2833, %v2195_v28   ;;  %v2192_v38 = vmul.f32 %v5465_v52, %v2128_v40  ;;  %v2200_v22 = vmul.f32 %v5512_v31, %v2136_v10  ;;  %v2209_v28 = vld [vmem:[%s5789_s1 + $0x38] sm:$0xff] }
 0x383   :  { %v2201_v8 = vmul.f32 %v5505_v45, %v2137_v47  ;;  %v2204_v45 = vld [vmem:[%s5789_s1 + $0x10] sm:$0xff] }
 0x389   :  { %2371 = vperm.xlu0 %2831, %v2197_v41   ;;  %2381 = vperm.xlu1 %2832, %v2199_v6   ;;  %v2213_v6 = vld [vmem:[%s5789_s1 + $0x58] sm:$0xff] }
 0x38a   :  { %2376 = vperm.xlu2 %2833, %v2198_v3  }
 0x391   :  { %2346 = vperm.xlu0 %2831, %v2192_v38   ;;  %2351 = vperm.xlu1 %2832, %v2193_v50  }
 0x392   :  { %2386 = vperm.xlu2 %2833, %v2200_v22  }
 0x399   :  { %2391 = vperm.xlu0 %2831, %v2201_v8  }
 0x39c   :  { %v2242_v2 = vpop.permute.xlu2 %2241 }
 0x39d   :  { %v2395_v42 = vmul.f32 %v2242_v2, %v2203_v55 }
 0x39f   :  { %v2433_v52 = vsel %vm6086_vm4, %v2395_v42, 0.0  ;;  %vm6099_vm4 = vmmov %vm6088_vm1 }
 0x3a0   :  { %v2434_v31 = vrot.slane %v2433_v52, 4 }
 0x3a2   :  { %v2435_v60 = vadd.f32 %v2434_v31, %v2433_v52 }
 0x3a4   :  { %v2262_v59 = vpop.permute.xlu2 %2261  ;;  %v2436_v37 = vrot.slane %v2435_v60, 2 }
 0x3a5   :  { %v2399_v53 = vmul.f32 %v2262_v59, %v2207_v34 }
 0x3a6   :  { %v2437_v9 = vadd.f32 %v2436_v37, %v2435_v60 }
 0x3a7   :  { %v2461_v19 = vsel %vm6087_vm5, %v2399_v53, 0.0  ;;  %vm6100_vm5 = vmmov %vm6088_vm1 }
 0x3a8   :  { %v2462_v7 = vrot.slane %v2461_v19, 4  ;;  %v2438_v11 = vrot.slane %v2437_v9, 1 }
 0x3aa   :  { %v2463_v61 = vadd.f32 %v2462_v7, %v2461_v19  ;;  %v2439_v38 = vadd.f32 %v2438_v11, %v2437_v9 }
 0x3ac   :  { %v2464_v18 = vrot.slane %v2463_v61, 2 }
 0x3ae   :  { %v2465_v50 = vadd.f32 %v2464_v18, %v2463_v61 }
 0x3b0   :  { %v2466_v7 = vrot.slane %v2465_v50, 1 }
 0x3b2   :  { %v2277_v4 = vpop.permute.xlu2 %2276 }
 0x3b3   :  { %v2247_v43 = vpop.permute.xlu0 %2246  ;;  %v2237_v62 = vpop.permute.xlu1 %2236  ;;  %v2402_v26 = vmul.f32 %v2277_v4, %v2210_v46 }
 0x3b4   :  { %v2396_v29 = vmul.f32 %v2247_v43, %v2204_v45  ;;  %v2394_v5 = vmul.f32 %v2237_v62, %v2202_v12 }
 0x3b5   :  { %v2482_v63 = vsel %vm6092_vm10, %v2402_v26, 0.0  ;;  %vm6104_vm10 = vmmov %vm6088_vm1 }
 0x3b6   :  { %v2440_v23 = vsel %vm6088_vm1, %v2396_v29, 0.0  ;;  %v2426_v17 = vsel %vm6089_vm8, %v2394_v5, 0.0  ;;  %v2483_v8 = vrot.slane %v2482_v63, 4  ;;  %v2216_v29 = vld [vmem:[%s5789_s1 + $0x70] sm:$0xff]  ;;  %vm6101_vm8 = vcmask 1045509  }
 0x3b7   :  { %v2441_v54 = vrot.slane %v2440_v23, 4  ;;  %v2427_v44 = vrot.slane %v2426_v17, 4 }
 0x3b9   :  { %v2442_v1 = vadd.f32 %v2441_v54, %v2440_v23  ;;  %v2428_v0 = vadd.f32 %v2427_v44, %v2426_v17  ;;  %v2212_v23 = vld [vmem:[%s5789_s1 + $0x50] sm:$0xff]  ;;  %v2211_v17 = vld [vmem:[%s5789_s1 + $0x48] sm:$0xff]  ;;  %v2484_v54 = vadd.f32 %v2483_v8, %v2482_v63  ;;  %v2214_v63 = vld [vmem:[%s5789_s1 + $0x60] sm:$0xff] }
 0x3ba   :  { %v2292_v49 = vpop.permute.xlu2 %2291 }
 0x3bb   :  { %v2443_v57 = vrot.slane %v2442_v1, 2  ;;  %v2429_v21 = vrot.slane %v2428_v0, 2  ;;  %v2257_v30 = vpop.permute.xlu0 %2256  ;;  %v2252_v25 = vpop.permute.xlu1 %2251  ;;  %v2405_v2 = vmul.f32 %v2292_v49, %v2213_v6 }
 0x3bc   :  { %v2398_v24 = vmul.f32 %v2257_v30, %v2206_v35  ;;  %v2397_v58 = vmul.f32 %v2252_v25, %v2205_v14 }
 0x3bd   :  { %v2430_v27 = vadd.f32 %v2429_v21, %v2428_v0  ;;  %v2444_v48 = vadd.f32 %v2443_v57, %v2442_v1  ;;  %v2503_v62 = vsel %vm6096_vm12, %v2405_v2, 0.0  ;;  %vm6107_vm12 = vmmov %vm6098_vm3 }
 0x3be   :  { %v2454_v56 = vsel %vm6090_vm15, %v2398_v24, 0.0  ;;  %v2447_v15 = vsel %vm6091_vm14, %v2397_v58, 0.0  ;;  %v2504_v57 = vrot.slane %v2503_v62, 4  ;;  %v2485_v24 = vrot.slane %v2484_v54, 2  ;;  %vm6102_vm15 = vmmov %vm6088_vm1 }
 0x3bf   :  { %v2431_v16 = vrot.slane %v2430_v27, 1  ;;  %v2455_v20 = vrot.slane %v2454_v56, 4  ;;  %v2448_v13 = vrot.slane %v2447_v15, 4  ;;  %v2445_v51 = vrot.slane %v2444_v48, 1  ;;  %vm6103_vm14 = vmmov %vm6088_vm1 }
 0x3c1   :  { %v2456_v39 = vadd.f32 %v2455_v20, %v2454_v56  ;;  %v2449_v36 = vadd.f32 %v2448_v13, %v2447_v15  ;;  %v2432_v41 = vadd.f32 %v2431_v16, %v2430_v27  ;;  %v2446_v59 = vadd.f32 %v2445_v51, %v2444_v48 }
 0x3c2   :  { %v2307_v12 = vpop.permute.xlu2 %2306  ;;  %v2467_v16 = vadd.f32 %v2466_v7, %v2465_v50  ;;  %v2505_v20 = vadd.f32 %v2504_v57, %v2503_v62  ;;  %v2219_v57 = vld [vmem:[%s5789_s1 + $0x88] sm:$0xff] }
 0x3c3   :  { %v2457_v3 = vrot.slane %v2456_v39, 2  ;;  %v2450_v40 = vrot.slane %v2449_v36, 2  ;;  %v2272_v32 = vpop.permute.xlu0 %2271  ;;  %v2267_v10 = vpop.permute.xlu1 %2266  ;;  %v2682_v52 = vsel %vm6093_vm11, %v2439_v38, %v2432_v41  ;;  %v2408_v21 = vmul.f32 %v2307_v12, %v2216_v29  ;;  %v2217_v29 = vld [vmem:[%s5789_s1 + $0x78] sm:$0xff] }
 0x3c4   :  { %v2401_v22 = vmul.f32 %v2272_v32, %v2209_v28  ;;  %v2400_v47 = vmul.f32 %v2267_v10, %v2208_v33  ;;  %v2683_v37 = vsel %vm1680_vm0, %v2446_v59, %v2682_v52  ;;  %v2215_v33 = vld [vmem:[%s5789_s1 + $0x68] sm:$0xff]  ;;  %v2486_v41 = vadd.f32 %v2485_v24, %v2484_v54 }
 0x3c5   :  { %v2458_v55 = vadd.f32 %v2457_v3, %v2456_v39  ;;  %v2451_v42 = vadd.f32 %v2450_v40, %v2449_v36  ;;  %v2524_v13 = vsel %vm6088_vm1, %v2408_v21, 0.0  ;;  %v2506_v8 = vrot.slane %v2505_v20, 2 }
 0x3c6   :  { %v2475_v34 = vsel %vm6094_vm6, %v2401_v22, 0.0  ;;  %v2468_v31 = vsel %vm6095_vm9, %v2400_v47, 0.0  ;;  %v2525_v38 = vrot.slane %v2524_v13, 4  ;;  %v2487_v52 = vrot.slane %v2486_v41, 1  ;;  %vm6105_vm6 = vmmov %vm6088_vm1 }
 0x3c7   :  { %v2459_v53 = vrot.slane %v2458_v55, 1  ;;  %v2452_v45 = vrot.slane %v2451_v42, 1  ;;  %v2476_v4 = vrot.slane %v2475_v34, 4  ;;  %v2469_v43 = vrot.slane %v2468_v31, 4  ;;  %vm6106_vm9 = vmmov %vm6097_vm13 }
 0x3c9   :  { %v2453_v60 = vadd.f32 %v2452_v45, %v2451_v42  ;;  %v2477_v5 = vadd.f32 %v2476_v4, %v2475_v34  ;;  %v2470_v19 = vadd.f32 %v2469_v43, %v2468_v31  ;;  %v2460_v44 = vadd.f32 %v2459_v53, %v2458_v55 }
 0x3ca   :  { %v2322_v39 = vpop.permute.xlu2 %2321  ;;  %v2526_v45 = vadd.f32 %v2525_v38, %v2524_v13  ;;  %v2507_v4 = vadd.f32 %v2506_v8, %v2505_v20 }
 0x3cb   :  { %v2684_v1 = vsel %vm6097_vm13, %v2453_v60, %v2683_v37  ;;  %v2478_v0 = vrot.slane %v2477_v5, 2  ;;  %v2471_v35 = vrot.slane %v2470_v19, 2  ;;  %v2287_v14 = vpop.permute.xlu0 %2286  ;;  %v2282_v46 = vpop.permute.xlu1 %2281  ;;  %vm6108_vm13 = vmmov %vm6088_vm1 }
 0x3cc   :  { %v2404_v30 = vmul.f32 %v2287_v14, %v2212_v23  ;;  %v2403_v25 = vmul.f32 %v2282_v46, %v2211_v17  ;;  %v2685_v58 = vsel %vm6098_vm3, %v2460_v44, %v2684_v1  ;;  %v2527_v44 = vrot.slane %v2526_v45, 2  ;;  %vm6109_vm3 = vmmov %vm6101_vm8 }
 0x3cd   :  { %v2479_v9 = vadd.f32 %v2478_v0, %v2477_v5  ;;  %v2472_v61 = vadd.f32 %v2471_v35, %v2470_v19  ;;  %v2686_v51 = vsel %vm6101_vm8, %v2467_v16, %v2685_v58  ;;  %v2488_v5 = vadd.f32 %v2487_v52, %v2486_v41  ;;  %vm6112_vm8 = vmmov %vm6088_vm1 }
 0x3ce   :  { %v2496_v27 = vsel %vm6099_vm4, %v2404_v30, 0.0  ;;  %v2489_v49 = vsel %vm6100_vm5, %v2403_v25, 0.0  ;;  %v2508_v1 = vrot.slane %v2507_v4, 1  ;;  %vm6110_vm4 = vmmov %vm6088_vm1 }
 0x3cf   :  { %v2480_v26 = vrot.slane %v2479_v9, 1  ;;  %v2473_v48 = vrot.slane %v2472_v61, 1  ;;  %v2497_v56 = vrot.slane %v2496_v27, 4  ;;  %v2490_v15 = vrot.slane %v2489_v49, 4  ;;  %vm6111_vm5 = vmmov %vm6088_vm1 }
 0x3d0   :  { %v2509_v58 = vadd.f32 %v2508_v1, %v2507_v4 }
 0x3d1   :  { %v2481_v11 = vadd.f32 %v2480_v26, %v2479_v9  ;;  %v2474_v18 = vadd.f32 %v2473_v48, %v2472_v61  ;;  %v2498_v36 = vadd.f32 %v2497_v56, %v2496_v27  ;;  %v2491_v28 = vadd.f32 %v2490_v15, %v2489_v49 }
 0x3d2   :  { %v2337_v19 = vpop.permute.xlu2 %2336  ;;  %v2528_v61 = vadd.f32 %v2527_v44, %v2526_v45  ;;  %v2411_v26 = vmul.f32 %v2322_v39, %v2219_v57 }
 0x3d3   :  { %v2687_v6 = vsel %vm1688_vm7, %v2474_v18, %v2686_v51  ;;  %v2499_v3 = vrot.slane %v2498_v36, 2  ;;  %v2492_v40 = vrot.slane %v2491_v28, 2  ;;  %v2302_v32 = vpop.permute.xlu0 %2301  ;;  %v2297_v10 = vpop.permute.xlu1 %2296 }
 0x3d4   :  { %v2688_v50 = vsel %vm1690_vm2, %v2481_v11, %v2687_v6  ;;  %v2407_v22 = vmul.f32 %v2302_v32, %v2215_v33  ;;  %v2406_v47 = vmul.f32 %v2297_v10, %v2214_v63  ;;  %v2529_v20 = vrot.slane %v2528_v61, 1  ;;  %v2218_v11 = vld [vmem:[%s5789_s1 + $0x80] sm:$0xff]  ;;  %v2221_v32 = vld [vmem:[%s5789_s1 + $0x98] sm:$0xff] }
 0x3d5   :  { %2714 = vst.msk [vmem:[%s5790_s4] sm:$0xff] %vm6102_vm15, %v2688_v50  ;;  %v2500_v2 = vadd.f32 %v2499_v3, %v2498_v36  ;;  %v2493_v55 = vadd.f32 %v2492_v40, %v2491_v28  ;;  %v2220_v28 = vld [vmem:[%s5789_s1 + $0x90] sm:$0xff]  ;;  %v2545_v39 = vsel %vm6108_vm13, %v2411_v26, 0.0  ;;  %v2227_v50 = vld [vmem:[%s5789_s1 + $0xc8] sm:$0xff]  ;;  %vm6113_vm15 = vmmov %vm6088_vm1 }
 0x3d6   :  { %v2517_v42 = vsel %vm6103_vm14, %v2407_v22, 0.0  ;;  %v2510_v59 = vsel %vm6104_vm10, %v2406_v47, 0.0  ;;  %v2530_v41 = vadd.f32 %v2529_v20, %v2528_v61  ;;  %v2546_v3 = vrot.slane %v2545_v39, 4  ;;  %vm6114_vm14 = vmmov %vm6088_vm1  ;;  %v2232_v26 = vld [vmem:[%s5789_s1 + $0xf0] sm:$0xff] }
 0x3d7   :  { %v2494_v34 = vrot.slane %v2493_v55, 1  ;;  %v2518_v31 = vrot.slane %v2517_v42, 4  ;;  %v2511_v53 = vrot.slane %v2510_v59, 4  ;;  %v2501_v12 = vrot.slane %v2500_v2, 1  ;;  %vm6115_vm10 = vmmov %vm6088_vm1 }
 0x3d8   :  { %vm6120_vm13 = vmmov %vm6088_vm1 }
 0x3d9   :  { %v2495_v43 = vadd.f32 %v2494_v34, %v2493_v55  ;;  %v2519_v62 = vadd.f32 %v2518_v31, %v2517_v42  ;;  %v2512_v60 = vadd.f32 %v2511_v53, %v2510_v59  ;;  %v2502_v37 = vadd.f32 %v2501_v12, %v2500_v2  ;;  %v2222_v59 = vld [vmem:[%s5789_s1 + $0xa0] sm:$0xff]  ;;  %v2223_v12 = vld [vmem:[%s5789_s1 + $0xa8] sm:$0xff] }
 0x3da   :  { %v2547_v42 = vadd.f32 %v2546_v3, %v2545_v39 }
 0x3db   :  { %v2520_v23 = vrot.slane %v2519_v62, 2  ;;  %v2513_v17 = vrot.slane %v2512_v60, 2  ;;  %v2312_v54 = vpop.permute.xlu1 %2311  ;;  %v2689_v0 = vsel %vm6093_vm11, %v2495_v43, %v2488_v5  ;;  %v2414_v43 = vmul.f32 %v2337_v19, %v2222_v59  ;;  %vm6116_vm11 = vmmov %vm6088_vm1 }
 0x3dc   :  { %v2409_v7 = vmul.f32 %v2312_v54, %v2217_v29  ;;  %v2317_v9 = vpop.permute.xlu0 %2316  ;;  %v2690_v24 = vsel %vm1680_vm0, %v2502_v37, %v2689_v0  ;;  %v2362_v18 = vpop.permute.xlu2 %2361  ;;  %v2548_v4 = vrot.slane %v2547_v42, 2 }
 0x3dd   :  { %v2521_v35 = vadd.f32 %v2520_v23, %v2519_v62  ;;  %v2514_v14 = vadd.f32 %v2513_v17, %v2512_v60  ;;  %v2691_v56 = vsel %vm6106_vm9, %v2509_v58, %v2690_v24  ;;  %v2410_v51 = vmul.f32 %v2317_v9, %v2218_v11  ;;  %v2226_v62 = vld [vmem:[%s5789_s1 + $0xc0] sm:$0xff]  ;;  %v2228_v60 = vld [vmem:[%s5789_s1 + $0xd0] sm:$0xff]  ;;  %vm6118_vm9 = vmmov %vm6088_vm1 }
 0x3de   :  { %v2531_v46 = vsel %vm6105_vm6, %v2409_v7, 0.0  ;;  %v2419_v52 = vmul.f32 %v2362_v18, %v2227_v50  ;;  %v2230_v23 = vld [vmem:[%s5789_s1 + $0xe0] sm:$0xff]  ;;  %v2549_v0 = vadd.f32 %v2548_v4, %v2547_v42  ;;  %vm6117_vm6 = vmmov %vm6088_vm1  ;;  %v2225_v4 = vld [vmem:[%s5789_s1 + $0xb8] sm:$0xff] }
 0x3df   :  { %v2522_v21 = vrot.slane %v2521_v35, 1  ;;  %v2515_v30 = vrot.slane %v2514_v14, 1  ;;  %v2532_v25 = vrot.slane %v2531_v46, 4  ;;  %v2538_v47 = vsel %vm6110_vm4, %v2410_v51, 0.0  ;;  %vm6122_vm4 = vmmov %vm6088_vm1 }
 0x3e0   :  { %v2539_v34 = vrot.slane %v2538_v47, 4  ;;  %v2601_v29 = vsel %vm6113_vm15, %v2419_v52, 0.0  ;;  %v2550_v18 = vrot.slane %v2549_v0, 1 }
 0x3e1   :  { %v2516_v27 = vadd.f32 %v2515_v30, %v2514_v14  ;;  %v2533_v49 = vadd.f32 %v2532_v25, %v2531_v46  ;;  %v2523_v48 = vadd.f32 %v2522_v21, %v2521_v35  ;;  %v2566_v35 = vsel %vm6114_vm14, %v2414_v43, 0.0 }
 0x3e2   :  { %v2540_v5 = vadd.f32 %v2539_v34, %v2538_v47  ;;  %v2602_v14 = vrot.slane %v2601_v29, 4  ;;  %v2551_v43 = vadd.f32 %v2550_v18, %v2549_v0 }
 0x3e3   :  { %v2534_v15 = vrot.slane %v2533_v49, 2  ;;  %v2327_v16 = vpop.permute.xlu1 %2326  ;;  %v2692_v13 = vsel %vm6107_vm12, %v2516_v27, %v2691_v56  ;;  %v2567_v27 = vrot.slane %v2566_v35, 4  ;;  %vm6119_vm12 = vmmov %vm6088_vm1 }
 0x3e4   :  { %v2693_v33 = vsel %vm6109_vm3, %v2523_v48, %v2692_v13  ;;  %v2412_v6 = vmul.f32 %v2327_v16, %v2220_v28  ;;  %v2332_v10 = vpop.permute.xlu0 %2331  ;;  %v2377_v31 = vpop.permute.xlu2 %2376  ;;  %v2541_v46 = vrot.slane %v2540_v5, 2  ;;  %v2231_v16 = vld [vmem:[%s5789_s1 + $0xe8] sm:$0xff]  ;;  %vm6121_vm3 = vmmov %vm6088_vm1 }
 0x3e5   :  { %v2535_v36 = vadd.f32 %v2534_v15, %v2533_v49  ;;  %v2694_v38 = vsel %vm1688_vm7, %v2530_v41, %v2693_v33  ;;  %v2413_v55 = vmul.f32 %v2332_v10, %v2221_v32  ;;  %v2422_v57 = vmul.f32 %v2377_v31, %v2230_v23  ;;  %v2229_v15 = vld [vmem:[%s5789_s1 + $0xd8] sm:$0xff]  ;;  %vm6127_vm14 = vmmov %vm6121_vm3 }
 0x3e6   :  { %v2552_v2 = vsel %vm6088_vm1, %v2412_v6, 0.0  ;;  %v2603_v49 = vadd.f32 %v2602_v14, %v2601_v29  ;;  %v2542_v20 = vadd.f32 %v2541_v46, %v2540_v5  ;;  %v2568_v3 = vadd.f32 %v2567_v27, %v2566_v35 }
 0x3e7   :  { %v2536_v63 = vrot.slane %v2535_v36, 1  ;;  %v2553_v53 = vrot.slane %v2552_v2, 4  ;;  %v2559_v45 = vsel %vm6112_vm8, %v2413_v55, 0.0  ;;  %v2622_v13 = vsel %vm6118_vm9, %v2422_v57, 0.0 }
 0x3e8   :  { %v2560_v54 = vrot.slane %v2559_v45, 4  ;;  %v2623_v32 = vrot.slane %v2622_v13, 4  ;;  %v2569_v34 = vrot.slane %v2568_v3, 2  ;;  %vm6125_vm8 = vcmask 1043459  }
 0x3e9   :  { %v2537_v40 = vadd.f32 %v2536_v63, %v2535_v36  ;;  %v2554_v17 = vadd.f32 %v2553_v53, %v2552_v2 }
 0x3ea   :  { %v2561_v9 = vadd.f32 %v2560_v54, %v2559_v45  ;;  %v2570_v14 = vadd.f32 %v2569_v34, %v2568_v3 }
 0x3eb   :  { %v2695_v22 = vsel %vm1690_vm2, %v2537_v40, %v2694_v38  ;;  %v2342_v8 = vpop.permute.xlu1 %2341  ;;  %v2555_v25 = vrot.slane %v2554_v17, 2  ;;  %v2604_v40 = vrot.slane %v2603_v49, 2  ;;  %v2543_v38 = vrot.slane %v2542_v20, 1 }
 0x3ec   :  { %2715 = vst.msk [vmem:[%s5790_s4 + $0x8] sm:$0xff] %vm6111_vm5, %v2695_v22  ;;  %v2415_v44 = vmul.f32 %v2342_v8, %v2223_v12  ;;  %v2387_v48 = vpop.permute.xlu2 %2386  ;;  %v2562_v28 = vrot.slane %v2561_v9, 2  ;;  %v2224_v12 = vld [vmem:[%s5789_s1 + $0xb0] sm:$0xff]  ;;  %vm6123_vm5 = vmmov %vm6088_vm1  ;;  %vm6124_vm1 = vcmask 1041409   ;;  %v2571_v18 = vrot.slane %v2570_v14, 1 }
 0x3ed   :  { %v2556_v36 = vadd.f32 %v2555_v25, %v2554_v17  ;;  %v2424_v63 = vmul.f32 %v2387_v48, %v2232_v26  ;;  %v2605_v31 = vadd.f32 %v2604_v40, %v2603_v49  ;;  %vm6126_vm15 = vmmov %vm6124_vm1 }
 0x3ee   :  { %v2573_v61 = vsel %vm6117_vm6, %v2415_v44, 0.0  ;;  %v2563_v2 = vadd.f32 %v2562_v28, %v2561_v9  ;;  %vm6130_vm6 = vcmask 1045509  }
 0x3ef   :  { %v2574_v11 = vrot.slane %v2573_v61, 4  ;;  %v2557_v8 = vrot.slane %v2556_v36, 1  ;;  %v2636_v42 = vsel %vm6121_vm3, %v2424_v63, 0.0  ;;  %v2606_v46 = vrot.slane %v2605_v31, 1 }
 0x3f0   :  { %v2564_v23 = vrot.slane %v2563_v2, 1  ;;  %v2637_v17 = vrot.slane %v2636_v42, 4 }
 0x3f1   :  { %v2575_v50 = vadd.f32 %v2574_v11, %v2573_v61  ;;  %v2558_v5 = vadd.f32 %v2557_v8, %v2556_v36  ;;  %v2233_v11 = vld [vmem:[%s5789_s1 + $0xf8] sm:$0xff] }
 0x3f2   :  { %v2565_v26 = vadd.f32 %v2564_v23, %v2563_v2 }
 0x3f3   :  { %v2357_v37 = vpop.permute.xlu0 %2356  ;;  %v2367_v19 = vpop.permute.xlu1 %2366  ;;  %v2576_v29 = vrot.slane %v2575_v50, 2 }
 0x3f4   :  { %v2418_v7 = vmul.f32 %v2357_v37, %v2226_v62  ;;  %v2420_v1 = vmul.f32 %v2367_v19, %v2228_v60  ;;  %v2544_v62 = vadd.f32 %v2543_v38, %v2542_v20  ;;  %v2624_v60 = vadd.f32 %v2623_v32, %v2622_v13 }
 0x3f5   :  { %v2577_v25 = vadd.f32 %v2576_v29, %v2575_v50 }
 0x3f6   :  { %v2594_v21 = vsel %vm6115_vm10, %v2418_v7, 0.0  ;;  %v2608_v30 = vsel %vm6116_vm11, %v2420_v1, 0.0  ;;  %v2696_v61 = vsel %vm6124_vm1, %v2551_v43, %v2544_v62  ;;  %vm6128_vm10 = vcmask 1044484   ;;  %vm6129_vm11 = vmmov %vm6125_vm8 }
 0x3f7   :  { %v2595_v24 = vrot.slane %v2594_v21, 4  ;;  %v2609_v58 = vrot.slane %v2608_v30, 4  ;;  %v2697_v49 = vsel %vm1680_vm0, %v2558_v5, %v2696_v61  ;;  %v2578_v28 = vrot.slane %v2577_v25, 1  ;;  %vm6131_vm9 = vmmov %vm6128_vm10 }
 0x3f9   :  { %v2596_v56 = vadd.f32 %v2595_v24, %v2594_v21  ;;  %v2610_v51 = vadd.f32 %v2609_v58, %v2608_v30  ;;  %v2625_v30 = vrot.slane %v2624_v60, 2  ;;  %v2638_v24 = vadd.f32 %v2637_v17, %v2636_v42 }
 0x3fa   :  { %v2579_v2 = vadd.f32 %v2578_v28, %v2577_v25 }
 0x3fb   :  { %v2372_v39 = vpop.permute.xlu0 %2371  ;;  %v2382_v33 = vpop.permute.xlu1 %2381  ;;  %v2597_v10 = vrot.slane %v2596_v56, 2  ;;  %v2611_v59 = vrot.slane %v2610_v51, 2  ;;  %v2626_v36 = vadd.f32 %v2625_v30, %v2624_v60 }
 0x3fc   :  { %v2421_v41 = vmul.f32 %v2372_v39, %v2229_v15  ;;  %v2423_v6 = vmul.f32 %v2382_v33, %v2231_v16  ;;  %v2607_v39 = vadd.f32 %v2606_v46, %v2605_v31  ;;  %v2639_v33 = vrot.slane %v2638_v24, 2 }
 0x3fd   :  { %v2598_v53 = vadd.f32 %v2597_v10, %v2596_v56  ;;  %v2612_v19 = vadd.f32 %v2611_v59, %v2610_v51  ;;  %v2627_v8 = vrot.slane %v2626_v36, 1 }
 0x3fe   :  { %v2615_v22 = vsel %vm6119_vm12, %v2421_v41, 0.0  ;;  %v2629_v47 = vsel %vm6120_vm13, %v2423_v6, 0.0  ;;  %v2698_v6 = vsel %vm6125_vm8, %v2565_v26, %v2697_v49  ;;  %v2640_v34 = vadd.f32 %v2639_v33, %v2638_v24  ;;  %vm6132_vm12 = vmmov %vm6121_vm3 }
 0x3ff   :  { %v2616_v55 = vrot.slane %v2615_v22, 4  ;;  %v2630_v52 = vrot.slane %v2629_v47, 4  ;;  %v2599_v57 = vrot.slane %v2598_v53, 1  ;;  %v2613_v48 = vrot.slane %v2612_v19, 1  ;;  %vm6134_vm13 = vmmov %vm6121_vm3 }
 0x400   :  { %v2628_v60 = vadd.f32 %v2627_v8, %v2626_v36  ;;  %v2641_v17 = vrot.slane %v2640_v34, 1 }
 0x401   :  { %v2617_v45 = vadd.f32 %v2616_v55, %v2615_v22  ;;  %v2631_v7 = vadd.f32 %v2630_v52, %v2629_v47  ;;  %v2600_v15 = vadd.f32 %v2599_v57, %v2598_v53  ;;  %v2614_v3 = vadd.f32 %v2613_v48, %v2612_v19 }
 0x402   :  { %v2572_v47 = vadd.f32 %v2571_v18, %v2570_v14 }
 0x403   :  { %v2618_v54 = vrot.slane %v2617_v45, 2  ;;  %v2347_v44 = vpop.permute.xlu0 %2346  ;;  %v2352_v37 = vpop.permute.xlu1 %2351  ;;  %v2632_v56 = vrot.slane %v2631_v7, 2  ;;  %v2703_v10 = vsel %vm6126_vm15, %v2607_v39, %v2600_v15 }
 0x404   :  { %v2416_v1 = vmul.f32 %v2347_v44, %v2224_v12  ;;  %v2417_v35 = vmul.f32 %v2352_v37, %v2225_v4  ;;  %v2699_v31 = vsel %vm6128_vm10, %v2572_v47, %v2698_v6  ;;  %v2704_v53 = vsel %vm1680_vm0, %v2614_v3, %v2703_v10  ;;  %vm6133_vm0 = vmmov %vm6130_vm6 }
 0x405   :  { %v2619_v21 = vadd.f32 %v2618_v54, %v2617_v45  ;;  %v2633_v40 = vadd.f32 %v2632_v56, %v2631_v7  ;;  %v2700_v29 = vsel %vm6130_vm6, %v2579_v2, %v2699_v31 }
 0x406   :  { %v2580_v0 = vsel %vm6122_vm4, %v2416_v1, 0.0  ;;  %v2587_v9 = vsel %vm6123_vm5, %v2417_v35, 0.0  ;;  %v2642_v35 = vadd.f32 %v2641_v17, %v2640_v34 }
 0x407   :  { %v2581_v58 = vrot.slane %v2580_v0, 4  ;;  %v2588_v27 = vrot.slane %v2587_v9, 4  ;;  %v2620_v16 = vrot.slane %v2619_v21, 1  ;;  %v2634_v45 = vrot.slane %v2633_v40, 1 }
 0x409   :  { %v2582_v20 = vadd.f32 %v2581_v58, %v2580_v0  ;;  %v2589_v13 = vadd.f32 %v2588_v27, %v2587_v9  ;;  %v2621_v38 = vadd.f32 %v2620_v16, %v2619_v21  ;;  %v2635_v37 = vadd.f32 %v2634_v45, %v2633_v40 }
 0x40b   :  { %v2583_v63 = vrot.slane %v2582_v20, 2  ;;  %v2590_v51 = vrot.slane %v2589_v13, 2  ;;  %v2392_v41 = vpop.permute.xlu0 %2391  ;;  %v2705_v12 = vsel %vm6129_vm11, %v2621_v38, %v2704_v53 }
 0x40c   :  { %v2425_v32 = vmul.f32 %v2392_v41, %v2233_v11  ;;  %v2706_v54 = vsel %vm6131_vm9, %v2628_v60, %v2705_v12 }
 0x40d   :  { %v2584_v50 = vadd.f32 %v2583_v63, %v2582_v20  ;;  %v2591_v22 = vadd.f32 %v2590_v51, %v2589_v13  ;;  %v2707_v7 = vsel %vm6133_vm0, %v2635_v37, %v2706_v54 }
 0x40e   :  { %v2643_v55 = vsel %vm6127_vm14, %v2425_v32, 0.0  ;;  %v2708_v46 = vsel %vm1688_vm7, %v2642_v35, %v2707_v7 }
 0x40f   :  { %v2585_v42 = vrot.slane %v2584_v50, 1  ;;  %v2592_v59 = vrot.slane %v2591_v22, 1  ;;  %v2644_v52 = vrot.slane %v2643_v55, 4 }
 0x411   :  { %v2586_v4 = vadd.f32 %v2585_v42, %v2584_v50  ;;  %v2593_v43 = vadd.f32 %v2592_v59, %v2591_v22  ;;  %v2645_v62 = vadd.f32 %v2644_v52, %v2643_v55 }
 0x413   :  { %v2701_v5 = vsel %vm1688_vm7, %v2586_v4, %v2700_v29  ;;  %v2646_v23 = vrot.slane %v2645_v62, 2 }
 0x414   :  { %v2702_v44 = vsel %vm1690_vm2, %v2593_v43, %v2701_v5 }
 0x415   :  { %2716 = vst.msk [vmem:[%s5790_s4 + $0x10] sm:$0xff] %vm6132_vm12, %v2702_v44  ;;  %v2647_v19 = vadd.f32 %v2646_v23, %v2645_v62 }
 0x417   :  { %v2648_v1 = vrot.slane %v2647_v19, 1 }
 0x419   :  { %v2649_v14 = vadd.f32 %v2648_v1, %v2647_v19 }
 0x41b   :  { %v2709_v57 = vsel %vm1690_vm2, %v2649_v14, %v2708_v46 }
 0x41c   :  { %2717 = vst.msk [vmem:[%s5790_s4 + $0x18] sm:$0xff] %vm6134_vm13, %v2709_v57 }

</bundles_post_ra>
